<compile_context>
chip_gen: v6e
topology: v6e:2x2x1
jax: 0.10.0
libtpu: 0.0.40
codegen_flags: <defaults>
</compile_context>

<pallas_src>
import jax
import jax.numpy as jnp
from jax import lax
from jax.experimental import pallas as pl
from jax.experimental.pallas import tpu as pltpu

# ----------------------------- configuration --------------------------------
HIDDEN = 32          # hidden_size (small stand-in for 256)
N_CLASSES = 4        # n_classes
LATENT = 32          # latent_dim (== hidden so decoder hidden dims match)
VOCAB = 28           # SOS, EOS, 'a'..'z'
HC = HIDDEN + N_CLASSES          # 36 = real hidden+condition width
PAD = 128                        # lane-padded width for hidden/latent/gate/vocab
KLD_WEIGHT = 0.01                # epoch > 0 -> 0.01 + 0.01 * lw, lw == 0
NEG_INF = -1e30                  # pad-lane bias for the vocab head

SOS_TOKEN = 0
EOS_TOKEN = 1
LETTERS = {chr(ord('a') + i): i + 2 for i in range(26)}
LETTERS['SOS_token'] = SOS_TOKEN
LETTERS['EOS_token'] = EOS_TOKEN


def word_to_ids(word):
    return [LETTERS[c] for c in word]


# ----------------------------- kernel helpers --------------------------------
def _gru_gates(gi, gh, h):
    """PyTorch nn.GRU gate math on stacked lane-padded gate blocks [r|z|n].

    gi = x @ W_ih + b_ih (precomputed table row), gh = h @ W_hh + b_hh; each
    gate occupies an aligned 128-lane block.  Padding lanes of gi/gh are zero
    and h's padding lanes are zero, so h_new's padding lanes stay exactly zero:
    (1-sig(0))*tanh(0 + sig(0)*0) + sig(0)*0 == 0.
    """
    r = jax.nn.sigmoid(gi[:, :PAD] + gh[:, :PAD])
    z = jax.nn.sigmoid(gi[:, PAD:2 * PAD] + gh[:, PAD:2 * PAD])
    n = jnp.tanh(gi[:, 2 * PAD:] + r * gh[:, 2 * PAD:])
    return (1.0 - z) * n + z * h


# ----------------------------- fused CVAE kernel ------------------------------
def cvae_kernel(in_tok_ref, dec_in_ref, tgt_ref,
                h0_ref, eps_ref, c2pad_ref,
                enc_gi_ref, enc_whh_ref, enc_bhh_ref,
                muvar_w_ref, muvar_b_ref,
                dec_gi_ref, dec_whh_ref, dec_bhh_ref,
                out_w_ref, out_b_ref,
                zmu_ref, zvar_ref, gen_ref, kld_ref, loss_ref):
    lin = in_tok_ref.shape[0]
    lt = tgt_ref.shape[0]

    # ---- encoder: only the last step's hidden is ever consumed (the reference
    #      overwrites the hidden with init_hidden every iteration). ----
    tok_e = in_tok_ref[lin - 1]
    gi_e = enc_gi_ref[tok_e]                  # (1, 3*PAD) = emb[tok] @ W_ih + b_ih
    h0 = h0_ref[...]
    gh_e = (jnp.dot(h0, enc_whh_ref[...], preferred_element_type=jnp.float32)
            + enc_bhh_ref[...])
    h_enc = _gru_gates(gi_e, gh_e, h0)

    # fused mu | var head
    muvar = (jnp.dot(h_enc, muvar_w_ref[...], preferred_element_type=jnp.float32)
             + muvar_b_ref[...])              # (1, 2*PAD)
    z_mu = muvar[:, :PAD]
    z_var = muvar[:, PAD:]
    # KLD (padding lanes contribute exactly 0: 1 + 0 - 0 - exp(0)).
    kld = -0.5 * jnp.sum(1.0 + z_var - z_mu * z_mu - jnp.exp(z_var),
                         axis=-1, keepdims=True)            # (1, 1)

    # reparameterisation + concat(one_hot(condition2)) as a padded add
    x_sample = eps_ref[...] * jnp.exp(z_var * 0.5) + z_mu
    h_dec0 = x_sample + c2pad_ref[...]

    dec_whh = dec_whh_ref[...]
    dec_bhh = dec_bhh_ref[...]
    out_w = out_w_ref[...]
    out_b = out_b_ref[...]
    liota = lax.broadcasted_iota(jnp.int32, (1, PAD), 1)

    # ---- decoder: in-kernel unrolled loop (teacher forcing) ----
    def dec_step(di, carry):
        h, rcl_sum, gen = carry
        tok_d = dec_in_ref[di]
        gi = dec_gi_ref[tok_d]                               # (1, 3*PAD)
        gh = (jnp.dot(h, dec_whh, preferred_element_type=jnp.float32) + dec_bhh)
        h_new = _gru_gates(gi, gh, h)

        logits = (jnp.dot(h_new, out_w, preferred_element_type=jnp.float32)
                  + out_b)                                   # (1, 128) lane-dense
        # CrossEntropyLoss(logits, target) for batch 1: logsumexp - logits[tgt]
        m = jnp.max(logits, axis=-1, keepdims=True)
        lse = m + jnp.log(jnp.sum(jnp.exp(logits - m), axis=-1, keepdims=True))
        tgt = tgt_ref[di]
        tgt_logit = jnp.sum(jnp.where(liota == tgt, logits, 0.0),
                            axis=-1, keepdims=True)
        rcl_sum = rcl_sum + (lse - tgt_logit)                # keep (1,1) vector-side

        amax = jnp.argmax(logits, axis=-1).astype(jnp.int32)  # (1,)
        gen = jnp.where(liota == di,
                        jnp.broadcast_to(amax.reshape(1, 1), (1, PAD)), gen)
        return h_new, rcl_sum, gen

    carry0 = (h_dec0,
              jnp.zeros((1, 1), jnp.float32),
              jnp.zeros((1, PAD), jnp.int32))
    _, rcl_sum, gen = lax.fori_loop(0, lt, dec_step, carry0, unroll=True)

    # loss += KLD_weight*KLD + RCL per step  ==  sum(RCL) + lt*KLD_weight*KLD
    loss = rcl_sum + (float(lt) * KLD_WEIGHT) * kld

    # ---- single writeback of all outputs ----
    zmu_ref[...] = z_mu
    zvar_ref[...] = z_var
    gen_ref[...] = gen
    kld_ref[...] = jnp.broadcast_to(kld, (1, PAD))
    loss_ref[...] = jnp.broadcast_to(loss, (1, PAD))


# ----------------------------- parameters ------------------------------------
def make_params(key):
    """Logical (PyTorch-layout, transposed to (in, out)) parameters; GRU gates
    stacked on a leading axis of size 3 in gate order [r, z, n]."""
    def unif(k, shape, bound):
        return jax.random.uniform(k, shape, jnp.float32, -bound, bound)

    ks = jax.random.split(key, 16)
    kg = 1.0 / jnp.sqrt(HC)
    return {
        'enc_emb': jax.random.normal(ks[0], (VOCAB, HIDDEN), jnp.float32) * 0.1,
        'enc_wih': unif(ks[1], (3, HIDDEN, HC), kg),
        'enc_whh': unif(ks[2], (3, HC, HC), kg),
        'enc_bih': unif(ks[3], (3, 1, HC), kg),
        'enc_bhh': unif(ks[4], (3, 1, HC), kg),
        'mu_w': unif(ks[5], (HC, LATENT), kg),
        'mu_b': unif(ks[6], (1, LATENT), kg),
        'var_w': unif(ks[7], (HC, LATENT), kg),
        'var_b': unif(ks[8], (1, LATENT), kg),
        'dec_emb': jax.random.normal(ks[9], (VOCAB, HIDDEN), jnp.float32) * 0.1,
        'dec_wih': unif(ks[10], (3, HIDDEN, HC), kg),
        'dec_whh': unif(ks[11], (3, HC, HC), kg),
        'dec_bih': unif(ks[12], (3, 1, HC), kg),
        'dec_bhh': unif(ks[13], (3, 1, HC), kg),
        'out_w': unif(ks[14], (HC, VOCAB), kg),
        'out_b': unif(ks[15], (1, VOCAB), kg),
    }


def pack_params(p):
    """Pack-time fusion: stack the 3 GRU gates into lane-padded blocks, fold
    embedding @ W_ih + b_ih into per-token gi tables, pad mu|var and output
    heads to full 128-lane blocks (zero padding except out_b -> -1e30)."""
    def stack_w(w3, rows):
        in_dim = w3.shape[1]
        out = jnp.zeros((rows, 3 * PAD), jnp.float32)
        for g in range(3):
            out = out.at[:in_dim, g * PAD:g * PAD + HC].set(w3[g])
        return out

    def stack_b(b3):
        out = jnp.zeros((1, 3 * PAD), jnp.float32)
        for g in range(3):
            out = out.at[:, g * PAD:g * PAD + HC].set(b3[g])
        return out

    def gi_table(emb, wih3, bih3):
        wih = stack_w(wih3, HIDDEN)                   # (HIDDEN, 3*PAD)
        bih = stack_b(bih3)                           # (1, 3*PAD)
        tbl = emb @ wih + bih                         # (VOCAB, 3*PAD)
        return tbl.reshape(VOCAB, 1, 3 * PAD)

    muvar_w = jnp.zeros((PAD, 2 * PAD), jnp.float32)
    muvar_w = muvar_w.at[:HC, :LATENT].set(p['mu_w'])
    muvar_w = muvar_w.at[:HC, PAD:PAD + LATENT].set(p['var_w'])
    muvar_b = jnp.zeros((1, 2 * PAD), jnp.float32)
    muvar_b = muvar_b.at[:, :LATENT].set(p['mu_b'])
    muvar_b = muvar_b.at[:, PAD:PAD + LATENT].set(p['var_b'])

    out_w = jnp.zeros((PAD, PAD), jnp.float32).at[:HC, :VOCAB].set(p['out_w'])
    # padding lanes of the bias MUST be very negative so logsumexp / argmax
    # over the full 128-lane vreg ignore them.
    out_b = jnp.full((1, PAD), NEG_INF, jnp.float32).at[:, :VOCAB].set(p['out_b'])

    return dict(
        enc_gi=gi_table(p['enc_emb'], p['enc_wih'], p['enc_bih']),
        dec_gi=gi_table(p['dec_emb'], p['dec_wih'], p['dec_bih']),
        enc_whh=stack_w(p['enc_whh'], PAD), enc_bhh=stack_b(p['enc_bhh']),
        dec_whh=stack_w(p['dec_whh'], PAD), dec_bhh=stack_b(p['dec_bhh']),
        muvar_w=muvar_w, muvar_b=muvar_b, out_w=out_w, out_b=out_b)


# ----------------------------- CVAE forward -----------------------------------
def cvae_forward(packed, input_word, condition1, condition2, target_word, key):
    in_ids = jnp.asarray(word_to_ids(input_word), dtype=jnp.int32)
    tgt_py = word_to_ids(target_word)
    tgt_ids = jnp.asarray(tgt_py, dtype=jnp.int32)
    # teacher forcing: decoder inputs are [SOS, target[:-1]]
    dec_in = jnp.asarray([SOS_TOKEN] + tgt_py[:-1], dtype=jnp.int32)
    lt = len(tgt_py)

    # init hidden = zeros(1, HIDDEN) ++ one_hot(condition1), lane-padded to 128
    h0 = jnp.zeros((1, PAD), jnp.float32).at[0, HIDDEN + condition1].set(1.0)
    # one_hot(condition2) placed right after the latent-sample lanes
    c2pad = jnp.zeros((1, PAD), jnp.float32).at[0, LATENT + condition2].set(1.0)
    # reparameterisation noise; pad lanes zero so padded x_sample lanes stay 0
    eps = jnp.zeros((1, PAD), jnp.float32).at[0, :LATENT].set(
        jax.random.normal(key, (LATENT,), jnp.float32))

    vmem = pl.BlockSpec(memory_space=pltpu.MemorySpace.VMEM)
    smem = pl.BlockSpec(memory_space=pltpu.MemorySpace.SMEM)

    out_shape = (
        jax.ShapeDtypeStruct((1, PAD), jnp.float32),   # z_mu (lane-padded)
        jax.ShapeDtypeStruct((1, PAD), jnp.float32),   # z_var (lane-padded)
        jax.ShapeDtypeStruct((1, PAD), jnp.int32),     # generated tokens (lane=step)
        jax.ShapeDtypeStruct((1, PAD), jnp.float32),   # KLD (broadcast)
        jax.ShapeDtypeStruct((1, PAD), jnp.float32),   # loss (broadcast)
    )

    zmu_p, zvar_p, gen_p, kld_p, loss_p = pl.pallas_call(
        cvae_kernel,
        out_shape=out_shape,
        # no grid: single invocation, decoder loop lives inside the kernel
        in_specs=[
            smem, smem, smem,            # encoder ids, decoder inputs, targets
            vmem, vmem, vmem,            # h0, eps, c2pad
            vmem, vmem, vmem,            # enc gi table, enc W_hh, enc b_hh
            vmem, vmem,                  # fused mu|var head
            vmem, vmem, vmem,            # dec gi table, dec W_hh, dec b_hh
            vmem, vmem,                  # output head (128-lane padded)
        ],
        out_specs=(vmem,) * 5,
    )(in_ids, dec_in, tgt_ids, h0, eps, c2pad,
      packed['enc_gi'], packed['enc_whh'], packed['enc_bhh'],
      packed['muvar_w'], packed['muvar_b'],
      packed['dec_gi'], packed['dec_whh'], packed['dec_bhh'],
      packed['out_w'], packed['out_b'])

    generated_x = gen_p[0, :lt]          # (target_length,) argmax tokens
    z_mu = zmu_p[:, :LATENT]
    z_var = zvar_p[:, :LATENT]
    return generated_x, z_mu, z_var, kld_p[0, 0], loss_p[0, 0]


# ----------------------------- main -------------------------------------------
if __name__ == "__main__":
    key = jax.random.PRNGKey(0)
    pkey, ekey = jax.random.split(key)
    params = make_params(pkey)
    packed = pack_params(params)

    input_word = "hello"     # length 5
    target_word = "helped"   # length 6
    condition1 = 1
    condition2 = 2

    generated_x, z_mu, z_var, kld, loss = cvae_forward(
        packed, input_word, condition1, condition2, target_word, ekey)

    jax.block_until_ready((generated_x, z_mu, z_var, kld, loss))
    print("KERNEL_OK")
</pallas_src>

<mosaic_0001>
module attributes {stable_mosaic.version = 11 : i64} {
  func.func @cvae_kernel(%arg0: memref<5xi32, #tpu.memory_space<smem>>, %arg1: memref<6xi32, #tpu.memory_space<smem>>, %arg2: memref<6xi32, #tpu.memory_space<smem>>, %arg3: memref<1x128xf32, #tpu.memory_space<vmem>>, %arg4: memref<1x128xf32, #tpu.memory_space<vmem>>, %arg5: memref<1x128xf32, #tpu.memory_space<vmem>>, %arg6: memref<28x1x384xf32, #tpu.memory_space<vmem>>, %arg7: memref<128x384xf32, #tpu.memory_space<vmem>>, %arg8: memref<1x384xf32, #tpu.memory_space<vmem>>, %arg9: memref<128x256xf32, #tpu.memory_space<vmem>>, %arg10: memref<1x256xf32, #tpu.memory_space<vmem>>, %arg11: memref<28x1x384xf32, #tpu.memory_space<vmem>>, %arg12: memref<128x384xf32, #tpu.memory_space<vmem>>, %arg13: memref<1x384xf32, #tpu.memory_space<vmem>>, %arg14: memref<128x128xf32, #tpu.memory_space<vmem>>, %arg15: memref<1x128xf32, #tpu.memory_space<vmem>>, %arg16: memref<1x128xf32, #tpu.memory_space<vmem>>, %arg17: memref<1x128xf32, #tpu.memory_space<vmem>>, %arg18: memref<1x128xi32, #tpu.memory_space<vmem>>, %arg19: memref<1x128xf32, #tpu.memory_space<vmem>>, %arg20: memref<1x128xf32, #tpu.memory_space<vmem>>) attributes {dimension_semantics = [], scalar_prefetch = 0 : i64, scratch_operands = 0 : i64, tpu.core_type = #tpu.core_type<tc>} {
    %c4 = arith.constant 4 : index
    %0 = memref.load %arg0[%c4] : memref<5xi32, #tpu.memory_space<smem>>
    %1 = arith.index_cast %0 : i32 to index
    %c0 = arith.constant 0 : index
    %c0_0 = arith.constant 0 : index
    %2 = vector.load %arg6[%1, %c0, %c0_0] : memref<28x1x384xf32, #tpu.memory_space<vmem>>, vector<1x1x384xf32>
    %3 = vector.shape_cast %2 : vector<1x1x384xf32> to vector<1x384xf32>
    %c0_1 = arith.constant 0 : index
    %c0_2 = arith.constant 0 : index
    %4 = vector.load %arg3[%c0_1, %c0_2] : memref<1x128xf32, #tpu.memory_space<vmem>>, vector<1x128xf32>
    %c0_3 = arith.constant 0 : index
    %c0_4 = arith.constant 0 : index
    %5 = vector.load %arg7[%c0_3, %c0_4] : memref<128x384xf32, #tpu.memory_space<vmem>>, vector<128x384xf32>
    %cst = arith.constant dense<0.000000e+00> : vector<1x384xf32>
    %6 = tpu.matmul %4, %5, %cst {dimension_numbers = #tpu.dot_dimension_numbers<[1], [0], [0], [1], [0, 0, 1, 1], [], []>} : vector<1x128xf32>, vector<128x384xf32>, vector<1x384xf32> -> vector<1x384xf32>
    %c0_5 = arith.constant 0 : index
    %c0_6 = arith.constant 0 : index
    %7 = vector.load %arg8[%c0_5, %c0_6] : memref<1x384xf32, #tpu.memory_space<vmem>>, vector<1x384xf32>
    %8 = arith.addf %6, %7 : vector<1x384xf32>
    %9 = vector.extract_strided_slice %3 {offsets = [0, 0], sizes = [1, 128], strides = [1, 1]} : vector<1x384xf32> to vector<1x128xf32>
    %10 = vector.extract_strided_slice %8 {offsets = [0, 0], sizes = [1, 128], strides = [1, 1]} : vector<1x384xf32> to vector<1x128xf32>
    %11 = arith.addf %9, %10 : vector<1x128xf32>
    %12 = arith.negf %11 : vector<1x128xf32>
    %13 = math.exp %12 : vector<1x128xf32>
    %cst_7 = arith.constant 1.000000e+00 : f32
    %14 = vector.broadcast %cst_7 : f32 to vector<1x128xf32>
    %15 = arith.addf %14, %13 : vector<1x128xf32>
    %16 = arith.divf %14, %15 : vector<1x128xf32>
    %17 = vector.extract_strided_slice %3 {offsets = [0, 128], sizes = [1, 128], strides = [1, 1]} : vector<1x384xf32> to vector<1x128xf32>
    %18 = vector.extract_strided_slice %8 {offsets = [0, 128], sizes = [1, 128], strides = [1, 1]} : vector<1x384xf32> to vector<1x128xf32>
    %19 = arith.addf %17, %18 : vector<1x128xf32>
    %20 = arith.negf %19 : vector<1x128xf32>
    %21 = math.exp %20 : vector<1x128xf32>
    %cst_8 = arith.constant 1.000000e+00 : f32
    %22 = vector.broadcast %cst_8 : f32 to vector<1x128xf32>
    %23 = arith.addf %22, %21 : vector<1x128xf32>
    %24 = arith.divf %22, %23 : vector<1x128xf32>
    %25 = vector.extract_strided_slice %3 {offsets = [0, 256], sizes = [1, 128], strides = [1, 1]} : vector<1x384xf32> to vector<1x128xf32>
    %26 = vector.extract_strided_slice %8 {offsets = [0, 256], sizes = [1, 128], strides = [1, 1]} : vector<1x384xf32> to vector<1x128xf32>
    %27 = arith.mulf %16, %26 : vector<1x128xf32>
    %28 = arith.addf %25, %27 : vector<1x128xf32>
    %29 = math.tanh %28 : vector<1x128xf32>
    %cst_9 = arith.constant 1.000000e+00 : f32
    %30 = vector.broadcast %cst_9 : f32 to vector<1x128xf32>
    %31 = arith.subf %30, %24 : vector<1x128xf32>
    %32 = arith.mulf %31, %29 : vector<1x128xf32>
    %33 = arith.mulf %24, %4 : vector<1x128xf32>
    %34 = arith.addf %32, %33 : vector<1x128xf32>
    %c0_10 = arith.constant 0 : index
    %c0_11 = arith.constant 0 : index
    %35 = vector.load %arg9[%c0_10, %c0_11] : memref<128x256xf32, #tpu.memory_space<vmem>>, vector<128x256xf32>
    %cst_12 = arith.constant dense<0.000000e+00> : vector<1x256xf32>
    %36 = tpu.matmul %34, %35, %cst_12 {dimension_numbers = #tpu.dot_dimension_numbers<[1], [0], [0], [1], [0, 0, 1, 1], [], []>} : vector<1x128xf32>, vector<128x256xf32>, vector<1x256xf32> -> vector<1x256xf32>
    %c0_13 = arith.constant 0 : index
    %c0_14 = arith.constant 0 : index
    %37 = vector.load %arg10[%c0_13, %c0_14] : memref<1x256xf32, #tpu.memory_space<vmem>>, vector<1x256xf32>
    %38 = arith.addf %36, %37 : vector<1x256xf32>
    %39 = vector.extract_strided_slice %38 {offsets = [0, 0], sizes = [1, 128], strides = [1, 1]} : vector<1x256xf32> to vector<1x128xf32>
    %40 = vector.extract_strided_slice %38 {offsets = [0, 128], sizes = [1, 128], strides = [1, 1]} : vector<1x256xf32> to vector<1x128xf32>
    %cst_15 = arith.constant 1.000000e+00 : f32
    %41 = vector.broadcast %cst_15 : f32 to vector<1x128xf32>
    %42 = arith.addf %41, %40 : vector<1x128xf32>
    %43 = arith.mulf %39, %39 : vector<1x128xf32>
    %44 = arith.subf %42, %43 : vector<1x128xf32>
    %45 = math.exp %40 : vector<1x128xf32>
    %46 = arith.subf %44, %45 : vector<1x128xf32>
    %cst_16 = arith.constant dense<0.000000e+00> : vector<1xf32>
    %47 = vector.multi_reduction <add>, %46, %cst_16 [1] : vector<1x128xf32> to vector<1xf32>
    %48 = vector.shape_cast %47 : vector<1xf32> to vector<1x1xf32>
    %cst_17 = arith.constant -5.000000e-01 : f32
    %49 = vector.broadcast %cst_17 : f32 to vector<1x1xf32>
    %50 = arith.mulf %49, %48 : vector<1x1xf32>
    %c0_18 = arith.constant 0 : index
    %c0_19 = arith.constant 0 : index
    %51 = vector.load %arg4[%c0_18, %c0_19] : memref<1x128xf32, #tpu.memory_space<vmem>>, vector<1x128xf32>
    %cst_20 = arith.constant 5.000000e-01 : f32
    %52 = vector.broadcast %cst_20 : f32 to vector<1x128xf32>
    %53 = arith.mulf %40, %52 : vector<1x128xf32>
    %54 = math.exp %53 : vector<1x128xf32>
    %55 = arith.mulf %51, %54 : vector<1x128xf32>
    %56 = arith.addf %55, %39 : vector<1x128xf32>
    %c0_21 = arith.constant 0 : index
    %c0_22 = arith.constant 0 : index
    %57 = vector.load %arg5[%c0_21, %c0_22] : memref<1x128xf32, #tpu.memory_space<vmem>>, vector<1x128xf32>
    %58 = arith.addf %56, %57 : vector<1x128xf32>
    %c0_23 = arith.constant 0 : index
    %c0_24 = arith.constant 0 : index
    %59 = vector.load %arg12[%c0_23, %c0_24] : memref<128x384xf32, #tpu.memory_space<vmem>>, vector<128x384xf32>
    %c0_25 = arith.constant 0 : index
    %c0_26 = arith.constant 0 : index
    %60 = vector.load %arg13[%c0_25, %c0_26] : memref<1x384xf32, #tpu.memory_space<vmem>>, vector<1x384xf32>
    %c0_27 = arith.constant 0 : index
    %c0_28 = arith.constant 0 : index
    %61 = vector.load %arg14[%c0_27, %c0_28] : memref<128x128xf32, #tpu.memory_space<vmem>>, vector<128x128xf32>
    %c0_29 = arith.constant 0 : index
    %c0_30 = arith.constant 0 : index
    %62 = vector.load %arg15[%c0_29, %c0_30] : memref<1x128xf32, #tpu.memory_space<vmem>>, vector<1x128xf32>
    %63 = tpu.iota {dimensions = array<i32: 1>} : vector<1x128xi32>
    %cst_31 = arith.constant 0.000000e+00 : f32
    %64 = vector.broadcast %cst_31 : f32 to vector<1x1xf32>
    %c0_i32 = arith.constant 0 : i32
    %65 = vector.broadcast %c0_i32 : i32 to vector<1x128xi32>
    %c0_i32_32 = arith.constant 0 : i32
    %66 = arith.index_cast %c0_i32_32 : i32 to index
    %67 = memref.load %arg1[%66] : memref<6xi32, #tpu.memory_space<smem>>
    %68 = arith.index_cast %67 : i32 to index
    %c0_33 = arith.constant 0 : index
    %c0_34 = arith.constant 0 : index
    %69 = vector.load %arg11[%68, %c0_33, %c0_34] : memref<28x1x384xf32, #tpu.memory_space<vmem>>, vector<1x1x384xf32>
    %70 = vector.shape_cast %69 : vector<1x1x384xf32> to vector<1x384xf32>
    %cst_35 = arith.constant dense<0.000000e+00> : vector<1x384xf32>
    %71 = tpu.matmul %58, %59, %cst_35 {dimension_numbers = #tpu.dot_dimension_numbers<[1], [0], [0], [1], [0, 0, 1, 1], [], []>} : vector<1x128xf32>, vector<128x384xf32>, vector<1x384xf32> -> vector<1x384xf32>
    %72 = arith.addf %71, %60 : vector<1x384xf32>
    %73 = vector.extract_strided_slice %70 {offsets = [0, 0], sizes = [1, 128], strides = [1, 1]} : vector<1x384xf32> to vector<1x128xf32>
    %74 = vector.extract_strided_slice %72 {offsets = [0, 0], sizes = [1, 128], strides = [1, 1]} : vector<1x384xf32> to vector<1x128xf32>
    %75 = arith.addf %73, %74 : vector<1x128xf32>
    %76 = arith.negf %75 : vector<1x128xf32>
    %77 = math.exp %76 : vector<1x128xf32>
    %cst_36 = arith.constant 1.000000e+00 : f32
    %78 = vector.broadcast %cst_36 : f32 to vector<1x128xf32>
    %79 = arith.addf %78, %77 : vector<1x128xf32>
    %80 = arith.divf %78, %79 : vector<1x128xf32>
    %81 = vector.extract_strided_slice %70 {offsets = [0, 128], sizes = [1, 128], strides = [1, 1]} : vector<1x384xf32> to vector<1x128xf32>
    %82 = vector.extract_strided_slice %72 {offsets = [0, 128], sizes = [1, 128], strides = [1, 1]} : vector<1x384xf32> to vector<1x128xf32>
    %83 = arith.addf %81, %82 : vector<1x128xf32>
    %84 = arith.negf %83 : vector<1x128xf32>
    %85 = math.exp %84 : vector<1x128xf32>
    %cst_37 = arith.constant 1.000000e+00 : f32
    %86 = vector.broadcast %cst_37 : f32 to vector<1x128xf32>
    %87 = arith.addf %86, %85 : vector<1x128xf32>
    %88 = arith.divf %86, %87 : vector<1x128xf32>
    %89 = vector.extract_strided_slice %70 {offsets = [0, 256], sizes = [1, 128], strides = [1, 1]} : vector<1x384xf32> to vector<1x128xf32>
    %90 = vector.extract_strided_slice %72 {offsets = [0, 256], sizes = [1, 128], strides = [1, 1]} : vector<1x384xf32> to vector<1x128xf32>
    %91 = arith.mulf %80, %90 : vector<1x128xf32>
    %92 = arith.addf %89, %91 : vector<1x128xf32>
    %93 = math.tanh %92 : vector<1x128xf32>
    %cst_38 = arith.constant 1.000000e+00 : f32
    %94 = vector.broadcast %cst_38 : f32 to vector<1x128xf32>
    %95 = arith.subf %94, %88 : vector<1x128xf32>
    %96 = arith.mulf %95, %93 : vector<1x128xf32>
    %97 = arith.mulf %88, %58 : vector<1x128xf32>
    %98 = arith.addf %96, %97 : vector<1x128xf32>
    %cst_39 = arith.constant dense<0.000000e+00> : vector<1x128xf32>
    %99 = tpu.matmul %98, %61, %cst_39 {dimension_numbers = #tpu.dot_dimension_numbers<[1], [0], [0], [1], [0, 0, 1, 1], [], []>} : vector<1x128xf32>, vector<128x128xf32>, vector<1x128xf32> -> vector<1x128xf32>
    %100 = arith.addf %99, %62 : vector<1x128xf32>
    %cst_40 = arith.constant dense<0xFF800000> : vector<1xf32>
    %101 = vector.multi_reduction <maximumf>, %100, %cst_40 [1] : vector<1x128xf32> to vector<1xf32>
    %102 = vector.shape_cast %101 : vector<1xf32> to vector<1x1xf32>
    %103 = vector.broadcast %102 : vector<1x1xf32> to vector<1x128xf32>
    %104 = arith.subf %100, %103 : vector<1x128xf32>
    %105 = math.exp %104 : vector<1x128xf32>
    %cst_41 = arith.constant dense<0.000000e+00> : vector<1xf32>
    %106 = vector.multi_reduction <add>, %105, %cst_41 [1] : vector<1x128xf32> to vector<1xf32>
    %107 = vector.shape_cast %106 : vector<1xf32> to vector<1x1xf32>
    %108 = math.log %107 : vector<1x1xf32>
    %109 = arith.addf %102, %108 : vector<1x1xf32>
    %110 = arith.index_cast %c0_i32_32 : i32 to index
    %111 = memref.load %arg2[%110] : memref<6xi32, #tpu.memory_space<smem>>
    %112 = vector.broadcast %111 : i32 to vector<1x128xi32>
    %113 = arith.cmpi eq, %63, %112 : vector<1x128xi32>
    %cst_42 = arith.constant 0.000000e+00 : f32
    %114 = vector.broadcast %cst_42 : f32 to vector<1x128xf32>
    %115 = arith.select %113, %100, %114 : vector<1x128xi1>, vector<1x128xf32>
    %cst_43 = arith.constant dense<0.000000e+00> : vector<1xf32>
    %116 = vector.multi_reduction <add>, %115, %cst_43 [1] : vector<1x128xf32> to vector<1xf32>
    %117 = vector.shape_cast %116 : vector<1xf32> to vector<1x1xf32>
    %118 = arith.subf %109, %117 : vector<1x1xf32>
    %119 = arith.addf %64, %118 : vector<1x1xf32>
    %120 = tpu.reduce_index %100 {axis = 1 : i32, kind = #tpu.reduction_kind<arg_max>} : vector<1x128xf32> -> vector<1xi32>
    %121 = vector.broadcast %c0_i32_32 : i32 to vector<1x128xi32>
    %122 = arith.cmpi eq, %63, %121 : vector<1x128xi32>
    %123 = vector.shape_cast %120 : vector<1xi32> to vector<1x1xi32>
    %124 = vector.shape_cast %123 : vector<1x1xi32> to vector<1x1xi32>
    %125 = vector.broadcast %124 : vector<1x1xi32> to vector<1x128xi32>
    %126 = arith.select %122, %125, %65 : vector<1x128xi1>, vector<1x128xi32>
    %c1_i32 = arith.constant 1 : i32
    %127 = arith.index_cast %c1_i32 : i32 to index
    %128 = memref.load %arg1[%127] : memref<6xi32, #tpu.memory_space<smem>>
    %129 = arith.index_cast %128 : i32 to index
    %c0_44 = arith.constant 0 : index
    %c0_45 = arith.constant 0 : index
    %130 = vector.load %arg11[%129, %c0_44, %c0_45] : memref<28x1x384xf32, #tpu.memory_space<vmem>>, vector<1x1x384xf32>
    %131 = vector.shape_cast %130 : vector<1x1x384xf32> to vector<1x384xf32>
    %cst_46 = arith.constant dense<0.000000e+00> : vector<1x384xf32>
    %132 = tpu.matmul %98, %59, %cst_46 {dimension_numbers = #tpu.dot_dimension_numbers<[1], [0], [0], [1], [0, 0, 1, 1], [], []>} : vector<1x128xf32>, vector<128x384xf32>, vector<1x384xf32> -> vector<1x384xf32>
    %133 = arith.addf %132, %60 : vector<1x384xf32>
    %134 = vector.extract_strided_slice %131 {offsets = [0, 0], sizes = [1, 128], strides = [1, 1]} : vector<1x384xf32> to vector<1x128xf32>
    %135 = vector.extract_strided_slice %133 {offsets = [0, 0], sizes = [1, 128], strides = [1, 1]} : vector<1x384xf32> to vector<1x128xf32>
    %136 = arith.addf %134, %135 : vector<1x128xf32>
    %137 = arith.negf %136 : vector<1x128xf32>
    %138 = math.exp %137 : vector<1x128xf32>
    %cst_47 = arith.constant 1.000000e+00 : f32
    %139 = vector.broadcast %cst_47 : f32 to vector<1x128xf32>
    %140 = arith.addf %139, %138 : vector<1x128xf32>
    %141 = arith.divf %139, %140 : vector<1x128xf32>
    %142 = vector.extract_strided_slice %131 {offsets = [0, 128], sizes = [1, 128], strides = [1, 1]} : vector<1x384xf32> to vector<1x128xf32>
    %143 = vector.extract_strided_slice %133 {offsets = [0, 128], sizes = [1, 128], strides = [1, 1]} : vector<1x384xf32> to vector<1x128xf32>
    %144 = arith.addf %142, %143 : vector<1x128xf32>
    %145 = arith.negf %144 : vector<1x128xf32>
    %146 = math.exp %145 : vector<1x128xf32>
    %cst_48 = arith.constant 1.000000e+00 : f32
    %147 = vector.broadcast %cst_48 : f32 to vector<1x128xf32>
    %148 = arith.addf %147, %146 : vector<1x128xf32>
    %149 = arith.divf %147, %148 : vector<1x128xf32>
    %150 = vector.extract_strided_slice %131 {offsets = [0, 256], sizes = [1, 128], strides = [1, 1]} : vector<1x384xf32> to vector<1x128xf32>
    %151 = vector.extract_strided_slice %133 {offsets = [0, 256], sizes = [1, 128], strides = [1, 1]} : vector<1x384xf32> to vector<1x128xf32>
    %152 = arith.mulf %141, %151 : vector<1x128xf32>
    %153 = arith.addf %150, %152 : vector<1x128xf32>
    %154 = math.tanh %153 : vector<1x128xf32>
    %cst_49 = arith.constant 1.000000e+00 : f32
    %155 = vector.broadcast %cst_49 : f32 to vector<1x128xf32>
    %156 = arith.subf %155, %149 : vector<1x128xf32>
    %157 = arith.mulf %156, %154 : vector<1x128xf32>
    %158 = arith.mulf %149, %98 : vector<1x128xf32>
    %159 = arith.addf %157, %158 : vector<1x128xf32>
    %cst_50 = arith.constant dense<0.000000e+00> : vector<1x128xf32>
    %160 = tpu.matmul %159, %61, %cst_50 {dimension_numbers = #tpu.dot_dimension_numbers<[1], [0], [0], [1], [0, 0, 1, 1], [], []>} : vector<1x128xf32>, vector<128x128xf32>, vector<1x128xf32> -> vector<1x128xf32>
    %161 = arith.addf %160, %62 : vector<1x128xf32>
    %cst_51 = arith.constant dense<0xFF800000> : vector<1xf32>
    %162 = vector.multi_reduction <maximumf>, %161, %cst_51 [1] : vector<1x128xf32> to vector<1xf32>
    %163 = vector.shape_cast %162 : vector<1xf32> to vector<1x1xf32>
    %164 = vector.broadcast %163 : vector<1x1xf32> to vector<1x128xf32>
    %165 = arith.subf %161, %164 : vector<1x128xf32>
    %166 = math.exp %165 : vector<1x128xf32>
    %cst_52 = arith.constant dense<0.000000e+00> : vector<1xf32>
    %167 = vector.multi_reduction <add>, %166, %cst_52 [1] : vector<1x128xf32> to vector<1xf32>
    %168 = vector.shape_cast %167 : vector<1xf32> to vector<1x1xf32>
    %169 = math.log %168 : vector<1x1xf32>
    %170 = arith.addf %163, %169 : vector<1x1xf32>
    %171 = arith.index_cast %c1_i32 : i32 to index
    %172 = memref.load %arg2[%171] : memref<6xi32, #tpu.memory_space<smem>>
    %173 = vector.broadcast %172 : i32 to vector<1x128xi32>
    %174 = arith.cmpi eq, %63, %173 : vector<1x128xi32>
    %cst_53 = arith.constant 0.000000e+00 : f32
    %175 = vector.broadcast %cst_53 : f32 to vector<1x128xf32>
    %176 = arith.select %174, %161, %175 : vector<1x128xi1>, vector<1x128xf32>
    %cst_54 = arith.constant dense<0.000000e+00> : vector<1xf32>
    %177 = vector.multi_reduction <add>, %176, %cst_54 [1] : vector<1x128xf32> to vector<1xf32>
    %178 = vector.shape_cast %177 : vector<1xf32> to vector<1x1xf32>
    %179 = arith.subf %170, %178 : vector<1x1xf32>
    %180 = arith.addf %119, %179 : vector<1x1xf32>
    %181 = tpu.reduce_index %161 {axis = 1 : i32, kind = #tpu.reduction_kind<arg_max>} : vector<1x128xf32> -> vector<1xi32>
    %182 = vector.broadcast %c1_i32 : i32 to vector<1x128xi32>
    %183 = arith.cmpi eq, %63, %182 : vector<1x128xi32>
    %184 = vector.shape_cast %181 : vector<1xi32> to vector<1x1xi32>
    %185 = vector.shape_cast %184 : vector<1x1xi32> to vector<1x1xi32>
    %186 = vector.broadcast %185 : vector<1x1xi32> to vector<1x128xi32>
    %187 = arith.select %183, %186, %126 : vector<1x128xi1>, vector<1x128xi32>
    %c2_i32 = arith.constant 2 : i32
    %188 = arith.index_cast %c2_i32 : i32 to index
    %189 = memref.load %arg1[%188] : memref<6xi32, #tpu.memory_space<smem>>
    %190 = arith.index_cast %189 : i32 to index
    %c0_55 = arith.constant 0 : index
    %c0_56 = arith.constant 0 : index
    %191 = vector.load %arg11[%190, %c0_55, %c0_56] : memref<28x1x384xf32, #tpu.memory_space<vmem>>, vector<1x1x384xf32>
    %192 = vector.shape_cast %191 : vector<1x1x384xf32> to vector<1x384xf32>
    %cst_57 = arith.constant dense<0.000000e+00> : vector<1x384xf32>
    %193 = tpu.matmul %159, %59, %cst_57 {dimension_numbers = #tpu.dot_dimension_numbers<[1], [0], [0], [1], [0, 0, 1, 1], [], []>} : vector<1x128xf32>, vector<128x384xf32>, vector<1x384xf32> -> vector<1x384xf32>
    %194 = arith.addf %193, %60 : vector<1x384xf32>
    %195 = vector.extract_strided_slice %192 {offsets = [0, 0], sizes = [1, 128], strides = [1, 1]} : vector<1x384xf32> to vector<1x128xf32>
    %196 = vector.extract_strided_slice %194 {offsets = [0, 0], sizes = [1, 128], strides = [1, 1]} : vector<1x384xf32> to vector<1x128xf32>
    %197 = arith.addf %195, %196 : vector<1x128xf32>
    %198 = arith.negf %197 : vector<1x128xf32>
    %199 = math.exp %198 : vector<1x128xf32>
    %cst_58 = arith.constant 1.000000e+00 : f32
    %200 = vector.broadcast %cst_58 : f32 to vector<1x128xf32>
    %201 = arith.addf %200, %199 : vector<1x128xf32>
    %202 = arith.divf %200, %201 : vector<1x128xf32>
    %203 = vector.extract_strided_slice %192 {offsets = [0, 128], sizes = [1, 128], strides = [1, 1]} : vector<1x384xf32> to vector<1x128xf32>
    %204 = vector.extract_strided_slice %194 {offsets = [0, 128], sizes = [1, 128], strides = [1, 1]} : vector<1x384xf32> to vector<1x128xf32>
    %205 = arith.addf %203, %204 : vector<1x128xf32>
    %206 = arith.negf %205 : vector<1x128xf32>
    %207 = math.exp %206 : vector<1x128xf32>
    %cst_59 = arith.constant 1.000000e+00 : f32
    %208 = vector.broadcast %cst_59 : f32 to vector<1x128xf32>
    %209 = arith.addf %208, %207 : vector<1x128xf32>
    %210 = arith.divf %208, %209 : vector<1x128xf32>
    %211 = vector.extract_strided_slice %192 {offsets = [0, 256], sizes = [1, 128], strides = [1, 1]} : vector<1x384xf32> to vector<1x128xf32>
    %212 = vector.extract_strided_slice %194 {offsets = [0, 256], sizes = [1, 128], strides = [1, 1]} : vector<1x384xf32> to vector<1x128xf32>
    %213 = arith.mulf %202, %212 : vector<1x128xf32>
    %214 = arith.addf %211, %213 : vector<1x128xf32>
    %215 = math.tanh %214 : vector<1x128xf32>
    %cst_60 = arith.constant 1.000000e+00 : f32
    %216 = vector.broadcast %cst_60 : f32 to vector<1x128xf32>
    %217 = arith.subf %216, %210 : vector<1x128xf32>
    %218 = arith.mulf %217, %215 : vector<1x128xf32>
    %219 = arith.mulf %210, %159 : vector<1x128xf32>
    %220 = arith.addf %218, %219 : vector<1x128xf32>
    %cst_61 = arith.constant dense<0.000000e+00> : vector<1x128xf32>
    %221 = tpu.matmul %220, %61, %cst_61 {dimension_numbers = #tpu.dot_dimension_numbers<[1], [0], [0], [1], [0, 0, 1, 1], [], []>} : vector<1x128xf32>, vector<128x128xf32>, vector<1x128xf32> -> vector<1x128xf32>
    %222 = arith.addf %221, %62 : vector<1x128xf32>
    %cst_62 = arith.constant dense<0xFF800000> : vector<1xf32>
    %223 = vector.multi_reduction <maximumf>, %222, %cst_62 [1] : vector<1x128xf32> to vector<1xf32>
    %224 = vector.shape_cast %223 : vector<1xf32> to vector<1x1xf32>
    %225 = vector.broadcast %224 : vector<1x1xf32> to vector<1x128xf32>
    %226 = arith.subf %222, %225 : vector<1x128xf32>
    %227 = math.exp %226 : vector<1x128xf32>
    %cst_63 = arith.constant dense<0.000000e+00> : vector<1xf32>
    %228 = vector.multi_reduction <add>, %227, %cst_63 [1] : vector<1x128xf32> to vector<1xf32>
    %229 = vector.shape_cast %228 : vector<1xf32> to vector<1x1xf32>
    %230 = math.log %229 : vector<1x1xf32>
    %231 = arith.addf %224, %230 : vector<1x1xf32>
    %232 = arith.index_cast %c2_i32 : i32 to index
    %233 = memref.load %arg2[%232] : memref<6xi32, #tpu.memory_space<smem>>
    %234 = vector.broadcast %233 : i32 to vector<1x128xi32>
    %235 = arith.cmpi eq, %63, %234 : vector<1x128xi32>
    %cst_64 = arith.constant 0.000000e+00 : f32
    %236 = vector.broadcast %cst_64 : f32 to vector<1x128xf32>
    %237 = arith.select %235, %222, %236 : vector<1x128xi1>, vector<1x128xf32>
    %cst_65 = arith.constant dense<0.000000e+00> : vector<1xf32>
    %238 = vector.multi_reduction <add>, %237, %cst_65 [1] : vector<1x128xf32> to vector<1xf32>
    %239 = vector.shape_cast %238 : vector<1xf32> to vector<1x1xf32>
    %240 = arith.subf %231, %239 : vector<1x1xf32>
    %241 = arith.addf %180, %240 : vector<1x1xf32>
    %242 = tpu.reduce_index %222 {axis = 1 : i32, kind = #tpu.reduction_kind<arg_max>} : vector<1x128xf32> -> vector<1xi32>
    %243 = vector.broadcast %c2_i32 : i32 to vector<1x128xi32>
    %244 = arith.cmpi eq, %63, %243 : vector<1x128xi32>
    %245 = vector.shape_cast %242 : vector<1xi32> to vector<1x1xi32>
    %246 = vector.shape_cast %245 : vector<1x1xi32> to vector<1x1xi32>
    %247 = vector.broadcast %246 : vector<1x1xi32> to vector<1x128xi32>
    %248 = arith.select %244, %247, %187 : vector<1x128xi1>, vector<1x128xi32>
    %c3_i32 = arith.constant 3 : i32
    %249 = arith.index_cast %c3_i32 : i32 to index
    %250 = memref.load %arg1[%249] : memref<6xi32, #tpu.memory_space<smem>>
    %251 = arith.index_cast %250 : i32 to index
    %c0_66 = arith.constant 0 : index
    %c0_67 = arith.constant 0 : index
    %252 = vector.load %arg11[%251, %c0_66, %c0_67] : memref<28x1x384xf32, #tpu.memory_space<vmem>>, vector<1x1x384xf32>
    %253 = vector.shape_cast %252 : vector<1x1x384xf32> to vector<1x384xf32>
    %cst_68 = arith.constant dense<0.000000e+00> : vector<1x384xf32>
    %254 = tpu.matmul %220, %59, %cst_68 {dimension_numbers = #tpu.dot_dimension_numbers<[1], [0], [0], [1], [0, 0, 1, 1], [], []>} : vector<1x128xf32>, vector<128x384xf32>, vector<1x384xf32> -> vector<1x384xf32>
    %255 = arith.addf %254, %60 : vector<1x384xf32>
    %256 = vector.extract_strided_slice %253 {offsets = [0, 0], sizes = [1, 128], strides = [1, 1]} : vector<1x384xf32> to vector<1x128xf32>
    %257 = vector.extract_strided_slice %255 {offsets = [0, 0], sizes = [1, 128], strides = [1, 1]} : vector<1x384xf32> to vector<1x128xf32>
    %258 = arith.addf %256, %257 : vector<1x128xf32>
    %259 = arith.negf %258 : vector<1x128xf32>
    %260 = math.exp %259 : vector<1x128xf32>
    %cst_69 = arith.constant 1.000000e+00 : f32
    %261 = vector.broadcast %cst_69 : f32 to vector<1x128xf32>
    %262 = arith.addf %261, %260 : vector<1x128xf32>
    %263 = arith.divf %261, %262 : vector<1x128xf32>
    %264 = vector.extract_strided_slice %253 {offsets = [0, 128], sizes = [1, 128], strides = [1, 1]} : vector<1x384xf32> to vector<1x128xf32>
    %265 = vector.extract_strided_slice %255 {offsets = [0, 128], sizes = [1, 128], strides = [1, 1]} : vector<1x384xf32> to vector<1x128xf32>
    %266 = arith.addf %264, %265 : vector<1x128xf32>
    %267 = arith.negf %266 : vector<1x128xf32>
    %268 = math.exp %267 : vector<1x128xf32>
    %cst_70 = arith.constant 1.000000e+00 : f32
    %269 = vector.broadcast %cst_70 : f32 to vector<1x128xf32>
    %270 = arith.addf %269, %268 : vector<1x128xf32>
    %271 = arith.divf %269, %270 : vector<1x128xf32>
    %272 = vector.extract_strided_slice %253 {offsets = [0, 256], sizes = [1, 128], strides = [1, 1]} : vector<1x384xf32> to vector<1x128xf32>
    %273 = vector.extract_strided_slice %255 {offsets = [0, 256], sizes = [1, 128], strides = [1, 1]} : vector<1x384xf32> to vector<1x128xf32>
    %274 = arith.mulf %263, %273 : vector<1x128xf32>
    %275 = arith.addf %272, %274 : vector<1x128xf32>
    %276 = math.tanh %275 : vector<1x128xf32>
    %cst_71 = arith.constant 1.000000e+00 : f32
    %277 = vector.broadcast %cst_71 : f32 to vector<1x128xf32>
    %278 = arith.subf %277, %271 : vector<1x128xf32>
    %279 = arith.mulf %278, %276 : vector<1x128xf32>
    %280 = arith.mulf %271, %220 : vector<1x128xf32>
    %281 = arith.addf %279, %280 : vector<1x128xf32>
    %cst_72 = arith.constant dense<0.000000e+00> : vector<1x128xf32>
    %282 = tpu.matmul %281, %61, %cst_72 {dimension_numbers = #tpu.dot_dimension_numbers<[1], [0], [0], [1], [0, 0, 1, 1], [], []>} : vector<1x128xf32>, vector<128x128xf32>, vector<1x128xf32> -> vector<1x128xf32>
    %283 = arith.addf %282, %62 : vector<1x128xf32>
    %cst_73 = arith.constant dense<0xFF800000> : vector<1xf32>
    %284 = vector.multi_reduction <maximumf>, %283, %cst_73 [1] : vector<1x128xf32> to vector<1xf32>
    %285 = vector.shape_cast %284 : vector<1xf32> to vector<1x1xf32>
    %286 = vector.broadcast %285 : vector<1x1xf32> to vector<1x128xf32>
    %287 = arith.subf %283, %286 : vector<1x128xf32>
    %288 = math.exp %287 : vector<1x128xf32>
    %cst_74 = arith.constant dense<0.000000e+00> : vector<1xf32>
    %289 = vector.multi_reduction <add>, %288, %cst_74 [1] : vector<1x128xf32> to vector<1xf32>
    %290 = vector.shape_cast %289 : vector<1xf32> to vector<1x1xf32>
    %291 = math.log %290 : vector<1x1xf32>
    %292 = arith.addf %285, %291 : vector<1x1xf32>
    %293 = arith.index_cast %c3_i32 : i32 to index
    %294 = memref.load %arg2[%293] : memref<6xi32, #tpu.memory_space<smem>>
    %295 = vector.broadcast %294 : i32 to vector<1x128xi32>
    %296 = arith.cmpi eq, %63, %295 : vector<1x128xi32>
    %cst_75 = arith.constant 0.000000e+00 : f32
    %297 = vector.broadcast %cst_75 : f32 to vector<1x128xf32>
    %298 = arith.select %296, %283, %297 : vector<1x128xi1>, vector<1x128xf32>
    %cst_76 = arith.constant dense<0.000000e+00> : vector<1xf32>
    %299 = vector.multi_reduction <add>, %298, %cst_76 [1] : vector<1x128xf32> to vector<1xf32>
    %300 = vector.shape_cast %299 : vector<1xf32> to vector<1x1xf32>
    %301 = arith.subf %292, %300 : vector<1x1xf32>
    %302 = arith.addf %241, %301 : vector<1x1xf32>
    %303 = tpu.reduce_index %283 {axis = 1 : i32, kind = #tpu.reduction_kind<arg_max>} : vector<1x128xf32> -> vector<1xi32>
    %304 = vector.broadcast %c3_i32 : i32 to vector<1x128xi32>
    %305 = arith.cmpi eq, %63, %304 : vector<1x128xi32>
    %306 = vector.shape_cast %303 : vector<1xi32> to vector<1x1xi32>
    %307 = vector.shape_cast %306 : vector<1x1xi32> to vector<1x1xi32>
    %308 = vector.broadcast %307 : vector<1x1xi32> to vector<1x128xi32>
    %309 = arith.select %305, %308, %248 : vector<1x128xi1>, vector<1x128xi32>
    %c4_i32 = arith.constant 4 : i32
    %310 = arith.index_cast %c4_i32 : i32 to index
    %311 = memref.load %arg1[%310] : memref<6xi32, #tpu.memory_space<smem>>
    %312 = arith.index_cast %311 : i32 to index
    %c0_77 = arith.constant 0 : index
    %c0_78 = arith.constant 0 : index
    %313 = vector.load %arg11[%312, %c0_77, %c0_78] : memref<28x1x384xf32, #tpu.memory_space<vmem>>, vector<1x1x384xf32>
    %314 = vector.shape_cast %313 : vector<1x1x384xf32> to vector<1x384xf32>
    %cst_79 = arith.constant dense<0.000000e+00> : vector<1x384xf32>
    %315 = tpu.matmul %281, %59, %cst_79 {dimension_numbers = #tpu.dot_dimension_numbers<[1], [0], [0], [1], [0, 0, 1, 1], [], []>} : vector<1x128xf32>, vector<128x384xf32>, vector<1x384xf32> -> vector<1x384xf32>
    %316 = arith.addf %315, %60 : vector<1x384xf32>
    %317 = vector.extract_strided_slice %314 {offsets = [0, 0], sizes = [1, 128], strides = [1, 1]} : vector<1x384xf32> to vector<1x128xf32>
    %318 = vector.extract_strided_slice %316 {offsets = [0, 0], sizes = [1, 128], strides = [1, 1]} : vector<1x384xf32> to vector<1x128xf32>
    %319 = arith.addf %317, %318 : vector<1x128xf32>
    %320 = arith.negf %319 : vector<1x128xf32>
    %321 = math.exp %320 : vector<1x128xf32>
    %cst_80 = arith.constant 1.000000e+00 : f32
    %322 = vector.broadcast %cst_80 : f32 to vector<1x128xf32>
    %323 = arith.addf %322, %321 : vector<1x128xf32>
    %324 = arith.divf %322, %323 : vector<1x128xf32>
    %325 = vector.extract_strided_slice %314 {offsets = [0, 128], sizes = [1, 128], strides = [1, 1]} : vector<1x384xf32> to vector<1x128xf32>
    %326 = vector.extract_strided_slice %316 {offsets = [0, 128], sizes = [1, 128], strides = [1, 1]} : vector<1x384xf32> to vector<1x128xf32>
    %327 = arith.addf %325, %326 : vector<1x128xf32>
    %328 = arith.negf %327 : vector<1x128xf32>
    %329 = math.exp %328 : vector<1x128xf32>
    %cst_81 = arith.constant 1.000000e+00 : f32
    %330 = vector.broadcast %cst_81 : f32 to vector<1x128xf32>
    %331 = arith.addf %330, %329 : vector<1x128xf32>
    %332 = arith.divf %330, %331 : vector<1x128xf32>
    %333 = vector.extract_strided_slice %314 {offsets = [0, 256], sizes = [1, 128], strides = [1, 1]} : vector<1x384xf32> to vector<1x128xf32>
    %334 = vector.extract_strided_slice %316 {offsets = [0, 256], sizes = [1, 128], strides = [1, 1]} : vector<1x384xf32> to vector<1x128xf32>
    %335 = arith.mulf %324, %334 : vector<1x128xf32>
    %336 = arith.addf %333, %335 : vector<1x128xf32>
    %337 = math.tanh %336 : vector<1x128xf32>
    %cst_82 = arith.constant 1.000000e+00 : f32
    %338 = vector.broadcast %cst_82 : f32 to vector<1x128xf32>
    %339 = arith.subf %338, %332 : vector<1x128xf32>
    %340 = arith.mulf %339, %337 : vector<1x128xf32>
    %341 = arith.mulf %332, %281 : vector<1x128xf32>
    %342 = arith.addf %340, %341 : vector<1x128xf32>
    %cst_83 = arith.constant dense<0.000000e+00> : vector<1x128xf32>
    %343 = tpu.matmul %342, %61, %cst_83 {dimension_numbers = #tpu.dot_dimension_numbers<[1], [0], [0], [1], [0, 0, 1, 1], [], []>} : vector<1x128xf32>, vector<128x128xf32>, vector<1x128xf32> -> vector<1x128xf32>
    %344 = arith.addf %343, %62 : vector<1x128xf32>
    %cst_84 = arith.constant dense<0xFF800000> : vector<1xf32>
    %345 = vector.multi_reduction <maximumf>, %344, %cst_84 [1] : vector<1x128xf32> to vector<1xf32>
    %346 = vector.shape_cast %345 : vector<1xf32> to vector<1x1xf32>
    %347 = vector.broadcast %346 : vector<1x1xf32> to vector<1x128xf32>
    %348 = arith.subf %344, %347 : vector<1x128xf32>
    %349 = math.exp %348 : vector<1x128xf32>
    %cst_85 = arith.constant dense<0.000000e+00> : vector<1xf32>
    %350 = vector.multi_reduction <add>, %349, %cst_85 [1] : vector<1x128xf32> to vector<1xf32>
    %351 = vector.shape_cast %350 : vector<1xf32> to vector<1x1xf32>
    %352 = math.log %351 : vector<1x1xf32>
    %353 = arith.addf %346, %352 : vector<1x1xf32>
    %354 = arith.index_cast %c4_i32 : i32 to index
    %355 = memref.load %arg2[%354] : memref<6xi32, #tpu.memory_space<smem>>
    %356 = vector.broadcast %355 : i32 to vector<1x128xi32>
    %357 = arith.cmpi eq, %63, %356 : vector<1x128xi32>
    %cst_86 = arith.constant 0.000000e+00 : f32
    %358 = vector.broadcast %cst_86 : f32 to vector<1x128xf32>
    %359 = arith.select %357, %344, %358 : vector<1x128xi1>, vector<1x128xf32>
    %cst_87 = arith.constant dense<0.000000e+00> : vector<1xf32>
    %360 = vector.multi_reduction <add>, %359, %cst_87 [1] : vector<1x128xf32> to vector<1xf32>
    %361 = vector.shape_cast %360 : vector<1xf32> to vector<1x1xf32>
    %362 = arith.subf %353, %361 : vector<1x1xf32>
    %363 = arith.addf %302, %362 : vector<1x1xf32>
    %364 = tpu.reduce_index %344 {axis = 1 : i32, kind = #tpu.reduction_kind<arg_max>} : vector<1x128xf32> -> vector<1xi32>
    %365 = vector.broadcast %c4_i32 : i32 to vector<1x128xi32>
    %366 = arith.cmpi eq, %63, %365 : vector<1x128xi32>
    %367 = vector.shape_cast %364 : vector<1xi32> to vector<1x1xi32>
    %368 = vector.shape_cast %367 : vector<1x1xi32> to vector<1x1xi32>
    %369 = vector.broadcast %368 : vector<1x1xi32> to vector<1x128xi32>
    %370 = arith.select %366, %369, %309 : vector<1x128xi1>, vector<1x128xi32>
    %c5_i32 = arith.constant 5 : i32
    %371 = arith.index_cast %c5_i32 : i32 to index
    %372 = memref.load %arg1[%371] : memref<6xi32, #tpu.memory_space<smem>>
    %373 = arith.index_cast %372 : i32 to index
    %c0_88 = arith.constant 0 : index
    %c0_89 = arith.constant 0 : index
    %374 = vector.load %arg11[%373, %c0_88, %c0_89] : memref<28x1x384xf32, #tpu.memory_space<vmem>>, vector<1x1x384xf32>
    %375 = vector.shape_cast %374 : vector<1x1x384xf32> to vector<1x384xf32>
    %cst_90 = arith.constant dense<0.000000e+00> : vector<1x384xf32>
    %376 = tpu.matmul %342, %59, %cst_90 {dimension_numbers = #tpu.dot_dimension_numbers<[1], [0], [0], [1], [0, 0, 1, 1], [], []>} : vector<1x128xf32>, vector<128x384xf32>, vector<1x384xf32> -> vector<1x384xf32>
    %377 = arith.addf %376, %60 : vector<1x384xf32>
    %378 = vector.extract_strided_slice %375 {offsets = [0, 0], sizes = [1, 128], strides = [1, 1]} : vector<1x384xf32> to vector<1x128xf32>
    %379 = vector.extract_strided_slice %377 {offsets = [0, 0], sizes = [1, 128], strides = [1, 1]} : vector<1x384xf32> to vector<1x128xf32>
    %380 = arith.addf %378, %379 : vector<1x128xf32>
    %381 = arith.negf %380 : vector<1x128xf32>
    %382 = math.exp %381 : vector<1x128xf32>
    %cst_91 = arith.constant 1.000000e+00 : f32
    %383 = vector.broadcast %cst_91 : f32 to vector<1x128xf32>
    %384 = arith.addf %383, %382 : vector<1x128xf32>
    %385 = arith.divf %383, %384 : vector<1x128xf32>
    %386 = vector.extract_strided_slice %375 {offsets = [0, 128], sizes = [1, 128], strides = [1, 1]} : vector<1x384xf32> to vector<1x128xf32>
    %387 = vector.extract_strided_slice %377 {offsets = [0, 128], sizes = [1, 128], strides = [1, 1]} : vector<1x384xf32> to vector<1x128xf32>
    %388 = arith.addf %386, %387 : vector<1x128xf32>
    %389 = arith.negf %388 : vector<1x128xf32>
    %390 = math.exp %389 : vector<1x128xf32>
    %cst_92 = arith.constant 1.000000e+00 : f32
    %391 = vector.broadcast %cst_92 : f32 to vector<1x128xf32>
    %392 = arith.addf %391, %390 : vector<1x128xf32>
    %393 = arith.divf %391, %392 : vector<1x128xf32>
    %394 = vector.extract_strided_slice %375 {offsets = [0, 256], sizes = [1, 128], strides = [1, 1]} : vector<1x384xf32> to vector<1x128xf32>
    %395 = vector.extract_strided_slice %377 {offsets = [0, 256], sizes = [1, 128], strides = [1, 1]} : vector<1x384xf32> to vector<1x128xf32>
    %396 = arith.mulf %385, %395 : vector<1x128xf32>
    %397 = arith.addf %394, %396 : vector<1x128xf32>
    %398 = math.tanh %397 : vector<1x128xf32>
    %cst_93 = arith.constant 1.000000e+00 : f32
    %399 = vector.broadcast %cst_93 : f32 to vector<1x128xf32>
    %400 = arith.subf %399, %393 : vector<1x128xf32>
    %401 = arith.mulf %400, %398 : vector<1x128xf32>
    %402 = arith.mulf %393, %342 : vector<1x128xf32>
    %403 = arith.addf %401, %402 : vector<1x128xf32>
    %cst_94 = arith.constant dense<0.000000e+00> : vector<1x128xf32>
    %404 = tpu.matmul %403, %61, %cst_94 {dimension_numbers = #tpu.dot_dimension_numbers<[1], [0], [0], [1], [0, 0, 1, 1], [], []>} : vector<1x128xf32>, vector<128x128xf32>, vector<1x128xf32> -> vector<1x128xf32>
    %405 = arith.addf %404, %62 : vector<1x128xf32>
    %cst_95 = arith.constant dense<0xFF800000> : vector<1xf32>
    %406 = vector.multi_reduction <maximumf>, %405, %cst_95 [1] : vector<1x128xf32> to vector<1xf32>
    %407 = vector.shape_cast %406 : vector<1xf32> to vector<1x1xf32>
    %408 = vector.broadcast %407 : vector<1x1xf32> to vector<1x128xf32>
    %409 = arith.subf %405, %408 : vector<1x128xf32>
    %410 = math.exp %409 : vector<1x128xf32>
    %cst_96 = arith.constant dense<0.000000e+00> : vector<1xf32>
    %411 = vector.multi_reduction <add>, %410, %cst_96 [1] : vector<1x128xf32> to vector<1xf32>
    %412 = vector.shape_cast %411 : vector<1xf32> to vector<1x1xf32>
    %413 = math.log %412 : vector<1x1xf32>
    %414 = arith.addf %407, %413 : vector<1x1xf32>
    %415 = arith.index_cast %c5_i32 : i32 to index
    %416 = memref.load %arg2[%415] : memref<6xi32, #tpu.memory_space<smem>>
    %417 = vector.broadcast %416 : i32 to vector<1x128xi32>
    %418 = arith.cmpi eq, %63, %417 : vector<1x128xi32>
    %cst_97 = arith.constant 0.000000e+00 : f32
    %419 = vector.broadcast %cst_97 : f32 to vector<1x128xf32>
    %420 = arith.select %418, %405, %419 : vector<1x128xi1>, vector<1x128xf32>
    %cst_98 = arith.constant dense<0.000000e+00> : vector<1xf32>
    %421 = vector.multi_reduction <add>, %420, %cst_98 [1] : vector<1x128xf32> to vector<1xf32>
    %422 = vector.shape_cast %421 : vector<1xf32> to vector<1x1xf32>
    %423 = arith.subf %414, %422 : vector<1x1xf32>
    %424 = arith.addf %363, %423 : vector<1x1xf32>
    %425 = tpu.reduce_index %405 {axis = 1 : i32, kind = #tpu.reduction_kind<arg_max>} : vector<1x128xf32> -> vector<1xi32>
    %426 = vector.broadcast %c5_i32 : i32 to vector<1x128xi32>
    %427 = arith.cmpi eq, %63, %426 : vector<1x128xi32>
    %428 = vector.shape_cast %425 : vector<1xi32> to vector<1x1xi32>
    %429 = vector.shape_cast %428 : vector<1x1xi32> to vector<1x1xi32>
    %430 = vector.broadcast %429 : vector<1x1xi32> to vector<1x128xi32>
    %431 = arith.select %427, %430, %370 : vector<1x128xi1>, vector<1x128xi32>
    %c6_i32 = arith.constant 6 : i32
    %cst_99 = arith.constant 6.000000e-02 : f32
    %432 = vector.broadcast %cst_99 : f32 to vector<1x1xf32>
    %433 = arith.mulf %432, %50 : vector<1x1xf32>
    %434 = arith.addf %424, %433 : vector<1x1xf32>
    %c0_100 = arith.constant 0 : index
    %c0_101 = arith.constant 0 : index
    %435 = vector.load %arg16[%c0_100, %c0_101] : memref<1x128xf32, #tpu.memory_space<vmem>>, vector<1x128xf32>
    tpu.vector_store %arg16[%c0_100, %c0_101], %39 {strides = array<i32>} : memref<1x128xf32, #tpu.memory_space<vmem>>, vector<1x128xf32>,
    %c0_102 = arith.constant 0 : index
    %c0_103 = arith.constant 0 : index
    %436 = vector.load %arg17[%c0_102, %c0_103] : memref<1x128xf32, #tpu.memory_space<vmem>>, vector<1x128xf32>
    tpu.vector_store %arg17[%c0_102, %c0_103], %40 {strides = array<i32>} : memref<1x128xf32, #tpu.memory_space<vmem>>, vector<1x128xf32>,
    %c0_104 = arith.constant 0 : index
    %c0_105 = arith.constant 0 : index
    %437 = vector.load %arg18[%c0_104, %c0_105] : memref<1x128xi32, #tpu.memory_space<vmem>>, vector<1x128xi32>
    tpu.vector_store %arg18[%c0_104, %c0_105], %431 {strides = array<i32>} : memref<1x128xi32, #tpu.memory_space<vmem>>, vector<1x128xi32>,
    %438 = vector.shape_cast %50 : vector<1x1xf32> to vector<1x1xf32>
    %439 = vector.broadcast %438 : vector<1x1xf32> to vector<1x128xf32>
    %c0_106 = arith.constant 0 : index
    %c0_107 = arith.constant 0 : index
    %440 = vector.load %arg19[%c0_106, %c0_107] : memref<1x128xf32, #tpu.memory_space<vmem>>, vector<1x128xf32>
    tpu.vector_store %arg19[%c0_106, %c0_107], %439 {strides = array<i32>} : memref<1x128xf32, #tpu.memory_space<vmem>>, vector<1x128xf32>,
    %441 = vector.shape_cast %434 : vector<1x1xf32> to vector<1x1xf32>
    %442 = vector.broadcast %441 : vector<1x1xf32> to vector<1x128xf32>
    %c0_108 = arith.constant 0 : index
    %c0_109 = arith.constant 0 : index
    %443 = vector.load %arg20[%c0_108, %c0_109] : memref<1x128xf32, #tpu.memory_space<vmem>>, vector<1x128xf32>
    tpu.vector_store %arg20[%c0_108, %c0_109], %442 {strides = array<i32>} : memref<1x128xf32, #tpu.memory_space<vmem>>, vector<1x128xf32>,
    return
  }
}

</mosaic_0001>

<bundles_post_ra>
// kernel: tpu_custom_call.1
= control target key start
LH: loop header
LB: loop body
LE: loop exit
PB: predicated region body
PF: predicated region fallthrough
CT: control target
= control target key end

     0   :  { %s4871_s0 = inlined_call_operand.hbm [shape: s32[5], index: 0, kind: input, shape index: {}]   ;;  %s4872_s1 = inlined_call_operand.vmem [shape: s32[6], index: 1, kind: input, shape index: {}]   ;;  %s4873_s2 = inlined_call_operand.hbm [shape: s32[6], index: 2, kind: input, shape index: {}]   ;;  %s4874_s3 = inlined_call_operand.hbm [shape: f32[1,128], index: 3, kind: input, shape index: {}]   ;;  %s4875_s4 = inlined_call_operand.hbm [shape: f32[1,128], index: 4, kind: input, shape index: {}]   ;;  %s4876_s5 = inlined_call_operand.hbm [shape: f32[1,128], index: 5, kind: input, shape index: {}]   ;;  %s4877_s6 = inlined_call_operand.hbm [shape: f32[28,1,384], index: 6, kind: input, shape index: {}]   ;;  %s4878_s7 = inlined_call_operand.hbm [shape: f32[128,384], index: 7, kind: input, shape index: {}]   ;;  %s4879_s8 = inlined_call_operand.vmem [shape: f32[1,384], index: 8, kind: input, shape index: {}]   ;;  %s4880_s9 = inlined_call_operand.hbm [shape: f32[128,256], index: 9, kind: input, shape index: {}]   ;;  %s4881_s10 = inlined_call_operand.vmem [shape: f32[1,256], index: 10, kind: input, shape index: {}]   ;;  %s4882_s11 = inlined_call_operand.hbm [shape: f32[28,1,384], index: 11, kind: input, shape index: {}]   ;;  %s4883_s12 = inlined_call_operand.hbm [shape: f32[128,384], index: 12, kind: input, shape index: {}]   ;;  %s4884_s13 = inlined_call_operand.vmem [shape: f32[1,384], index: 13, kind: input, shape index: {}]   ;;  %s4885_s14 = inlined_call_operand.hbm [shape: f32[128,128], index: 14, kind: input, shape index: {}]   ;;  %s4886_s15 = inlined_call_operand.vmem [shape: f32[1,128], index: 15, kind: input, shape index: {}]   ;;  %s4887_s16 = inlined_call_operand.hbm [shape: f32[1,128], index: 16, kind: output, shape index: {0}]   ;;  %s4888_s17 = inlined_call_operand.hbm [shape: f32[1,128], index: 17, kind: output, shape index: {1}]   ;;  %s4889_s18 = inlined_call_operand.hbm [shape: s32[1,128], index: 18, kind: output, shape index: {2}]   ;;  %s4890_s19 = inlined_call_operand.hbm [shape: f32[1,128], index: 19, kind: output, shape index: {3}]   ;;  %s4891_s20 = inlined_call_operand.hbm [shape: f32[1,128], index: 20, kind: output, shape index: {4}]  }
   0x1   :  { %4961 = sst [smem:[#allocation67_spill]] %s4871_s0 }
   0x2   :  { %4962 = sst [smem:[#allocation68_spill]] %s4872_s1 }
   0x3   :  { %4963 = sst [smem:[#allocation69_spill]] %s4873_s2 }
   0x4   :  { %4964 = sst [smem:[#allocation70_spill]] %s4874_s3 }
   0x5   :  { %4965 = sst [smem:[#allocation71_spill]] %s4875_s4 }
   0x6   :  { %26 = vsyncpa [#allocation5], 0 }
   0x7   :  { %27 = vsyncpa [#allocation6], 0 }
   0x8   :  { %28 = vsyncpa [#allocation9], 0 }
   0x9   :  { %29 = vsyncpa [#allocation3], 0 }
   0xa   :  { %30 = vsyncpa [#allocation12], 0 }
   0xb   :  { %31 = vsyncpa [#allocation15], 0 }
   0xc   :  { %32 = vsyncpa [#allocation18], 0 }
   0xd   :  { %33 = vsyncpa [#allocation21], 0 }
   0xe   :  { %34 = vsyncpa [#allocation4], 0 }
   0xf   :  { %35 = vsyncpa [#allocation25], 0 }
  0x10   :  { %36 = vsyncpa [#allocation28], 0  ;;  %s3579_s1 = smov [#allocation11]   ;;  %s3580_s23 = smov [#allocation14]  }
  0x11   :  { %s79_s22 = sshll.u32 %s3579_s1, 4  ;;  %s98_s24 = sshll.u32 %s3580_s23, 4  ;;  %s80_s22 = int_to_ptr.vmem [resolvable:$true] %s79_s22  ;;  %s99_s24 = int_to_ptr.vmem [resolvable:$true] %s98_s24 }
  0x12   :  { %s3257_s2 = scalar_lea.vmem %s80_s22, 16  ;;  %s3261_s25 = scalar_lea.vmem %s80_s22, 32 }
  0x13   :  { %p3258_p0 = scmp.ne.s32.totalorder %s80_s22, %s3257_s2  ;;  %p3262_p1 = scmp.lt.s32.totalorder %s80_s22, %s80_s22 }
  0x14   :  { %p3263_p2 = scmp.lt.s32.totalorder %s3261_s25, %s3257_s2 }
  0x16   :  { %p3264_p3 = por %p3263_p2, %p3262_p1 }
  0x18   :  { %p3265_p4 = pnand %p3264_p3, %p3258_p0 }
  0x1a   :  { %3268 = shalt.err (!%p3265_p4)
}
  0x1b   :  { %s4966_s27 = sld [smem:[#allocation71_spill]]  ;;  %s3277_s28 = scalar_lea.vmem %s99_s24, 1344 }
  0x1c   :  { %p3278_p5 = scmp.ne.s32.totalorder %s99_s24, %s3277_s28  ;;  %p3282_p6 = scmp.lt.s32.totalorder %s99_s24, %s99_s24 }
  0x1d   :  { %p3283_p7 = scmp.lt.s32.totalorder %s3277_s28, %s3277_s28 }
  0x1f   :  { %p3284_p8 = por %p3283_p7, %p3282_p6 }
  0x21   :  { %82 = dma.hbm_to_vmem [thread:$0]  %s4966_s27, 16, %s80_s22, [#allocation12]  }
  0x22   :  { %p3285_p9 = pnand %p3284_p8, %p3278_p5 }
  0x24   :  { %3288 = shalt.err (!%p3285_p9)
}
  0x25   :  { %s3581_s4 = smov 48   ;;  %s3582_s29 = smov 3  }
  0x26   :  { %104 = dma.hbm_to_vmem [thread:$0]  %s4877_s6, 1344, %s99_s24, [#allocation15], %s3581_s4, %s3581_s4, %s3582_s29  }
  0x27   :  { %s3583_s21 = smov [#allocation17]  }
  0x28   :  { %s124_s1 = sshll.u32 %s3583_s21, 4  ;;  %s125_s1 = int_to_ptr.vmem [resolvable:$true] %s124_s1 }
  0x29   :  { %s3297_s22 = scalar_lea.vmem %s125_s1, 4096  ;;  %p3302_p11 = scmp.lt.s32.totalorder %s125_s1, %s125_s1 }
  0x2a   :  { %p3298_p10 = scmp.ne.s32.totalorder %s125_s1, %s3297_s22  ;;  %p3303_p12 = scmp.lt.s32.totalorder %s3297_s22, %s3297_s22 }
  0x2c   :  { %p3304_p13 = por %p3303_p12, %p3302_p11 }
  0x2e   :  { %p3305_p0 = pnand %p3304_p13, %p3298_p10 }
  0x30   :  { %3308 = shalt.err (!%p3305_p0)
}
  0x31   :  { %s3584_s23 = smov 256   ;;  %s3585_s2 = smov 16  }
  0x32   :  { %130 = dma.hbm_to_vmem [thread:$0]  %s4880_s9, 4096, %s125_s1, [#allocation18], %s3584_s23, %s3584_s23, %s3585_s2  }
  0x33   :  { %s3586_s26 = smov [#allocation20]   ;;  %s4967_s28 = sld [smem:[#allocation68_spill]] }
  0x34   :  { %s150_s27 = sshll.u32 %s3586_s26, 4  ;;  %s151_s27 = int_to_ptr.vmem [resolvable:$true] %s150_s27 }
  0x35   :  { %s3317_s0 = scalar_lea.vmem %s151_s27, 6144  ;;  %p3322_p2 = scmp.lt.s32.totalorder %s151_s27, %s151_s27 }
  0x36   :  { %p3318_p1 = scmp.ne.s32.totalorder %s151_s27, %s3317_s0  ;;  %p3323_p3 = scmp.lt.s32.totalorder %s3317_s0, %s3317_s0 }
  0x38   :  { %p3324_p4 = por %p3323_p3, %p3322_p2 }
  0x39   :  { %s51_s30 = sshll.u32 %s4967_s28, 4  ;;  %s52_s30 = int_to_ptr.vmem [resolvable:$true] %s51_s30 }
  0x3a   :  { %p3325_p5 = pnand %p3324_p4, %p3318_p1 }
  0x3c   :  { %3328 = shalt.err (!%p3325_p5)
}
  0x3d   :  { %s3587_s21 = smov 384   ;;  %s3588_s22 = smov 24  }
  0x3e   :  { %156 = dma.hbm_to_vmem [thread:$0]  %s4883_s12, 6144, %s151_s27, [#allocation21], %s3587_s21, %s3587_s21, %s3588_s22  }
  0x3f   :  { %s3589_s23 = smov [#allocation2]   ;;  %s4968_s3 = sld [smem:[#allocation67_spill]] }
  0x40   :  { %s3337_s26 = scalar_lea.vmem %s52_s30, 16  ;;  %p3342_p7 = scmp.lt.s32.totalorder %s52_s30, %s52_s30 }
  0x41   :  { %p3338_p6 = scmp.ne.s32.totalorder %s52_s30, %s3337_s26  ;;  %p3343_p8 = scmp.lt.s32.totalorder %s3337_s26, %s3337_s26 }
  0x43   :  { %p3344_p9 = por %p3343_p8, %p3342_p7 }
  0x45   :  { %44 = dma.hbm_to_smem %s4968_s3, 16, %s3589_s23, [#allocation5]  }
  0x46   :  { %p3345_p10 = pnand %p3344_p9, %p3338_p6 }
  0x48   :  { %3348 = shalt.err (!%p3345_p10)
}
  0x49   :  { %s3590_s6 = smov [#allocation7]   ;;  %s3591_s24 = smov [#allocation8]  }
  0x4a   :  { %54 = dma.vmem_to_smem %s52_s30, 16, %s3590_s6, [#allocation6]  }
  0x4b   :  { %s4969_s9 = sld [smem:[#allocation69_spill]]  ;;  %s3592_s12 = smov [#allocation10]  }
  0x4c   :  { %s69_s27 = sshll.u32 %s3592_s12, 4  ;;  %s3593_s1 = smov [#allocation13]   ;;  %s70_s27 = int_to_ptr.vmem [resolvable:$true] %s69_s27 }
  0x4d   :  { %s89_s23 = sshll.u32 %s3593_s1, 4  ;;  %s3365_s2 = scalar_lea.vmem %s70_s27, 16  ;;  %s90_s23 = int_to_ptr.vmem [resolvable:$true] %s89_s23 }
  0x4e   :  { %p3366_p11 = scmp.ne.s32.totalorder %s70_s27, %s3365_s2  ;;  %s3369_s25 = scalar_lea.vmem %s70_s27, 32 }
  0x4f   :  { %p3370_p12 = scmp.lt.s32.totalorder %s70_s27, %s70_s27  ;;  %p3371_p13 = scmp.lt.s32.totalorder %s3369_s25, %s3365_s2 }
  0x51   :  { %62 = dma.hbm_to_smem %s4969_s9, 16, %s3591_s24, [#allocation9]  }
  0x52   :  { %p3372_p0 = por %p3371_p13, %p3370_p12 }
  0x54   :  { %p3373_p1 = pnand %p3372_p0, %p3366_p11 }
  0x56   :  { %3376 = shalt.err (!%p3373_p1)
}
  0x57   :  { %s4970_s26 = sld [smem:[#allocation70_spill]]  ;;  %s3385_s6 = scalar_lea.vmem %s90_s23, 16 }
  0x58   :  { %p3386_p2 = scmp.ne.s32.totalorder %s90_s23, %s3385_s6  ;;  %s3389_s24 = scalar_lea.vmem %s90_s23, 32 }
  0x59   :  { %p3390_p3 = scmp.lt.s32.totalorder %s90_s23, %s90_s23  ;;  %p3391_p4 = scmp.lt.s32.totalorder %s3389_s24, %s3385_s6 }
  0x5b   :  { %p3392_p5 = por %p3391_p4, %p3390_p3 }
  0x5d   :  { %72 = dma.hbm_to_vmem [thread:$0]  %s4970_s26, 16, %s70_s27, [#allocation3]  }
  0x5e   :  { %p3393_p6 = pnand %p3392_p5, %p3386_p2 }
  0x60   :  { %3396 = shalt.err (!%p3393_p6)
}
  0x61   :  { %92 = dma.hbm_to_vmem [thread:$0]  %s4876_s5, 16, %s90_s23, [#allocation12]  }
  0x62   :  { %s3594_s9 = smov [#allocation16]   ;;  %s3595_s1 = smov [#allocation19]  }
  0x63   :  { %s110_s12 = sshll.u32 %s3594_s9, 4  ;;  %s138_s2 = sshll.u32 %s3595_s1, 4  ;;  %s111_s12 = int_to_ptr.vmem [resolvable:$true] %s110_s12  ;;  %s139_s2 = int_to_ptr.vmem [resolvable:$true] %s138_s2 }
  0x64   :  { %s3405_s25 = scalar_lea.vmem %s111_s12, 6144  ;;  %p3410_p8 = scmp.lt.s32.totalorder %s111_s12, %s111_s12 }
  0x65   :  { %p3406_p7 = scmp.ne.s32.totalorder %s111_s12, %s3405_s25  ;;  %p3411_p9 = scmp.lt.s32.totalorder %s3405_s25, %s3405_s25 }
  0x67   :  { %p3412_p10 = por %p3411_p9, %p3410_p8 }
  0x69   :  { %p3413_p11 = pnand %p3412_p10, %p3406_p7 }
  0x6b   :  { %3416 = shalt.err (!%p3413_p11)
}
  0x6c   :  { %116 = dma.hbm_to_vmem [thread:$0]  %s4878_s7, 6144, %s111_s12, [#allocation15], %s3587_s21, %s3587_s21, %s3588_s22  }
  0x6d   :  { %s3425_s5 = scalar_lea.vmem %s139_s2, 1344  ;;  %p3430_p13 = scmp.lt.s32.totalorder %s139_s2, %s139_s2 }
  0x6e   :  { %p3426_p12 = scmp.ne.s32.totalorder %s139_s2, %s3425_s5  ;;  %p3431_p0 = scmp.lt.s32.totalorder %s3425_s5, %s3425_s5 }
  0x70   :  { %p3432_p1 = por %p3431_p0, %p3430_p13 }
  0x72   :  { %p3433_p2 = pnand %p3432_p1, %p3426_p12 }
  0x74   :  { %3436 = shalt.err (!%p3433_p2)
}
  0x75   :  { %144 = dma.hbm_to_vmem [thread:$0]  %s4882_s11, 1344, %s139_s2, [#allocation18], %s3581_s4, %s3581_s4, %s3582_s29  }
  0x76   :  { %s3596_s26 = smov [#allocation22]  }
  0x77   :  { %s164_s6 = sshll.u32 %s3596_s26, 4  ;;  %s165_s6 = int_to_ptr.vmem [resolvable:$true] %s164_s6 }
  0x78   :  { %s3445_s24 = scalar_lea.vmem %s165_s6, 2048  ;;  %p3450_p4 = scmp.lt.s32.totalorder %s165_s6, %s165_s6 }
  0x79   :  { %p3446_p3 = scmp.ne.s32.totalorder %s165_s6, %s3445_s24  ;;  %p3451_p5 = scmp.lt.s32.totalorder %s3445_s24, %s3445_s24 }
  0x7b   :  { %p3452_p6 = por %p3451_p5, %p3450_p4 }
  0x7d   :  { %p3453_p7 = pnand %p3452_p6, %p3446_p3 }
  0x7f   :  { %3456 = shalt.err (!%p3453_p7)
}
  0x80   :  { %s3597_s7 = smov 128   ;;  %s3598_s21 = smov 8  }
  0x81   :  { %170 = dma.hbm_to_vmem [thread:$0]  %s4885_s14, 2048, %s165_s6, [#allocation21], %s3597_s7, %s3597_s7, %s3598_s21  }
  0x82   :  { %3557 = dma.done.wait [#allocation5], 16  }
  0x83   :  { %3558 = vsyncadd [#allocation5], 4294967280 }
  0x84   :  { %3559 = dma.done.wait [#allocation6], 16  }
  0x85   :  { %3560 = vsyncadd [#allocation6], 4294967280 }
  0x86   :  { %3561 = dma.done.wait [#allocation9], 16  }
  0x87   :  { %3562 = vsyncadd [#allocation9], 4294967280 }
  0x88   :  { %3563 = dma.done.wait [#allocation3], 16  }
  0x89   :  { %3564 = vsyncadd [#allocation3], 4294967280 }
  0x8a   :  { %3565 = dma.done.wait [#allocation12], 32  }
  0x8b   :  { %3566 = vsyncadd [#allocation12], 4294967264 }
  0x8c   :  { %3567 = dma.done.wait [#allocation15], 7488  }
  0x8d   :  { %3568 = vsyncadd [#allocation15], 4294959808 }
  0x8e   :  { %3569 = dma.done.wait [#allocation18], 5440  }
  0x8f   :  { %3570 = vsyncadd [#allocation18], 4294961856 }
  0x90   :  { %3571 = dma.done.wait [#allocation21], 8192  }
  0x91   :  { %3572 = vsyncadd [#allocation21], 4294959104 }
  0x92   :  { %209 = sfence }
  0x93   :  { %v261_v0 = vld [vmem:[#allocation16 + $0x170] sm:$0xff]  ;;  %v260_v1 = vld [vmem:[#allocation16 + $0x168] sm:$0xff]  ;;  %v258_v2 = vld [vmem:[#allocation16 + $0x158] sm:$0xff]  ;;  %v4894_v4 = vmov 0.0   ;;  %vm3600_vm0 = vmmov 0   ;;  %s2358_s11 = sld [smem:[#allocation2 + $0x4]] }
  0x94   :  { %280 = vmatprep.subr.mxu0 %v261_v0  ;;  %v257_v3 = vld [vmem:[#allocation16 + $0x150] sm:$0xff]  ;;  %344 = vmatprep.mubr.f32.mxu0 %v4894_v4  ;;  %v255_v5 = vld [vmem:[#allocation16 + $0x140] sm:$0xff]  ;;  %v254_v6 = vld [vmem:[#allocation16 + $0x138] sm:$0xff]  ;;  %vm568_vm1 = vcmask 1040384   ;;  %s2367_s30 = sld [smem:[#allocation7 + $0x2]] }
  0x95   :  { %281 = vmatpush1.msra.mxu0 %v260_v1  ;;  %2604 = vmatprep.subr.mxu1 %v4894_v4  ;;  %v252_v7 = vld [vmem:[#allocation16 + $0x128] sm:$0xff]  ;;  %v251_v8 = vld [vmem:[#allocation16 + $0x120] sm:$0xff]  ;;  %v249_v9 = vld [vmem:[#allocation16 + $0x110] sm:$0xff]  ;;  %s2371_s24 = sld [smem:[#allocation7 + $0x3]] }
  0x96   :  { %282 = vmatprep.subr.mxu0 %v258_v2  ;;  %2636 = vmatprep.mubr.msk.f32.mxu1 %vm3600_vm0, %v4894_v4  ;;  %v248_v10 = vld [vmem:[#allocation16 + $0x108] sm:$0xff]  ;;  %v246_v11 = vld [vmem:[#allocation16 + $0xf8] sm:$0xff]  ;;  %v245_v12 = vld [vmem:[#allocation16 + $0xf0] sm:$0xff]  ;;  %s2375_s22 = sld [smem:[#allocation7 + $0x4]] }
  0x97   :  { %283 = vmatpush1.msra.mxu0 %v257_v3  ;;  %v243_v13 = vld [vmem:[#allocation16 + $0xe0] sm:$0xff]  ;;  %v242_v14 = vld [vmem:[#allocation16 + $0xd8] sm:$0xff]  ;;  %v240_v17 = vld [vmem:[#allocation16 + $0xc8] sm:$0xff]  ;;  %s2370_s9 = sld [smem:[#allocation8 + $0x2]] }
  0x98   :  { %284 = vmatprep.subr.mxu0 %v255_v5  ;;  %v262_v15 = vld [vmem:[#allocation16 + $0x178] sm:$0xff]  ;;  %v259_v16 = vld [vmem:[#allocation16 + $0x160] sm:$0xff]  ;;  %v256_v19 = vld [vmem:[#allocation16 + $0x148] sm:$0xff]  ;;  %s2374_s1 = sld [smem:[#allocation8 + $0x3]] }
  0x99   :  { %285 = vmatpush1.msra.mxu0 %v254_v6  ;;  %2605 = vmatpush3.msra.mxu1 %v262_v15  ;;  %v239_v18 = vld [vmem:[#allocation16 + $0xc0] sm:$0xff]  ;;  %v237_v20 = vld [vmem:[#allocation16 + $0xb0] sm:$0xff]  ;;  %v236_v21 = vld [vmem:[#allocation16 + $0xa8] sm:$0xff]  ;;  %s211_s14 = smul.u32 3, %s2358_s11  ;;  %s2382_s2 = sld [smem:[#allocation8 + $0x5]] }
  0x9a   :  { %286 = vmatprep.subr.mxu0 %v252_v7  ;;  %2606 = vmatprep.subr.mxu1 %v4894_v4  ;;  %v253_v22 = vld [vmem:[#allocation16 + $0x130] sm:$0xff]  ;;  %v234_v23 = vld [vmem:[#allocation16 + $0x98] sm:$0xff]  ;;  %v231_v26 = vld [vmem:[#allocation16 + $0x80] sm:$0xff]  ;;  %s1198_s26 = smul.u32 3, %s2367_s30 }
  0x9b   :  { %287 = vmatpush1.msra.mxu0 %v251_v8  ;;  %2607 = vmatpush3.msra.mxu1 %v259_v16  ;;  %v233_v24 = vld [vmem:[#allocation16 + $0x90] sm:$0xff]  ;;  %v250_v25 = vld [vmem:[#allocation16 + $0x118] sm:$0xff]  ;;  %v247_v28 = vld [vmem:[#allocation16 + $0x100] sm:$0xff]  ;;  %s212_s0 = scalar_lea.vmem [#allocation14], %s211_s14  ;;  %s1464_s7 = smul.u32 3, %s2371_s24 }
  0x9c   :  { %288 = vmatprep.subr.mxu0 %v249_v9  ;;  %2608 = vmatprep.subr.mxu1 %v4894_v4  ;;  %v230_v27 = vld [vmem:[#allocation16 + $0x78] sm:$0xff]  ;;  %v228_v29 = vld [vmem:[#allocation16 + $0x68] sm:$0xff]  ;;  %v227_v30 = vld [vmem:[#allocation16 + $0x60] sm:$0xff]  ;;  %s1199_s6 = scalar_lea.vmem [#allocation19], %s1198_s26  ;;  %s1730_s28 = smul.u32 3, %s2375_s22 }
  0x9d   :  { %289 = vmatpush1.msra.mxu0 %v248_v10  ;;  %2609 = vmatpush3.msra.mxu1 %v256_v19  ;;  %v244_v31 = vld [vmem:[#allocation16 + $0xe8] sm:$0xff]  ;;  %v225_v32 = vld [vmem:[#allocation16 + $0x50] sm:$0xff]  ;;  %v222_v35 = vld [vmem:[#allocation16 + $0x38] sm:$0xff]  ;;  %s1465_s21 = scalar_lea.vmem [#allocation19], %s1464_s7  ;;  %s2379_s14 = sld [smem:[#allocation7 + $0x5]] }
  0x9e   :  { %290 = vmatprep.subr.mxu0 %v246_v11  ;;  %2610 = vmatprep.subr.mxu1 %v4894_v4  ;;  %v224_v33 = vld [vmem:[#allocation16 + $0x48] sm:$0xff]  ;;  %v241_v34 = vld [vmem:[#allocation16 + $0xd0] sm:$0xff]  ;;  %v238_v37 = vld [vmem:[#allocation16 + $0xb8] sm:$0xff]  ;;  %s1731_s11 = scalar_lea.vmem [#allocation19], %s1730_s28 }
  0x9f   :  { %291 = vmatpush1.msra.mxu0 %v245_v12  ;;  %2611 = vmatpush3.msra.mxu1 %v253_v22  ;;  %v221_v36 = vld [vmem:[#allocation16 + $0x30] sm:$0xff]  ;;  %v219_v38 = vld [vmem:[#allocation16 + $0x20] sm:$0xff]  ;;  %v218_v39 = vld [vmem:[#allocation16 + $0x18] sm:$0xff]  ;;  %v4892_v22 = vlaneseq }
  0xa0   :  { %292 = vmatprep.subr.mxu0 %v243_v13  ;;  %2612 = vmatprep.subr.mxu1 %v4894_v4  ;;  %v235_v40 = vld [vmem:[#allocation16 + $0xa0] sm:$0xff]  ;;  %v216_v41 = vld [vmem:[#allocation16 + $0x8] sm:$0xff]  ;;  %v229_v45 = vld [vmem:[#allocation16 + $0x70] sm:$0xff] }
  0xa1   :  { %293 = vmatpush1.msra.mxu0 %v242_v14  ;;  %2613 = vmatpush3.msra.mxu1 %v250_v25  ;;  %v215_v42 = vld [vmem:[#allocation16] sm:$0xff]  ;;  %v232_v43 = vld [vmem:[#allocation16 + $0x88] sm:$0xff]  ;;  %v226_v46 = vld [vmem:[#allocation16 + $0x58] sm:$0xff] }
  0xa2   :  { %294 = vmatprep.subr.mxu0 %v240_v17  ;;  %2614 = vmatprep.subr.mxu1 %v4894_v4  ;;  %v3772_v44 = vld [vmem:[#allocation10] sm:$0x1]  ;;  %v220_v48 = vld [vmem:[#allocation16 + $0x28] sm:$0xff]  ;;  %v217_v49 = vld [vmem:[#allocation16 + $0x10] sm:$0xff] }
  0xa3   :  { %295 = vmatpush1.msra.mxu0 %v239_v18  ;;  %2615 = vmatpush3.msra.mxu1 %v247_v28  ;;  %v223_v47 = vld [vmem:[#allocation16 + $0x40] sm:$0xff]  ;;  %v478_v50 = vld [vmem:[#allocation17 + $0xf8] sm:$0xff]  ;;  %v477_v51 = vld [vmem:[#allocation17 + $0xf0] sm:$0xff]  ;;  %s1996_s4 = smul.u32 3, %s2379_s14 }
  0xa4   :  { %296 = vmatprep.subr.mxu0 %v237_v20  ;;  %2616 = vmatprep.subr.mxu1 %v4894_v4  ;;  %v476_v52 = vld [vmem:[#allocation17 + $0xe8] sm:$0xff]  ;;  %v475_v53 = vld [vmem:[#allocation17 + $0xe0] sm:$0xff]  ;;  %v474_v54 = vld [vmem:[#allocation17 + $0xd8] sm:$0xff] }
  0xa5   :  { %297 = vmatpush1.msra.mxu0 %v236_v21  ;;  %2617 = vmatpush3.msra.mxu1 %v244_v31  ;;  %v473_v55 = vld [vmem:[#allocation17 + $0xd0] sm:$0xff]  ;;  %v472_v56 = vld [vmem:[#allocation17 + $0xc8] sm:$0xff]  ;;  %v471_v57 = vld [vmem:[#allocation17 + $0xc0] sm:$0xff]  ;;  %s1997_s29 = scalar_lea.vmem [#allocation19], %s1996_s4 }
  0xa6   :  { %298 = vmatprep.subr.mxu0 %v234_v23  ;;  %2618 = vmatprep.subr.mxu1 %v4894_v4  ;;  %v470_v58 = vld [vmem:[#allocation17 + $0xb8] sm:$0xff]  ;;  %v469_v59 = vld [vmem:[#allocation17 + $0xb0] sm:$0xff]  ;;  %v468_v60 = vld [vmem:[#allocation17 + $0xa8] sm:$0xff]  ;;  %v3795_v23 = vshrl.u32 %v4892_v22, 7 }
  0xa7   :  { %299 = vmatpush1.msra.mxu0 %v233_v24  ;;  %2619 = vmatpush3.msra.mxu1 %v241_v34  ;;  %v467_v61 = vld [vmem:[#allocation17 + $0xa0] sm:$0xff]  ;;  %v466_v62 = vld [vmem:[#allocation17 + $0x98] sm:$0xff]  ;;  %v465_v63 = vld [vmem:[#allocation17 + $0x90] sm:$0xff] }
  0xa8   :  { %300 = vmatprep.subr.mxu0 %v231_v26  ;;  %2620 = vmatprep.subr.mxu1 %v4894_v4  ;;  %v464_v0 = vld [vmem:[#allocation17 + $0x88] sm:$0xff]  ;;  %v463_v1 = vld [vmem:[#allocation17 + $0x80] sm:$0xff]  ;;  %v462_v2 = vld [vmem:[#allocation17 + $0x78] sm:$0xff]  ;;  %v3798_v24 = vsub.s32 0, %v3795_v23 }
  0xa9   :  { %301 = vmatpush1.msra.mxu0 %v230_v27  ;;  %2621 = vmatpush3.msra.mxu1 %v238_v37  ;;  %v461_v3 = vld [vmem:[#allocation17 + $0x70] sm:$0xff]  ;;  %v460_v5 = vld [vmem:[#allocation17 + $0x68] sm:$0xff]  ;;  %v459_v6 = vld [vmem:[#allocation17 + $0x60] sm:$0xff]  ;;  %v3805_v27 = vsub.s32 1, %v3795_v23 }
  0xaa   :  { %302 = vmatprep.subr.mxu0 %v228_v29  ;;  %2622 = vmatprep.subr.mxu1 %v4894_v4  ;;  %v458_v7 = vld [vmem:[#allocation17 + $0x58] sm:$0xff]  ;;  %v457_v8 = vld [vmem:[#allocation17 + $0x50] sm:$0xff]  ;;  %v456_v9 = vld [vmem:[#allocation17 + $0x48] sm:$0xff] }
  0xab   :  { %303 = vmatpush1.msra.mxu0 %v227_v30  ;;  %2623 = vmatpush3.msra.mxu1 %v235_v40  ;;  %v455_v10 = vld [vmem:[#allocation17 + $0x40] sm:$0xff]  ;;  %v454_v11 = vld [vmem:[#allocation17 + $0x38] sm:$0xff]  ;;  %v453_v12 = vld [vmem:[#allocation17 + $0x30] sm:$0xff] }
  0xac   :  { %304 = vmatprep.subr.mxu0 %v225_v32  ;;  %2624 = vmatprep.subr.mxu1 %v4894_v4  ;;  %v452_v13 = vld [vmem:[#allocation17 + $0x28] sm:$0xff]  ;;  %v451_v14 = vld [vmem:[#allocation17 + $0x20] sm:$0xff]  ;;  %v450_v15 = vld [vmem:[#allocation17 + $0x18] sm:$0xff] }
  0xad   :  { %305 = vmatpush1.msra.mxu0 %v224_v33  ;;  %2625 = vmatpush3.msra.mxu1 %v232_v43  ;;  %v449_v16 = vld [vmem:[#allocation17 + $0x10] sm:$0xff]  ;;  %v448_v17 = vld [vmem:[#allocation17 + $0x8] sm:$0xff]  ;;  %v447_v18 = vld [vmem:[#allocation17] sm:$0xff]  ;;  %v4893_v43 = vsub.s32 2, %v3795_v23 }
  0xae   :  { %306 = vmatprep.subr.mxu0 %v222_v35  ;;  %2626 = vmatprep.subr.mxu1 %v4894_v4  ;;  %v3784_v19 = vld [vmem:[#allocation20 + $0x170] sm:$0xff]  ;;  %v3787_v20 = vld [vmem:[#allocation20 + $0x168] sm:$0xff]  ;;  %v3790_v21 = vld [vmem:[#allocation20 + $0x158] sm:$0xff] }
  0xaf   :  { %307 = vmatpush1.msra.mxu0 %v221_v36  ;;  %2627 = vmatpush3.msra.mxu1 %v229_v45  ;;  %4971 = vst [vmem:[#allocation41_spill] sm:$0xff] %v3784_v19  ;;  %v263_v25 = vld [vmem:[%s4879_s8] sm:$0x7] }
  0xb0   :  { %308 = vmatprep.subr.mxu0 %v219_v38  ;;  %2628 = vmatprep.subr.mxu1 %v4894_v4  ;;  %v268_v26 = vrot.slane %v263_v25, %v3798_v24  ;;  %v213_v28 = vld [vmem:[%s212_s0] sm:$0x7]  ;;  %v272_v31 = vrot.slane %v263_v25, %v3805_v27  ;;  %v276_v45 = vrot.slane %v263_v25, %v4893_v43  ;;  %v3890_v25 = vld [vmem:[#allocation20 + $0x98] sm:$0xff] }
  0xb1   :  { %309 = vmatpush1.msra.mxu0 %v218_v39  ;;  %2629 = vmatpush3.msra.mxu1 %v226_v46  ;;  %v429_v36 = vrot.slane %v213_v28, 1  ;;  %4977 = vst [vmem:[#allocation47_spill] sm:$0xff] %v3890_v25 }
  0xb2   :  { %310 = vmatprep.subr.mxu0 %v216_v41  ;;  %2630 = vmatprep.subr.mxu1 %v4894_v4 }
  0xb3   :  { %311 = vmatpush1.msra.mxu0 %v215_v42  ;;  %2631 = vmatpush3.msra.mxu1 %v223_v47 }
  0xb4   :  { %345 = vmatmul.mubr.f32.vlgmr.msra.gmra.mxu0 %v3772_v44  ;;  %2632 = vmatprep.subr.mxu1 %v4894_v4 }
  0xb5   :  { %555 = vmatprep.mubr.f32.mxu0 %v4894_v4  ;;  %2633 = vmatpush3.msra.mxu1 %v220_v48 }
  0xb6   :  { %2634 = vmatprep.subr.mxu1 %v4894_v4  ;;  %491 = vmatprep.subr.mxu0 %v478_v50 }
  0xb7   :  { %2635 = vmatpush3.msra.mxu1 %v217_v49  ;;  %492 = vmatpush1.msra.mxu0 %v477_v51  ;;  %v439_v49 = vrot.slane %v213_v28, 2 }
  0xb8   :  { %2637 = vmatmul.mubr.f32.vlgmr.msra.gmra.mxu1 %v3772_v44  ;;  %493 = vmatprep.subr.mxu0 %v476_v52 }
  0xb9   :  { %733 = vmatprep.mubr.f32.mxu1 %v4894_v4  ;;  %494 = vmatpush1.msra.mxu0 %v475_v53 }
  0xba   :  { %495 = vmatprep.subr.mxu0 %v474_v54  ;;  %669 = vmatprep.subr.mxu1 %v3784_v19 }
  0xbb   :  { %496 = vmatpush1.msra.mxu0 %v473_v55  ;;  %670 = vmatpush1.msra.mxu1 %v3787_v20 }
  0xbc   :  { %497 = vmatprep.subr.mxu0 %v472_v56  ;;  %671 = vmatprep.subr.mxu1 %v3790_v21 }
  0xbd   :  { %498 = vmatpush1.msra.mxu0 %v471_v57 }
  0xbe   :  { %499 = vmatprep.subr.mxu0 %v470_v58 }
  0xbf   :  { %500 = vmatpush1.msra.mxu0 %v469_v59  ;;  %v3812_v59 = vld [vmem:[#allocation20 + $0x178] sm:$0xff] }
  0xc0   :  { %501 = vmatprep.subr.mxu0 %v468_v60  ;;  %v3818_v60 = vld [vmem:[#allocation20 + $0x150] sm:$0xff] }
  0xc1   :  { %502 = vmatpush1.msra.mxu0 %v467_v61  ;;  %v3820_v61 = vld [vmem:[#allocation20 + $0x160] sm:$0xff]  ;;  %672 = vmatpush1.msra.mxu1 %v3818_v60 }
  0xc2   :  { %503 = vmatprep.subr.mxu0 %v466_v62  ;;  %v3828_v62 = vld [vmem:[#allocation20 + $0x138] sm:$0xff] }
  0xc3   :  { %504 = vmatpush1.msra.mxu0 %v465_v63  ;;  %v3830_v63 = vld [vmem:[#allocation20 + $0x148] sm:$0xff] }
  0xc4   :  { %505 = vmatprep.subr.mxu0 %v464_v0  ;;  %v3834_v0 = vld [vmem:[#allocation20 + $0x128] sm:$0xff] }
  0xc5   :  { %506 = vmatpush1.msra.mxu0 %v463_v1  ;;  %v3838_v1 = vld [vmem:[#allocation20 + $0x120] sm:$0xff] }
  0xc6   :  { %507 = vmatprep.subr.mxu0 %v462_v2  ;;  %v3840_v2 = vld [vmem:[#allocation20 + $0x130] sm:$0xff] }
  0xc7   :  { %508 = vmatpush1.msra.mxu0 %v461_v3  ;;  %v3844_v3 = vld [vmem:[#allocation20 + $0x110] sm:$0xff] }
  0xc8   :  { %509 = vmatprep.subr.mxu0 %v460_v5  ;;  %v3848_v5 = vld [vmem:[#allocation20 + $0x108] sm:$0xff] }
  0xc9   :  { %510 = vmatpush1.msra.mxu0 %v459_v6  ;;  %v3850_v6 = vld [vmem:[#allocation20 + $0x118] sm:$0xff] }
  0xca   :  { %511 = vmatprep.subr.mxu0 %v458_v7  ;;  %v3854_v7 = vld [vmem:[#allocation20 + $0xf8] sm:$0xff] }
  0xcb   :  { %512 = vmatpush1.msra.mxu0 %v457_v8  ;;  %v3858_v8 = vld [vmem:[#allocation20 + $0xf0] sm:$0xff] }
  0xcc   :  { %513 = vmatprep.subr.mxu0 %v456_v9  ;;  %v3860_v9 = vld [vmem:[#allocation20 + $0x100] sm:$0xff] }
  0xcd   :  { %514 = vmatpush1.msra.mxu0 %v455_v10  ;;  %v3864_v10 = vld [vmem:[#allocation20 + $0xe0] sm:$0xff] }
  0xce   :  { %515 = vmatprep.subr.mxu0 %v454_v11  ;;  %v3868_v11 = vld [vmem:[#allocation20 + $0xd8] sm:$0xff] }
  0xcf   :  { %516 = vmatpush1.msra.mxu0 %v453_v12  ;;  %4972 = vst [vmem:[#allocation42_spill] sm:$0xff] %v3868_v11  ;;  %v3870_v12 = vld [vmem:[#allocation20 + $0xe8] sm:$0xff] }
  0xd0   :  { %517 = vmatprep.subr.mxu0 %v452_v13  ;;  %v3872_v13 = vld [vmem:[#allocation20 + $0xc8] sm:$0xff] }
  0xd1   :  { %518 = vmatpush1.msra.mxu0 %v451_v14  ;;  %4973 = vst [vmem:[#allocation43_spill] sm:$0xff] %v3872_v13  ;;  %v3876_v14 = vld [vmem:[#allocation20 + $0xc0] sm:$0xff] }
  0xd2   :  { %519 = vmatprep.subr.mxu0 %v450_v15  ;;  %4974 = vst [vmem:[#allocation44_spill] sm:$0xff] %v3876_v14  ;;  %v3878_v15 = vld [vmem:[#allocation20 + $0xd0] sm:$0xff] }
  0xd3   :  { %520 = vmatpush1.msra.mxu0 %v449_v16  ;;  %v3880_v16 = vld [vmem:[#allocation20 + $0xb0] sm:$0xff] }
  0xd4   :  { %521 = vmatprep.subr.mxu0 %v448_v17  ;;  %4975 = vst [vmem:[#allocation45_spill] sm:$0xff] %v3880_v16  ;;  %v3884_v17 = vld [vmem:[#allocation20 + $0xa8] sm:$0xff] }
  0xd5   :  { %522 = vmatpush1.msra.mxu0 %v447_v18  ;;  %4976 = vst [vmem:[#allocation46_spill] sm:$0xff] %v3884_v17  ;;  %v3886_v18 = vld [vmem:[#allocation20 + $0xb8] sm:$0xff] }
  0xd6   :  { %2639 = vmatprep.subr.mxu0 %v4894_v4 }
 0x174   :  { %v346_v29 = vpop.f32.mrf.mxu0 }
 0x175   :  { %v347_v30 = vadd.f32 %v346_v29, %v268_v26  ;;  %v3894_v26 = vld [vmem:[#allocation20 + $0x90] sm:$0xff]  ;;  %v3900_v29 = vld [vmem:[#allocation20 + $0x80] sm:$0xff] }
 0x176   :  { %v348_v32 = vpop.f32.mrf.mxu0  ;;  %4978 = vst [vmem:[#allocation48_spill] sm:$0xff] %v3894_v26  ;;  %4979 = vst [vmem:[#allocation49_spill] sm:$0xff] %v3900_v29 }
 0x177   :  { %v421_v33 = vadd.f32 %v347_v30, %v213_v28  ;;  %v349_v35 = vadd.f32 %v348_v32, %v272_v31  ;;  %v3896_v28 = vld [vmem:[#allocation20 + $0xa0] sm:$0xff]  ;;  %v3904_v30 = vld [vmem:[#allocation20 + $0x78] sm:$0xff]  ;;  %v3906_v31 = vld [vmem:[#allocation20 + $0x88] sm:$0xff] }
 0x178   :  { %v417_v38 = vpop.f32.mrf.mxu1  ;;  %4980 = vst [vmem:[#allocation50_spill] sm:$0xff] %v3904_v30  ;;  %v3910_v32 = vld [vmem:[#allocation20 + $0x68] sm:$0xff] }
 0x179   :  { %v2359_v34 = vmul.f32 -1.442695, %v421_v33  ;;  %v431_v37 = vadd.f32 %v429_v36, %v349_v35  ;;  %v418_v48 = vadd.f32 %v417_v38, %v276_v45  ;;  %4981 = vst [vmem:[#allocation51_spill] sm:$0xff] %v3910_v32  ;;  %v3914_v33 = vld [vmem:[#allocation20 + $0x60] sm:$0xff]  ;;  %v3920_v35 = vld [vmem:[#allocation20 + $0x50] sm:$0xff]  ;;  %v3924_v36 = vld [vmem:[#allocation20 + $0x48] sm:$0xff] }
 0x17a   :  { %v2638_v39 = vpop.f32.mrf.mxu1  ;;  %4982 = vst [vmem:[#allocation52_spill] sm:$0xff] %v3914_v33  ;;  %4983 = vst [vmem:[#allocation53_spill] sm:$0xff] %v3920_v35  ;;  %v3930_v38 = vld [vmem:[#allocation20 + $0x38] sm:$0xff]  ;;  %v3946_v45 = vld [vmem:[#allocation20 + $0x28] sm:$0xff] }
 0x17b   :  { %3086 = vpow2.f32 %v2359_v34  ;;  %v2360_v40 = vmul.f32 -1.442695, %v431_v37  ;;  %v3916_v34 = vld [vmem:[#allocation20 + $0x70] sm:$0xff]  ;;  %4984 = vst [vmem:[#allocation54_spill] sm:$0xff] %v3924_v36  ;;  %v3926_v37 = vld [vmem:[#allocation20 + $0x58] sm:$0xff]  ;;  %4986 = vst [vmem:[#allocation56_spill] sm:$0xff] %v3930_v38 }
 0x17c   :  { %4985 = vst [vmem:[#allocation55_spill] sm:$0xff] %v3926_v37  ;;  %v3934_v39 = vld [vmem:[#allocation20 + $0x30] sm:$0xff]  ;;  %4991 = vst [vmem:[#allocation61_spill] sm:$0xff] %v3946_v45 }
 0x17d   :  { %3088 = vpow2.f32 %v2360_v40  ;;  %4987 = vst [vmem:[#allocation57_spill] sm:$0xff] %v3934_v39  ;;  %v3936_v40 = vld [vmem:[#allocation20 + $0x40] sm:$0xff] }
 0x17e   :  { %4988 = vst [vmem:[#allocation58_spill] sm:$0xff] %v3936_v40 }
 0x188   :  { %v3087_v41 = vpop.eup %3086 }
 0x189   :  { %v425_v42 = vadd.f32 1.0, %v3087_v41  ;;  %v3940_v41 = vld [vmem:[#allocation20 + $0x20] sm:$0xff] }
 0x18a   :  { %v3089_v46 = vpop.eup %3088  ;;  %4989 = vst [vmem:[#allocation59_spill] sm:$0xff] %v3940_v41 }
 0x18b   :  { %3090 = vrcp.f32 %v425_v42  ;;  %v435_v47 = vadd.f32 1.0, %v3089_v46  ;;  %v3944_v42 = vld [vmem:[#allocation20 + $0x18] sm:$0xff]  ;;  %v3950_v46 = vld [vmem:[#allocation20 + $0x8] sm:$0xff] }
 0x18c   :  { %4990 = vst [vmem:[#allocation60_spill] sm:$0xff] %v3944_v42  ;;  %4992 = vst [vmem:[#allocation62_spill] sm:$0xff] %v3950_v46 }
 0x18d   :  { %3092 = vrcp.f32 %v435_v47  ;;  %v3954_v47 = vld [vmem:[#allocation20] sm:$0xff] }
 0x18e   :  { %4993 = vst [vmem:[#allocation63_spill] sm:$0xff] %v3954_v47 }
 0x198   :  { %v3091_v50 = vpop.eup %3090 }
 0x199   :  { %v438_v51 = vmul.f32 %v3091_v50, %v418_v48  ;;  %v3956_v48 = vld [vmem:[#allocation20 + $0x10] sm:$0xff] }
 0x19a   :  { %v3093_v53 = vpop.eup %3092  ;;  %4994 = vst [vmem:[#allocation64_spill] sm:$0xff] %v3956_v48 }
 0x19b   :  { %v441_v52 = vadd.f32 %v439_v49, %v438_v51  ;;  %v443_v54 = vsub.f32 1.0, %v3093_v53  ;;  %v445_v57 = vmul.f32 %v3093_v53, %v3772_v44  ;;  %v3824_v44 = vld [vmem:[#allocation20 + $0x140] sm:$0xff]  ;;  %v479_v49 = vld [vmem:[%s4881_s10] sm:$0x3]  ;;  %s649_s10 = sld [smem:[#allocation7]] }
 0x19c   :  { %673 = vmatprep.subr.mxu1 %v3824_v44  ;;  %v484_v50 = vrot.slane %v479_v49, %v3798_v24  ;;  %v488_v51 = vrot.slane %v479_v49, %v3805_v27 }
 0x19d   :  { %3094 = vtanh.f32 %v441_v52  ;;  %674 = vmatpush1.msra.mxu1 %v3828_v62 }
 0x19e   :  { %675 = vmatprep.subr.mxu1 %v3834_v0 }
 0x19f   :  { %676 = vmatpush1.msra.mxu1 %v3838_v1 }
 0x1a0   :  { %677 = vmatprep.subr.mxu1 %v3844_v3 }
 0x1a1   :  { %678 = vmatpush1.msra.mxu1 %v3848_v5  ;;  %s650_s12 = smul.u32 3, %s649_s10  ;;  %s2378_s10 = sld [smem:[#allocation8 + $0x4]] }
 0x1a2   :  { %679 = vmatprep.subr.mxu1 %v3854_v7 }
 0x1a3   :  { %680 = vmatpush1.msra.mxu1 %v3858_v8  ;;  %s651_s25 = scalar_lea.vmem [#allocation19], %s650_s12  ;;  %s2366_s12 = sld [smem:[#allocation8 + $0x1]] }
 0x1a4   :  { %681 = vmatprep.subr.mxu1 %v3864_v10 }
 0x1a5   :  { %682 = vmatpush1.msra.mxu1 %v3868_v11 }
 0x1a6   :  { %683 = vmatprep.subr.mxu1 %v3872_v13 }
 0x1a7   :  { %684 = vmatpush1.msra.mxu1 %v3876_v14 }
 0x1a8   :  { %685 = vmatprep.subr.mxu1 %v3880_v16 }
 0x1a9   :  { %686 = vmatpush1.msra.mxu1 %v3884_v17 }
 0x1aa   :  { %v3095_v55 = vpop.eup %3094  ;;  %687 = vmatprep.subr.mxu1 %v3890_v25 }
 0x1ab   :  { %v444_v56 = vmul.f32 %v3095_v55, %v443_v54  ;;  %688 = vmatpush1.msra.mxu1 %v3894_v26 }
 0x1ac   :  { %689 = vmatprep.subr.mxu1 %v3900_v29 }
 0x1ad   :  { %v446_v58 = vadd.f32 %v445_v57, %v444_v56  ;;  %690 = vmatpush1.msra.mxu1 %v3904_v30 }
 0x1ae   :  { %691 = vmatprep.subr.mxu1 %v3910_v32 }
 0x1af   :  { %556 = vmatmul.mubr.f32.vlgmr.msra.gmra.mxu0 %v446_v58  ;;  %692 = vmatpush1.msra.mxu1 %v3914_v33 }
 0x1b0   :  { %2640 = vmatpush3.msra.mxu0 %v3812_v59  ;;  %2671 = vmatprep.mubr.msk.f32.mxu0 %vm3600_vm0, %v4894_v4 }
 0x1b1   :  { %2641 = vmatprep.subr.mxu0 %v4894_v4  ;;  %693 = vmatprep.subr.mxu1 %v3920_v35 }
 0x1b2   :  { %2642 = vmatpush3.msra.mxu0 %v3820_v61  ;;  %694 = vmatpush1.msra.mxu1 %v3924_v36 }
 0x1b3   :  { %2643 = vmatprep.subr.mxu0 %v4894_v4  ;;  %695 = vmatprep.subr.mxu1 %v3930_v38 }
 0x1b4   :  { %2644 = vmatpush3.msra.mxu0 %v3830_v63  ;;  %696 = vmatpush1.msra.mxu1 %v3934_v39 }
 0x1b5   :  { %2645 = vmatprep.subr.mxu0 %v4894_v4  ;;  %697 = vmatprep.subr.mxu1 %v3940_v41 }
 0x1b6   :  { %2646 = vmatpush3.msra.mxu0 %v3840_v2  ;;  %698 = vmatpush1.msra.mxu1 %v3944_v42 }
 0x1b7   :  { %2647 = vmatprep.subr.mxu0 %v4894_v4  ;;  %699 = vmatprep.subr.mxu1 %v3950_v46 }
 0x1b8   :  { %2648 = vmatpush3.msra.mxu0 %v3850_v6  ;;  %700 = vmatpush1.msra.mxu1 %v3954_v47 }
 0x1b9   :  { %2649 = vmatprep.subr.mxu0 %v4894_v4  ;;  %2674 = vmatprep.subr.mxu1 %v4894_v4 }
 0x1ba   :  { %2650 = vmatpush3.msra.mxu0 %v3860_v9 }
 0x1bb   :  { %2651 = vmatprep.subr.mxu0 %v4894_v4 }
 0x1bc   :  { %2652 = vmatpush3.msra.mxu0 %v3870_v12 }
 0x1bd   :  { %2653 = vmatprep.subr.mxu0 %v4894_v4 }
 0x1be   :  { %2654 = vmatpush3.msra.mxu0 %v3878_v15 }
 0x1bf   :  { %2655 = vmatprep.subr.mxu0 %v4894_v4 }
 0x1c0   :  { %2656 = vmatpush3.msra.mxu0 %v3886_v18 }
 0x1c1   :  { %2657 = vmatprep.subr.mxu0 %v4894_v4 }
 0x1c2   :  { %2658 = vmatpush3.msra.mxu0 %v3896_v28 }
 0x1c3   :  { %2659 = vmatprep.subr.mxu0 %v4894_v4 }
 0x1c4   :  { %2660 = vmatpush3.msra.mxu0 %v3906_v31 }
 0x1c5   :  { %2661 = vmatprep.subr.mxu0 %v4894_v4 }
 0x1c6   :  { %2662 = vmatpush3.msra.mxu0 %v3916_v34 }
 0x1c7   :  { %2663 = vmatprep.subr.mxu0 %v4894_v4 }
 0x1c8   :  { %2664 = vmatpush3.msra.mxu0 %v3926_v37  ;;  %v579_v37 = vld [vmem:[#allocation13] sm:$0x1] }
 0x1c9   :  { %2665 = vmatprep.subr.mxu0 %v4894_v4 }
 0x1ca   :  { %2666 = vmatpush3.msra.mxu0 %v3936_v40 }
 0x1cb   :  { %2667 = vmatprep.subr.mxu0 %v4894_v4 }
 0x1cc   :  { %2668 = vmatpush3.msra.mxu0 %v3946_v45 }
 0x1cd   :  { %2669 = vmatprep.subr.mxu0 %v4894_v4 }
 0x1ce   :  { %2670 = vmatpush3.msra.mxu0 %v3956_v48  ;;  %v573_v48 = vld [vmem:[#allocation11] sm:$0x1] }
 0x1cf   :  { %935 = vmatprep.subr.mxu0 %v3784_v19 }
 0x26f   :  { %v557_v52 = vpop.f32.mrf.mxu0 }
 0x270   :  { %v558_v53 = vadd.f32 %v557_v52, %v484_v50 }
 0x271   :  { %v559_v54 = vpop.f32.mrf.mxu0 }
 0x272   :  { %2263 = vst [vmem:[#allocation23] sm:$0x1] %v558_v53  ;;  %v560_v55 = vadd.f32 %v559_v54, %v488_v51  ;;  %v563_v56 = vmul.f32 %v558_v53, %v558_v53  ;;  %v4996_v51 = vmov 0.0   ;;  %v4043_v54 = vld [vmem:[#allocation22 + $0x38] sm:$0xff] }
 0x274   :  { %v565_v57 = vmul.f32 1.442695, %v560_v55  ;;  %v574_v58 = vmul.f32 0.5, %v560_v55  ;;  %2264 = vst [vmem:[#allocation24] sm:$0x1] %v560_v55  ;;  %v562_v22 = vadd.f32 1.0, %v560_v55 }
 0x275   :  { %v4046_v55 = vld [vmem:[#allocation22 + $0x30] sm:$0xff] }
 0x276   :  { %3096 = vpow2.f32 %v565_v57  ;;  %v575_v43 = vmul.f32 1.442695, %v574_v58  ;;  %v564_v4 = vsub.f32 %v562_v22, %v563_v56  ;;  %v4020_v22 = vld [vmem:[#allocation22 + $0x68] sm:$0xff]  ;;  %v4054_v57 = vld [vmem:[#allocation22 + $0x20] sm:$0xff]  ;;  %v4058_v58 = vld [vmem:[#allocation22 + $0x18] sm:$0xff] }
 0x277   :  { %v4050_v56 = vld [vmem:[#allocation22 + $0x28] sm:$0xff] }
 0x278   :  { %3098 = vpow2.f32 %v575_v43  ;;  %v4024_v43 = vld [vmem:[#allocation22 + $0x60] sm:$0xff] }
 0x283   :  { %v3097_v19 = vpop.eup %3096 }
 0x284   :  { %v3971_v45 = vsub.f32 %v564_v4, %v3097_v19  ;;  %v4012_v4 = vld [vmem:[#allocation22 + $0x78] sm:$0xff]  ;;  %v4016_v19 = vld [vmem:[#allocation22 + $0x70] sm:$0xff] }
 0x285   :  { %v3099_v40 = vpop.eup %3098 }
 0x286   :  { %4995 = vst [vmem:[#allocation65_spill] sm:$0xff] %v3971_v45  ;;  %v577_v49 = vmul.f32 %v3099_v40, %v573_v48  ;;  %v4032_v40 = vld [vmem:[#allocation22 + $0x50] sm:$0xff]  ;;  %v4036_v48 = vld [vmem:[#allocation22 + $0x48] sm:$0xff]  ;;  %v4070_v45 = vld [vmem:[#allocation22] sm:$0xff] }
 0x288   :  { %v578_v50 = vadd.f32 %v577_v49, %v558_v53  ;;  %v4040_v53 = vld [vmem:[#allocation22 + $0x40] sm:$0xff]  ;;  %v4062_v49 = vld [vmem:[#allocation22 + $0x10] sm:$0xff] }
 0x28a   :  { %v3973_v52 = vadd.f32 %v579_v37, %v578_v50  ;;  %v4028_v37 = vld [vmem:[#allocation22 + $0x58] sm:$0xff]  ;;  %v4066_v50 = vld [vmem:[#allocation22 + $0x8] sm:$0xff] }
 0x28c   :  { %734 = vmatmul.mubr.f32.vlgmr.msra.gmra.mxu1 %v3973_v52  ;;  %2672 = vmatmul.mubr.f32.vlgmr.msra.gmra.mxu0 %v3973_v52 }
 0x28d   :  { %936 = vmatpush1.msra.mxu0 %v3787_v20  ;;  %2706 = vmatprep.mubr.msk.f32.mxu1 %vm3600_vm0, %v4996_v51 }
 0x28e   :  { %937 = vmatprep.subr.mxu0 %v3790_v21  ;;  %999 = vmatprep.mubr.f32.mxu0 %v4996_v51 }
 0x28f   :  { %938 = vmatpush1.msra.mxu0 %v3818_v60  ;;  %2675 = vmatpush3.msra.mxu1 %v4012_v4 }
 0x290   :  { %939 = vmatprep.subr.mxu0 %v3824_v44  ;;  %2676 = vmatprep.subr.mxu1 %v4996_v51 }
 0x291   :  { %940 = vmatpush1.msra.mxu0 %v3828_v62  ;;  %2677 = vmatpush3.msra.mxu1 %v4016_v19 }
 0x292   :  { %941 = vmatprep.subr.mxu0 %v3834_v0  ;;  %2678 = vmatprep.subr.mxu1 %v4996_v51 }
 0x293   :  { %942 = vmatpush1.msra.mxu0 %v3838_v1  ;;  %2679 = vmatpush3.msra.mxu1 %v4020_v22 }
 0x294   :  { %943 = vmatprep.subr.mxu0 %v3844_v3  ;;  %2680 = vmatprep.subr.mxu1 %v4996_v51 }
 0x295   :  { %944 = vmatpush1.msra.mxu0 %v3848_v5  ;;  %2681 = vmatpush3.msra.mxu1 %v4024_v43 }
 0x296   :  { %945 = vmatprep.subr.mxu0 %v3854_v7  ;;  %2682 = vmatprep.subr.mxu1 %v4996_v51 }
 0x297   :  { %946 = vmatpush1.msra.mxu0 %v3858_v8  ;;  %2683 = vmatpush3.msra.mxu1 %v4028_v37 }
 0x298   :  { %947 = vmatprep.subr.mxu0 %v3864_v10  ;;  %2684 = vmatprep.subr.mxu1 %v4996_v51 }
 0x299   :  { %948 = vmatpush1.msra.mxu0 %v3868_v11  ;;  %2685 = vmatpush3.msra.mxu1 %v4032_v40 }
 0x29a   :  { %949 = vmatprep.subr.mxu0 %v3872_v13  ;;  %2686 = vmatprep.subr.mxu1 %v4996_v51 }
 0x29b   :  { %950 = vmatpush1.msra.mxu0 %v3876_v14  ;;  %2687 = vmatpush3.msra.mxu1 %v4036_v48 }
 0x29c   :  { %951 = vmatprep.subr.mxu0 %v3880_v16  ;;  %2688 = vmatprep.subr.mxu1 %v4996_v51 }
 0x29d   :  { %952 = vmatpush1.msra.mxu0 %v3884_v17  ;;  %2689 = vmatpush3.msra.mxu1 %v4040_v53 }
 0x29e   :  { %953 = vmatprep.subr.mxu0 %v3890_v25  ;;  %2690 = vmatprep.subr.mxu1 %v4996_v51 }
 0x29f   :  { %954 = vmatpush1.msra.mxu0 %v3894_v26  ;;  %2691 = vmatpush3.msra.mxu1 %v4043_v54 }
 0x2a0   :  { %955 = vmatprep.subr.mxu0 %v3900_v29  ;;  %2692 = vmatprep.subr.mxu1 %v4996_v51 }
 0x2a1   :  { %956 = vmatpush1.msra.mxu0 %v3904_v30  ;;  %2693 = vmatpush3.msra.mxu1 %v4046_v55 }
 0x2a2   :  { %957 = vmatprep.subr.mxu0 %v3910_v32  ;;  %2694 = vmatprep.subr.mxu1 %v4996_v51 }
 0x2a3   :  { %958 = vmatpush1.msra.mxu0 %v3914_v33  ;;  %2695 = vmatpush3.msra.mxu1 %v4050_v56 }
 0x2a4   :  { %959 = vmatprep.subr.mxu0 %v3920_v35  ;;  %2696 = vmatprep.subr.mxu1 %v4996_v51 }
 0x2a5   :  { %960 = vmatpush1.msra.mxu0 %v3924_v36  ;;  %2697 = vmatpush3.msra.mxu1 %v4054_v57 }
 0x2a6   :  { %961 = vmatprep.subr.mxu0 %v3930_v38  ;;  %2698 = vmatprep.subr.mxu1 %v4996_v51 }
 0x2a7   :  { %962 = vmatpush1.msra.mxu0 %v3934_v39  ;;  %2699 = vmatpush3.msra.mxu1 %v4058_v58 }
 0x2a8   :  { %963 = vmatprep.subr.mxu0 %v3940_v41  ;;  %2700 = vmatprep.subr.mxu1 %v4996_v51 }
 0x2a9   :  { %964 = vmatpush1.msra.mxu0 %v3944_v42  ;;  %2701 = vmatpush3.msra.mxu1 %v4062_v49  ;;  %v652_v42 = vld [vmem:[%s651_s25] sm:$0x7]  ;;  %s3601_s25 = smov [#allocation24]  }
 0x2aa   :  { %965 = vmatprep.subr.mxu0 %v3950_v46  ;;  %2702 = vmatprep.subr.mxu1 %v4996_v51  ;;  %v818_v26 = vrot.slane %v652_v42, 1 }
 0x2ab   :  { %966 = vmatpush1.msra.mxu0 %v3954_v47  ;;  %2703 = vmatpush3.msra.mxu1 %v4066_v50  ;;  %v629_v47 = vld [vmem:[%s4884_s13] sm:$0x7]  ;;  %s2363_s13 = sld [smem:[#allocation7 + $0x1]] }
 0x2ac   :  { %2744 = vmatprep.subr.mxu0 %v4996_v51  ;;  %2704 = vmatprep.subr.mxu1 %v4996_v51  ;;  %v4080_v46 = vrot.slane %v629_v47, %v3798_v24  ;;  %v4083_v38 = vrot.slane %v629_v47, %v3805_v27  ;;  %v4998_v27 = vsub.s32 2, %v3795_v23  ;;  %v4999_v23 = vld [vmem:[#allocation55_spill] sm:$0xff] }
 0x2ad   :  { %2705 = vmatpush3.msra.mxu1 %v4070_v45 }
 0x2ae   :  { %2709 = vmatprep.subr.mxu1 %v4996_v51  ;;  %4997 = vst [vmem:[#allocation66_spill] sm:$0xff] %v4080_v46  ;;  %v4089_v13 = vrot.slane %v629_v47, %v4998_v27  ;;  %v5006_v47 = vld [vmem:[#allocation45_spill] sm:$0xff]  ;;  %v5009_v27 = vld [vmem:[#allocation48_spill] sm:$0xff] }
 0x2b1   :  { %s932_s27 = smul.u32 3, %s2363_s13  ;;  %s2284_s13 = sshll.u32 %s3601_s25, 4  ;;  %s2285_s13 = int_to_ptr.vmem [resolvable:$true] %s2284_s13 }
 0x2b2   :  { %s3461_s3 = scalar_lea.vmem %s2285_s13, 32  ;;  %p3462_p9 = scmp.lt.s32.totalorder %s2285_s13, %s2285_s13 }
 0x2b3   :  { %s933_s23 = scalar_lea.vmem [#allocation19], %s932_s27  ;;  %s3457_s27 = scalar_lea.vmem %s2285_s13, 16 }
 0x2b4   :  { %p3458_p8 = scmp.ne.s32.totalorder %s2285_s13, %s3457_s27  ;;  %p3463_p10 = scmp.lt.s32.totalorder %s3461_s3, %s3457_s27 }
 0x2b6   :  { %p3464_p11 = por %p3463_p10, %p3462_p9 }
 0x2b8   :  { %p3465_p12 = pnand %p3464_p11, %p3458_p8 }
 0x34c   :  { %v735_v41 = vpop.f32.mrf.mxu1  ;;  %v806_v39 = vpop.f32.mrf.mxu0 }
 0x34d   :  { %v736_v36 = vadd.f32 %v735_v41, %v4080_v46 }
 0x34e   :  { %v737_v35 = vpop.f32.mrf.mxu1  ;;  %v2673_v33 = vpop.f32.mrf.mxu0 }
 0x34f   :  { %v810_v32 = vadd.f32 %v736_v36, %v652_v42  ;;  %v738_v29 = vadd.f32 %v737_v35, %v4083_v38  ;;  %v807_v33 = vadd.f32 %v806_v39, %v4089_v13  ;;  %v828_v36 = vrot.slane %v652_v42, 2  ;;  %v5001_v39 = vld [vmem:[#allocation61_spill] sm:$0xff]  ;;  %v5002_v42 = vld [vmem:[#allocation64_spill] sm:$0xff] }
 0x351   :  { %v2361_v30 = vmul.f32 -1.442695, %v810_v32  ;;  %v820_v25 = vadd.f32 %v818_v26, %v738_v29 }
 0x353   :  { %3100 = vpow2.f32 %v2361_v30  ;;  %v2362_v24 = vmul.f32 -1.442695, %v820_v25 }
 0x355   :  { %3102 = vpow2.f32 %v2362_v24  ;;  %v5008_v24 = vld [vmem:[#allocation47_spill] sm:$0xff] }
 0x360   :  { %v3101_v17 = vpop.eup %3100 }
 0x361   :  { %v814_v16 = vadd.f32 1.0, %v3101_v17 }
 0x362   :  { %v3103_v14 = vpop.eup %3102 }
 0x363   :  { %3104 = vrcp.f32 %v814_v16  ;;  %v824_v41 = vadd.f32 1.0, %v3103_v14  ;;  %v5000_v14 = vld [vmem:[#allocation58_spill] sm:$0xff] }
 0x365   :  { %3106 = vrcp.f32 %v824_v41  ;;  %v5010_v41 = vld [vmem:[#allocation49_spill] sm:$0xff] }
 0x370   :  { %v3105_v32 = vpop.eup %3104 }
 0x371   :  { %v827_v46 = vmul.f32 %v3105_v32, %v807_v33  ;;  %v5011_v33 = vld [vmem:[#allocation50_spill] sm:$0xff]  ;;  %v5013_v32 = vld [vmem:[#allocation52_spill] sm:$0xff] }
 0x372   :  { %v3107_v26 = vpop.eup %3106 }
 0x373   :  { %v830_v35 = vadd.f32 %v828_v36, %v827_v46  ;;  %v832_v25 = vsub.f32 1.0, %v3107_v26  ;;  %v834_v16 = vmul.f32 %v3107_v26, %v3973_v52  ;;  %v5003_v46 = vld [vmem:[#allocation41_spill] sm:$0xff]  ;;  %v5007_v52 = vld [vmem:[#allocation46_spill] sm:$0xff]  ;;  %v5012_v36 = vld [vmem:[#allocation51_spill] sm:$0xff] }
 0x374   :  { %v5015_v26 = vld [vmem:[#allocation54_spill] sm:$0xff] }
 0x375   :  { %3108 = vtanh.f32 %v830_v35  ;;  %v5014_v35 = vld [vmem:[#allocation53_spill] sm:$0xff] }
 0x382   :  { %v3109_v29 = vpop.eup %3108 }
 0x383   :  { %v833_v30 = vmul.f32 %v3109_v29, %v832_v25  ;;  %v5016_v25 = vld [vmem:[#allocation56_spill] sm:$0xff]  ;;  %v5017_v29 = vld [vmem:[#allocation57_spill] sm:$0xff] }
 0x385   :  { %v4093_v17 = vadd.f32 %v834_v16, %v833_v30  ;;  %v5018_v30 = vld [vmem:[#allocation59_spill] sm:$0xff]  ;;  %v5019_v16 = vld [vmem:[#allocation60_spill] sm:$0xff] }
 0x387   :  { %2707 = vmatmul.mubr.f32.vlgmr.msra.gmra.mxu1 %v4093_v17  ;;  %1000 = vmatmul.mubr.f32.vlgmr.msra.gmra.mxu0 %v4093_v17 }
 0x388   :  { %2710 = vmatpush3.msra.mxu1 %v3812_v59  ;;  %2741 = vmatprep.mubr.msk.f32.mxu1 %vm3600_vm0, %v4996_v51 }
 0x389   :  { %2711 = vmatprep.subr.mxu1 %v4996_v51  ;;  %2745 = vmatpush3.msra.mxu0 %v4012_v4 }
 0x38a   :  { %2712 = vmatpush3.msra.mxu1 %v3820_v61  ;;  %2746 = vmatprep.subr.mxu0 %v4996_v51 }
 0x38b   :  { %2713 = vmatprep.subr.mxu1 %v4996_v51  ;;  %2747 = vmatpush3.msra.mxu0 %v4016_v19 }
 0x38c   :  { %2714 = vmatpush3.msra.mxu1 %v3830_v63  ;;  %2748 = vmatprep.subr.mxu0 %v4996_v51 }
 0x38d   :  { %2715 = vmatprep.subr.mxu1 %v4996_v51  ;;  %2749 = vmatpush3.msra.mxu0 %v4020_v22 }
 0x38e   :  { %2716 = vmatpush3.msra.mxu1 %v3840_v2  ;;  %2750 = vmatprep.subr.mxu0 %v4996_v51 }
 0x38f   :  { %2717 = vmatprep.subr.mxu1 %v4996_v51  ;;  %2751 = vmatpush3.msra.mxu0 %v4024_v43 }
 0x390   :  { %2718 = vmatpush3.msra.mxu1 %v3850_v6  ;;  %2752 = vmatprep.subr.mxu0 %v4996_v51 }
 0x391   :  { %2719 = vmatprep.subr.mxu1 %v4996_v51  ;;  %2753 = vmatpush3.msra.mxu0 %v4028_v37 }
 0x392   :  { %2720 = vmatpush3.msra.mxu1 %v3860_v9  ;;  %2754 = vmatprep.subr.mxu0 %v4996_v51 }
 0x393   :  { %2721 = vmatprep.subr.mxu1 %v4996_v51  ;;  %2755 = vmatpush3.msra.mxu0 %v4032_v40 }
 0x394   :  { %2722 = vmatpush3.msra.mxu1 %v3870_v12  ;;  %2756 = vmatprep.subr.mxu0 %v4996_v51 }
 0x395   :  { %2723 = vmatprep.subr.mxu1 %v4996_v51  ;;  %2757 = vmatpush3.msra.mxu0 %v4036_v48 }
 0x396   :  { %2724 = vmatpush3.msra.mxu1 %v3878_v15  ;;  %2758 = vmatprep.subr.mxu0 %v4996_v51 }
 0x397   :  { %2725 = vmatprep.subr.mxu1 %v4996_v51  ;;  %2759 = vmatpush3.msra.mxu0 %v4040_v53 }
 0x398   :  { %2726 = vmatpush3.msra.mxu1 %v3886_v18  ;;  %2760 = vmatprep.subr.mxu0 %v4996_v51 }
 0x399   :  { %2727 = vmatprep.subr.mxu1 %v4996_v51  ;;  %2761 = vmatpush3.msra.mxu0 %v4043_v54 }
 0x39a   :  { %2728 = vmatpush3.msra.mxu1 %v3896_v28  ;;  %2762 = vmatprep.subr.mxu0 %v4996_v51 }
 0x39b   :  { %2729 = vmatprep.subr.mxu1 %v4996_v51  ;;  %2763 = vmatpush3.msra.mxu0 %v4046_v55 }
 0x39c   :  { %2730 = vmatpush3.msra.mxu1 %v3906_v31  ;;  %2764 = vmatprep.subr.mxu0 %v4996_v51 }
 0x39d   :  { %2731 = vmatprep.subr.mxu1 %v4996_v51  ;;  %2765 = vmatpush3.msra.mxu0 %v4050_v56 }
 0x39e   :  { %2732 = vmatpush3.msra.mxu1 %v3916_v34  ;;  %2766 = vmatprep.subr.mxu0 %v4996_v51 }
 0x39f   :  { %2733 = vmatprep.subr.mxu1 %v4996_v51  ;;  %2767 = vmatpush3.msra.mxu0 %v4054_v57 }
 0x3a0   :  { %2734 = vmatpush3.msra.mxu1 %v4999_v23  ;;  %2768 = vmatprep.subr.mxu0 %v4996_v51 }
 0x3a1   :  { %2735 = vmatprep.subr.mxu1 %v4996_v51  ;;  %2769 = vmatpush3.msra.mxu0 %v4058_v58 }
 0x3a2   :  { %2736 = vmatpush3.msra.mxu1 %v5000_v14  ;;  %2770 = vmatprep.subr.mxu0 %v4996_v51 }
 0x3a3   :  { %2737 = vmatprep.subr.mxu1 %v4996_v51  ;;  %2771 = vmatpush3.msra.mxu0 %v4062_v49 }
 0x3a4   :  { %2738 = vmatpush3.msra.mxu1 %v5001_v39  ;;  %2772 = vmatprep.subr.mxu0 %v4996_v51 }
 0x3a5   :  { %2739 = vmatprep.subr.mxu1 %v4996_v51  ;;  %2773 = vmatpush3.msra.mxu0 %v4066_v50 }
 0x3a6   :  { %2740 = vmatpush3.msra.mxu1 %v5002_v42  ;;  %2774 = vmatprep.subr.mxu0 %v4996_v51 }
 0x3a7   :  { %2742 = vmatmul.mubr.f32.vlgmr.msra.gmra.mxu1 %v4093_v17  ;;  %1201 = vmatprep.subr.mxu1 %v5003_v46  ;;  %v5020_v46 = vld [vmem:[#allocation62_spill] sm:$0xff] }
 0x3a8   :  { %1202 = vmatpush1.msra.mxu1 %v3787_v20  ;;  %2775 = vmatpush3.msra.mxu0 %v4070_v45  ;;  %v5004_v20 = vld [vmem:[#allocation43_spill] sm:$0xff] }
 0x3a9   :  { %1203 = vmatprep.subr.mxu1 %v3790_v21  ;;  %2776 = vmatprep.mubr.msk.f32.mxu0 %vm3600_vm0, %v4996_v51  ;;  %v5005_v21 = vld [vmem:[#allocation44_spill] sm:$0xff] }
 0x3aa   :  { %1204 = vmatpush1.msra.mxu1 %v3818_v60  ;;  %1265 = vmatprep.mubr.f32.mxu1 %v4996_v51 }
 0x3ab   :  { %1205 = vmatprep.subr.mxu1 %v3824_v44  ;;  %2779 = vmatprep.subr.mxu0 %v4996_v51 }
 0x3ac   :  { %1206 = vmatpush1.msra.mxu1 %v3828_v62 }
 0x3ad   :  { %1207 = vmatprep.subr.mxu1 %v3834_v0 }
 0x3ae   :  { %1208 = vmatpush1.msra.mxu1 %v3838_v1 }
 0x3af   :  { %1209 = vmatprep.subr.mxu1 %v3844_v3 }
 0x3b0   :  { %1210 = vmatpush1.msra.mxu1 %v3848_v5 }
 0x3b1   :  { %1211 = vmatprep.subr.mxu1 %v3854_v7 }
 0x3b2   :  { %1212 = vmatpush1.msra.mxu1 %v3858_v8 }
 0x3b3   :  { %1213 = vmatprep.subr.mxu1 %v3864_v10 }
 0x3b4   :  { %1214 = vmatpush1.msra.mxu1 %v3868_v11 }
 0x3b5   :  { %1215 = vmatprep.subr.mxu1 %v5004_v20 }
 0x3b6   :  { %1216 = vmatpush1.msra.mxu1 %v5005_v21 }
 0x3b7   :  { %1217 = vmatprep.subr.mxu1 %v5006_v47 }
 0x3b8   :  { %1218 = vmatpush1.msra.mxu1 %v5007_v52 }
 0x3b9   :  { %1219 = vmatprep.subr.mxu1 %v5008_v24 }
 0x3ba   :  { %1220 = vmatpush1.msra.mxu1 %v5009_v27 }
 0x3bb   :  { %1221 = vmatprep.subr.mxu1 %v5010_v41  ;;  %v5021_v41 = vld [vmem:[#allocation63_spill] sm:$0xff] }
 0x3bc   :  { %1222 = vmatpush1.msra.mxu1 %v5011_v33 }
 0x3bd   :  { %1223 = vmatprep.subr.mxu1 %v5012_v36 }
 0x3be   :  { %1224 = vmatpush1.msra.mxu1 %v5013_v32 }
 0x3bf   :  { %1225 = vmatprep.subr.mxu1 %v5014_v35 }
 0x3c0   :  { %1226 = vmatpush1.msra.mxu1 %v5015_v26  ;;  %v4202_v26 = vld [vmem:[%s4886_s15] sm:$0x1] }
 0x3c1   :  { %1227 = vmatprep.subr.mxu1 %v5016_v25  ;;  %5022 = vst [vmem:[#allocation55_spill] sm:$0xff] %v4202_v26 }
 0x3c2   :  { %1228 = vmatpush1.msra.mxu1 %v5017_v29  ;;  %v934_v29 = vld [vmem:[%s933_s23] sm:$0x7] }
 0x3c3   :  { %1229 = vmatprep.subr.mxu1 %v5018_v30  ;;  %v1084_v52 = vrot.slane %v934_v29, 1  ;;  %v1094_v20 = vrot.slane %v934_v29, 2 }
 0x3c4   :  { %1230 = vmatpush1.msra.mxu1 %v5019_v16  ;;  %v5024_v16 = vld [vmem:[#allocation66_spill] sm:$0xff] }
 0x3c5   :  { %1231 = vmatprep.subr.mxu1 %v5020_v46 }
 0x3c6   :  { %1232 = vmatpush1.msra.mxu1 %v5021_v41 }
 0x3c7   :  { %2814 = vmatprep.subr.mxu1 %v4996_v51 }
 0x447   :  { %v902_v25 = vpop.f32.mrf.mxu1  ;;  %v1001_v35 = vpop.f32.mrf.mxu0 }
 0x448   :  { %v4205_v30 = vadd.f32 %v902_v25, %v4202_v26  ;;  %v1002_v46 = vadd.f32 %v1001_v35, %v5024_v16 }
 0x449   :  { %v2708_v32 = vpop.f32.mrf.mxu1  ;;  %v1003_v41 = vpop.f32.mrf.mxu0 }
 0x44a   :  { %5023 = vst [vmem:[#allocation58_spill] sm:$0xff] %v4205_v30  ;;  %v1076_v36 = vadd.f32 %v1002_v46, %v934_v29  ;;  %v4210_v33 = vsel %vm568_vm1, %v4205_v30, -inf  ;;  %v1004_v24 = vadd.f32 %v1003_v41, %v4083_v38 }
 0x44b   :  { %5025 = vst [vmem:[#allocation61_spill] sm:$0xff] %v4210_v33  ;;  %907 = vmax.xlane.f32.xlu0 %v4210_v33 }
 0x44c   :  { %v2364_v27 = vmul.f32 -1.442695, %v1076_v36  ;;  %v1086_v47 = vadd.f32 %v1084_v52, %v1004_v24 }
 0x44e   :  { %3110 = vpow2.f32 %v2364_v27  ;;  %v2365_v25 = vmul.f32 -1.442695, %v1086_v47 }
 0x450   :  { %3112 = vpow2.f32 %v2365_v25 }
 0x45b   :  { %v3111_v26 = vpop.eup %3110 }
 0x45c   :  { %v1080_v35 = vadd.f32 1.0, %v3111_v26 }
 0x45d   :  { %v3113_v32 = vpop.eup %3112 }
 0x45e   :  { %3114 = vrcp.f32 %v1080_v35  ;;  %v1090_v46 = vadd.f32 1.0, %v3113_v32 }
 0x460   :  { %3116 = vrcp.f32 %v1090_v46 }
 0x467   :  { %v1072_v16 = vpop.f32.mrf.mxu1 }
 0x468   :  { %v1073_v30 = vadd.f32 %v1072_v16, %v4089_v13 }
 0x469   :  { %v2743_v21 = vpop.f32.mrf.mxu1 }
 0x46b   :  { %v3115_v11 = vpop.eup %3114 }
 0x46c   :  { %v1093_v36 = vmul.f32 %v3115_v11, %v1073_v30  ;;  %v5039_v11 = vld [vmem:[#allocation56_spill] sm:$0xff] }
 0x46d   :  { %v3117_v41 = vpop.eup %3116 }
 0x46e   :  { %v1096_v33 = vadd.f32 %v1094_v20, %v1093_v36  ;;  %v1098_v27 = vsub.f32 1.0, %v3117_v41  ;;  %v1100_v24 = vmul.f32 %v3117_v41, %v4093_v17  ;;  %v1200_v17 = vld [vmem:[%s1199_s6] sm:$0x7]  ;;  %v5045_v20 = vld [vmem:[#allocation55_spill] sm:$0xff] }
 0x46f   :  { %v1350_v36 = vrot.slane %v1200_v17, 1 }
 0x470   :  { %3118 = vtanh.f32 %v1096_v33  ;;  %v5047_v33 = vld [vmem:[#allocation66_spill] sm:$0xff] }
 0x47d   :  { %v3119_v52 = vpop.eup %3118 }
 0x47e   :  { %v1099_v47 = vmul.f32 %v3119_v52, %v1098_v27 }
 0x480   :  { %v4216_v26 = vadd.f32 %v1100_v24, %v1099_v47 }
 0x482   :  { %2777 = vmatmul.mubr.f32.vlgmr.msra.gmra.mxu0 %v4216_v26  ;;  %1266 = vmatmul.mubr.f32.vlgmr.msra.gmra.mxu1 %v4216_v26 }
 0x483   :  { %2780 = vmatpush3.msra.mxu0 %v3812_v59  ;;  %2811 = vmatprep.mubr.msk.f32.mxu0 %vm3600_vm0, %v4996_v51  ;;  %v4284_v59 = vld [vmem:[#allocation20 + $0x170] sm:$0xff] }
 0x484   :  { %2781 = vmatprep.subr.mxu0 %v4996_v51  ;;  %2815 = vmatpush3.msra.mxu1 %v4012_v4 }
 0x485   :  { %2782 = vmatpush3.msra.mxu0 %v3820_v61  ;;  %2816 = vmatprep.subr.mxu1 %v4996_v51  ;;  %v4287_v61 = vld [vmem:[#allocation20 + $0x168] sm:$0xff] }
 0x486   :  { %2783 = vmatprep.subr.mxu0 %v4996_v51  ;;  %2817 = vmatpush3.msra.mxu1 %v4016_v19 }
 0x487   :  { %2784 = vmatpush3.msra.mxu0 %v3830_v63  ;;  %2818 = vmatprep.subr.mxu1 %v4996_v51  ;;  %v4291_v63 = vld [vmem:[#allocation20 + $0x158] sm:$0xff] }
 0x488   :  { %2785 = vmatprep.subr.mxu0 %v4996_v51  ;;  %2819 = vmatpush3.msra.mxu1 %v4020_v22 }
 0x489   :  { %2786 = vmatpush3.msra.mxu0 %v3840_v2  ;;  %2820 = vmatprep.subr.mxu1 %v4996_v51  ;;  %v5028_v2 = vld [vmem:[#allocation44_spill] sm:$0xff] }
 0x48a   :  { %2787 = vmatprep.subr.mxu0 %v4996_v51  ;;  %2821 = vmatpush3.msra.mxu1 %v4024_v43 }
 0x48b   :  { %2788 = vmatpush3.msra.mxu0 %v3850_v6  ;;  %2822 = vmatprep.subr.mxu1 %v4996_v51  ;;  %v5034_v6 = vld [vmem:[#allocation50_spill] sm:$0xff] }
 0x48c   :  { %2789 = vmatprep.subr.mxu0 %v4996_v51  ;;  %2823 = vmatpush3.msra.mxu1 %v4028_v37 }
 0x48d   :  { %2790 = vmatpush3.msra.mxu0 %v3860_v9  ;;  %2824 = vmatprep.subr.mxu1 %v4996_v51  ;;  %v5037_v9 = vld [vmem:[#allocation53_spill] sm:$0xff] }
 0x48e   :  { %2791 = vmatprep.subr.mxu0 %v4996_v51  ;;  %2825 = vmatpush3.msra.mxu1 %v4032_v40 }
 0x48f   :  { %2792 = vmatpush3.msra.mxu0 %v3870_v12  ;;  %2826 = vmatprep.subr.mxu1 %v4996_v51  ;;  %v5040_v12 = vld [vmem:[#allocation57_spill] sm:$0xff] }
 0x490   :  { %2793 = vmatprep.subr.mxu0 %v4996_v51  ;;  %2827 = vmatpush3.msra.mxu1 %v4036_v48 }
 0x491   :  { %2794 = vmatpush3.msra.mxu0 %v3878_v15  ;;  %2828 = vmatprep.subr.mxu1 %v4996_v51  ;;  %v5041_v15 = vld [vmem:[#allocation59_spill] sm:$0xff] }
 0x492   :  { %2795 = vmatprep.subr.mxu0 %v4996_v51  ;;  %2829 = vmatpush3.msra.mxu1 %v4040_v53 }
 0x493   :  { %2796 = vmatpush3.msra.mxu0 %v3886_v18  ;;  %2830 = vmatprep.subr.mxu1 %v4996_v51  ;;  %v5042_v18 = vld [vmem:[#allocation60_spill] sm:$0xff] }
 0x494   :  { %2797 = vmatprep.subr.mxu0 %v4996_v51  ;;  %2831 = vmatpush3.msra.mxu1 %v4043_v54 }
 0x495   :  { %2798 = vmatpush3.msra.mxu0 %v3896_v28  ;;  %2832 = vmatprep.subr.mxu1 %v4996_v51  ;;  %v5043_v28 = vld [vmem:[#allocation62_spill] sm:$0xff] }
 0x496   :  { %2799 = vmatprep.subr.mxu0 %v4996_v51  ;;  %2833 = vmatpush3.msra.mxu1 %v4046_v55 }
 0x497   :  { %2800 = vmatpush3.msra.mxu0 %v3906_v31  ;;  %2834 = vmatprep.subr.mxu1 %v4996_v51  ;;  %v5044_v31 = vld [vmem:[#allocation63_spill] sm:$0xff] }
 0x498   :  { %2801 = vmatprep.subr.mxu0 %v4996_v51  ;;  %2835 = vmatpush3.msra.mxu1 %v4050_v56 }
 0x499   :  { %2802 = vmatpush3.msra.mxu0 %v3916_v34  ;;  %2836 = vmatprep.subr.mxu1 %v4996_v51 }
 0x49a   :  { %2803 = vmatprep.subr.mxu0 %v4996_v51  ;;  %2837 = vmatpush3.msra.mxu1 %v4054_v57 }
 0x49b   :  { %2804 = vmatpush3.msra.mxu0 %v4999_v23  ;;  %2838 = vmatprep.subr.mxu1 %v4996_v51 }
 0x49c   :  { %2805 = vmatprep.subr.mxu0 %v4996_v51  ;;  %2839 = vmatpush3.msra.mxu1 %v4058_v58 }
 0x49d   :  { %2806 = vmatpush3.msra.mxu0 %v5000_v14  ;;  %2840 = vmatprep.subr.mxu1 %v4996_v51 }
 0x49e   :  { %2807 = vmatprep.subr.mxu0 %v4996_v51  ;;  %2841 = vmatpush3.msra.mxu1 %v4062_v49 }
 0x49f   :  { %2808 = vmatpush3.msra.mxu0 %v5001_v39  ;;  %2842 = vmatprep.subr.mxu1 %v4996_v51 }
 0x4a0   :  { %2809 = vmatprep.subr.mxu0 %v4996_v51  ;;  %2843 = vmatpush3.msra.mxu1 %v4066_v50 }
 0x4a1   :  { %2810 = vmatpush3.msra.mxu0 %v5002_v42  ;;  %2844 = vmatprep.subr.mxu1 %v4996_v51 }
 0x4a2   :  { %2812 = vmatmul.mubr.f32.vlgmr.msra.gmra.mxu0 %v4216_v26  ;;  %1467 = vmatprep.subr.mxu0 %v4284_v59 }
 0x4a3   :  { %1468 = vmatpush1.msra.mxu0 %v4287_v61  ;;  %2845 = vmatpush3.msra.mxu1 %v4070_v45 }
 0x4a4   :  { %1469 = vmatprep.subr.mxu0 %v4291_v63  ;;  %2846 = vmatprep.mubr.msk.f32.mxu1 %vm3600_vm0, %v4996_v51 }
 0x4a5   :  { %1470 = vmatpush1.msra.mxu0 %v3818_v60  ;;  %1531 = vmatprep.mubr.f32.mxu0 %v4996_v51  ;;  %v5026_v60 = vld [vmem:[#allocation42_spill] sm:$0xff] }
 0x4a6   :  { %1471 = vmatprep.subr.mxu0 %v3824_v44  ;;  %2849 = vmatprep.subr.mxu1 %v4996_v51  ;;  %v5027_v44 = vld [vmem:[#allocation43_spill] sm:$0xff] }
 0x4a7   :  { %1472 = vmatpush1.msra.mxu0 %v3828_v62  ;;  %v5029_v62 = vld [vmem:[#allocation45_spill] sm:$0xff] }
 0x4a8   :  { %1473 = vmatprep.subr.mxu0 %v3834_v0  ;;  %v5030_v0 = vld [vmem:[#allocation46_spill] sm:$0xff] }
 0x4a9   :  { %1474 = vmatpush1.msra.mxu0 %v3838_v1  ;;  %v5031_v1 = vld [vmem:[#allocation47_spill] sm:$0xff] }
 0x4aa   :  { %1475 = vmatprep.subr.mxu0 %v3844_v3  ;;  %v5032_v3 = vld [vmem:[#allocation48_spill] sm:$0xff] }
 0x4ab   :  { %1476 = vmatpush1.msra.mxu0 %v3848_v5  ;;  %v5033_v5 = vld [vmem:[#allocation49_spill] sm:$0xff] }
 0x4ac   :  { %1477 = vmatprep.subr.mxu0 %v3854_v7  ;;  %v5035_v7 = vld [vmem:[#allocation51_spill] sm:$0xff] }
 0x4ad   :  { %1478 = vmatpush1.msra.mxu0 %v3858_v8  ;;  %v5036_v8 = vld [vmem:[#allocation52_spill] sm:$0xff] }
 0x4ae   :  { %1479 = vmatprep.subr.mxu0 %v3864_v10  ;;  %v5038_v10 = vld [vmem:[#allocation54_spill] sm:$0xff] }
 0x4af   :  { %1480 = vmatpush1.msra.mxu0 %v5026_v60 }
 0x4b0   :  { %1481 = vmatprep.subr.mxu0 %v5027_v44 }
 0x4b1   :  { %1482 = vmatpush1.msra.mxu0 %v5028_v2 }
 0x4b2   :  { %1483 = vmatprep.subr.mxu0 %v5029_v62 }
 0x4b3   :  { %1484 = vmatpush1.msra.mxu0 %v5030_v0  ;;  %v1360_v0 = vrot.slane %v1200_v17, 2 }
 0x4b4   :  { %1485 = vmatprep.subr.mxu0 %v5031_v1 }
 0x4b5   :  { %1486 = vmatpush1.msra.mxu0 %v5032_v3 }
 0x4b6   :  { %1487 = vmatprep.subr.mxu0 %v5033_v5 }
 0x4b7   :  { %1488 = vmatpush1.msra.mxu0 %v5034_v6 }
 0x4b8   :  { %1489 = vmatprep.subr.mxu0 %v5035_v7 }
 0x4b9   :  { %1490 = vmatpush1.msra.mxu0 %v5036_v8 }
 0x4ba   :  { %1491 = vmatprep.subr.mxu0 %v5037_v9 }
 0x4bb   :  { %1492 = vmatpush1.msra.mxu0 %v5038_v10 }
 0x4bc   :  { %1493 = vmatprep.subr.mxu0 %v5039_v11 }
 0x4bd   :  { %1494 = vmatpush1.msra.mxu0 %v5040_v12  ;;  %v4344_v12 = vld [vmem:[#allocation20 + $0x178] sm:$0xff] }
 0x4be   :  { %1495 = vmatprep.subr.mxu0 %v5041_v15  ;;  %v4351_v15 = vld [vmem:[#allocation20 + $0x160] sm:$0xff] }
 0x4bf   :  { %1496 = vmatpush1.msra.mxu0 %v5042_v18  ;;  %v4469_v18 = vld [vmem:[#allocation20 + $0xe0] sm:$0xff] }
 0x4c0   :  { %1497 = vmatprep.subr.mxu0 %v5043_v28  ;;  %v4472_v28 = vld [vmem:[#allocation20 + $0xd8] sm:$0xff] }
 0x4c1   :  { %1498 = vmatpush1.msra.mxu0 %v5044_v31  ;;  %v4475_v31 = vld [vmem:[#allocation20 + $0xc8] sm:$0xff] }
 0x4c2   :  { %2884 = vmatprep.subr.mxu0 %v4996_v51 }
 0x542   :  { %v1168_v34 = vpop.f32.mrf.mxu0  ;;  %v1267_v23 = vpop.f32.mrf.mxu1 }
 0x543   :  { %v4329_v21 = vadd.f32 %v1168_v34, %v5045_v20  ;;  %v1268_v29 = vadd.f32 %v1267_v23, %v5047_v33  ;;  %v4478_v34 = vld [vmem:[#allocation20 + $0xc0] sm:$0xff]  ;;  %v4484_v23 = vld [vmem:[#allocation20 + $0xa8] sm:$0xff] }
 0x544   :  { %v2778_v30 = vpop.f32.mrf.mxu0  ;;  %v1269_v16 = vpop.f32.mrf.mxu1 }
 0x545   :  { %5046 = vst [vmem:[#allocation64_spill] sm:$0xff] %v4329_v21  ;;  %v1342_v25 = vadd.f32 %v1268_v29, %v1200_v17  ;;  %v4334_v35 = vsel %vm568_vm1, %v4329_v21, -inf  ;;  %v1270_v46 = vadd.f32 %v1269_v16, %v4083_v38  ;;  %v4481_v17 = vld [vmem:[#allocation20 + $0xb0] sm:$0xff]  ;;  %v4487_v29 = vld [vmem:[#allocation20 + $0x98] sm:$0xff]  ;;  %v4493_v16 = vld [vmem:[#allocation20 + $0x80] sm:$0xff] }
 0x546   :  { %5048 = vst [vmem:[#allocation41_spill] sm:$0xff] %v4334_v35  ;;  %1173 = vmax.xlane.f32.xlu0 %v4334_v35  ;;  %v4490_v30 = vld [vmem:[#allocation20 + $0x90] sm:$0xff] }
 0x547   :  { %v2368_v32 = vmul.f32 -1.442695, %v1342_v25  ;;  %v1352_v41 = vadd.f32 %v1350_v36, %v1270_v46  ;;  %v4496_v25 = vld [vmem:[#allocation20 + $0x78] sm:$0xff]  ;;  %v4502_v46 = vld [vmem:[#allocation20 + $0x60] sm:$0xff]  ;;  %v4505_v36 = vld [vmem:[#allocation20 + $0x50] sm:$0xff] }
 0x549   :  { %3120 = vpow2.f32 %v2368_v32  ;;  %v2369_v27 = vmul.f32 -1.442695, %v1352_v41  ;;  %v4499_v32 = vld [vmem:[#allocation20 + $0x68] sm:$0xff] }
 0x54a   :  { %v4508_v41 = vld [vmem:[#allocation20 + $0x48] sm:$0xff] }
 0x54b   :  { %3122 = vpow2.f32 %v2369_v27  ;;  %v4511_v27 = vld [vmem:[#allocation20 + $0x38] sm:$0xff] }
 0x556   :  { %v3121_v52 = vpop.eup %3120 }
 0x557   :  { %v1346_v47 = vadd.f32 1.0, %v3121_v52  ;;  %v4514_v52 = vld [vmem:[#allocation20 + $0x30] sm:$0xff] }
 0x558   :  { %v3123_v24 = vpop.eup %3122 }
 0x559   :  { %3124 = vrcp.f32 %v1346_v47  ;;  %v1356_v44 = vadd.f32 1.0, %v3123_v24  ;;  %v4517_v47 = vld [vmem:[#allocation20 + $0x20] sm:$0xff]  ;;  %v4520_v24 = vld [vmem:[#allocation20 + $0x18] sm:$0xff] }
 0x55a   :  { %5049 = vst [vmem:[#allocation42_spill] sm:$0xff] %v4520_v24 }
 0x55b   :  { %3126 = vrcp.f32 %v1356_v44  ;;  %v4526_v44 = vld [vmem:[#allocation20] sm:$0xff] }
 0x55c   :  { %5051 = vst [vmem:[#allocation44_spill] sm:$0xff] %v4526_v44 }
 0x562   :  { %v1338_v60 = vpop.f32.mrf.mxu0 }
 0x563   :  { %v1339_v62 = vadd.f32 %v1338_v60, %v4089_v13  ;;  %v4523_v60 = vld [vmem:[#allocation20 + $0x8] sm:$0xff] }
 0x564   :  { %v2813_v2 = vpop.f32.mrf.mxu0  ;;  %5050 = vst [vmem:[#allocation43_spill] sm:$0xff] %v4523_v60 }
 0x566   :  { %v3125_v1 = vpop.eup %3124 }
 0x567   :  { %v1359_v3 = vmul.f32 %v3125_v1, %v1339_v62  ;;  %v1466_v62 = vld [vmem:[%s1465_s21] sm:$0x7] }
 0x568   :  { %v3127_v6 = vpop.eup %3126  ;;  %v1616_v21 = vrot.slane %v1466_v62, 1 }
 0x569   :  { %v1362_v5 = vadd.f32 %v1360_v0, %v1359_v3  ;;  %v1364_v7 = vsub.f32 1.0, %v3127_v6  ;;  %v1366_v10 = vmul.f32 %v3127_v6, %v4216_v26  ;;  %v4357_v26 = vld [vmem:[#allocation20 + $0x148] sm:$0xff] }
 0x56b   :  { %3128 = vtanh.f32 %v1362_v5 }
 0x578   :  { %v3129_v8 = vpop.eup %3128 }
 0x579   :  { %v1365_v9 = vmul.f32 %v3129_v8, %v1364_v7 }
 0x57b   :  { %v4340_v11 = vadd.f32 %v1366_v10, %v1365_v9 }
 0x57d   :  { %2847 = vmatmul.mubr.f32.vlgmr.msra.gmra.mxu1 %v4340_v11  ;;  %1532 = vmatmul.mubr.f32.vlgmr.msra.gmra.mxu0 %v4340_v11 }
 0x57e   :  { %2850 = vmatpush3.msra.mxu1 %v4344_v12  ;;  %2881 = vmatprep.mubr.msk.f32.mxu1 %vm3600_vm0, %v4996_v51 }
 0x57f   :  { %2851 = vmatprep.subr.mxu1 %v4996_v51  ;;  %2885 = vmatpush3.msra.mxu0 %v4012_v4  ;;  %v4363_v4 = vld [vmem:[#allocation20 + $0x130] sm:$0xff] }
 0x580   :  { %2852 = vmatpush3.msra.mxu1 %v4351_v15  ;;  %2886 = vmatprep.subr.mxu0 %v4996_v51 }
 0x581   :  { %2853 = vmatprep.subr.mxu1 %v4996_v51  ;;  %2887 = vmatpush3.msra.mxu0 %v4016_v19  ;;  %v4369_v19 = vld [vmem:[#allocation20 + $0x118] sm:$0xff] }
 0x582   :  { %2854 = vmatpush3.msra.mxu1 %v4357_v26  ;;  %2888 = vmatprep.subr.mxu0 %v4996_v51 }
 0x583   :  { %2855 = vmatprep.subr.mxu1 %v4996_v51  ;;  %2889 = vmatpush3.msra.mxu0 %v4020_v22  ;;  %v4375_v22 = vld [vmem:[#allocation20 + $0x100] sm:$0xff] }
 0x584   :  { %2856 = vmatpush3.msra.mxu1 %v4363_v4  ;;  %2890 = vmatprep.subr.mxu0 %v4996_v51 }
 0x585   :  { %2857 = vmatprep.subr.mxu1 %v4996_v51  ;;  %2891 = vmatpush3.msra.mxu0 %v4024_v43  ;;  %v4381_v43 = vld [vmem:[#allocation20 + $0xe8] sm:$0xff] }
 0x586   :  { %2858 = vmatpush3.msra.mxu1 %v4369_v19  ;;  %2892 = vmatprep.subr.mxu0 %v4996_v51 }
 0x587   :  { %2859 = vmatprep.subr.mxu1 %v4996_v51  ;;  %2893 = vmatpush3.msra.mxu0 %v4028_v37  ;;  %v4387_v37 = vld [vmem:[#allocation20 + $0xd0] sm:$0xff] }
 0x588   :  { %2860 = vmatpush3.msra.mxu1 %v4375_v22  ;;  %2894 = vmatprep.subr.mxu0 %v4996_v51 }
 0x589   :  { %2861 = vmatprep.subr.mxu1 %v4996_v51  ;;  %2895 = vmatpush3.msra.mxu0 %v4032_v40  ;;  %v4393_v40 = vld [vmem:[#allocation20 + $0xb8] sm:$0xff] }
 0x58a   :  { %2862 = vmatpush3.msra.mxu1 %v4381_v43  ;;  %2896 = vmatprep.subr.mxu0 %v4996_v51 }
 0x58b   :  { %2863 = vmatprep.subr.mxu1 %v4996_v51  ;;  %2897 = vmatpush3.msra.mxu0 %v4036_v48  ;;  %v4399_v48 = vld [vmem:[#allocation20 + $0xa0] sm:$0xff] }
 0x58c   :  { %2864 = vmatpush3.msra.mxu1 %v4387_v37  ;;  %2898 = vmatprep.subr.mxu0 %v4996_v51 }
 0x58d   :  { %2865 = vmatprep.subr.mxu1 %v4996_v51  ;;  %2899 = vmatpush3.msra.mxu0 %v4040_v53  ;;  %v4405_v53 = vld [vmem:[#allocation20 + $0x88] sm:$0xff] }
 0x58e   :  { %2866 = vmatpush3.msra.mxu1 %v4393_v40  ;;  %2900 = vmatprep.subr.mxu0 %v4996_v51 }
 0x58f   :  { %2867 = vmatprep.subr.mxu1 %v4996_v51  ;;  %2901 = vmatpush3.msra.mxu0 %v4043_v54  ;;  %v4411_v54 = vld [vmem:[#allocation20 + $0x70] sm:$0xff] }
 0x590   :  { %2868 = vmatpush3.msra.mxu1 %v4399_v48  ;;  %2902 = vmatprep.subr.mxu0 %v4996_v51 }
 0x591   :  { %2869 = vmatprep.subr.mxu1 %v4996_v51  ;;  %2903 = vmatpush3.msra.mxu0 %v4046_v55  ;;  %v4417_v55 = vld [vmem:[#allocation20 + $0x58] sm:$0xff] }
 0x592   :  { %2870 = vmatpush3.msra.mxu1 %v4405_v53  ;;  %2904 = vmatprep.subr.mxu0 %v4996_v51 }
 0x593   :  { %2871 = vmatprep.subr.mxu1 %v4996_v51  ;;  %2905 = vmatpush3.msra.mxu0 %v4050_v56  ;;  %v4440_v56 = vld [vmem:[#allocation20 + $0x150] sm:$0xff] }
 0x594   :  { %2872 = vmatpush3.msra.mxu1 %v4411_v54  ;;  %2906 = vmatprep.subr.mxu0 %v4996_v51 }
 0x595   :  { %2873 = vmatprep.subr.mxu1 %v4996_v51  ;;  %2907 = vmatpush3.msra.mxu0 %v4054_v57  ;;  %v4444_v57 = vld [vmem:[#allocation20 + $0x140] sm:$0xff] }
 0x596   :  { %2874 = vmatpush3.msra.mxu1 %v4417_v55  ;;  %2908 = vmatprep.subr.mxu0 %v4996_v51 }
 0x597   :  { %2875 = vmatprep.subr.mxu1 %v4996_v51  ;;  %2909 = vmatpush3.msra.mxu0 %v4058_v58  ;;  %v4448_v58 = vld [vmem:[#allocation20 + $0x138] sm:$0xff] }
 0x598   :  { %2876 = vmatpush3.msra.mxu1 %v5000_v14  ;;  %2910 = vmatprep.subr.mxu0 %v4996_v51  ;;  %v4460_v14 = vld [vmem:[#allocation20 + $0x108] sm:$0xff] }
 0x599   :  { %2877 = vmatprep.subr.mxu1 %v4996_v51  ;;  %2911 = vmatpush3.msra.mxu0 %v4062_v49  ;;  %v4454_v49 = vld [vmem:[#allocation20 + $0x120] sm:$0xff] }
 0x59a   :  { %2878 = vmatpush3.msra.mxu1 %v5001_v39  ;;  %2912 = vmatprep.subr.mxu0 %v4996_v51  ;;  %v4463_v39 = vld [vmem:[#allocation20 + $0xf8] sm:$0xff] }
 0x59b   :  { %2879 = vmatprep.subr.mxu1 %v4996_v51  ;;  %2913 = vmatpush3.msra.mxu0 %v4066_v50  ;;  %v4457_v50 = vld [vmem:[#allocation20 + $0x110] sm:$0xff] }
 0x59c   :  { %2880 = vmatpush3.msra.mxu1 %v5002_v42  ;;  %2914 = vmatprep.subr.mxu0 %v4996_v51  ;;  %v4466_v42 = vld [vmem:[#allocation20 + $0xf0] sm:$0xff] }
 0x59d   :  { %2882 = vmatmul.mubr.f32.vlgmr.msra.gmra.mxu1 %v4340_v11  ;;  %1733 = vmatprep.subr.mxu1 %v4284_v59 }
 0x59e   :  { %1734 = vmatpush1.msra.mxu1 %v4287_v61  ;;  %2915 = vmatpush3.msra.mxu0 %v4070_v45  ;;  %v4451_v45 = vld [vmem:[#allocation20 + $0x128] sm:$0xff] }
 0x59f   :  { %1735 = vmatprep.subr.mxu1 %v4291_v63  ;;  %2916 = vmatprep.mubr.msk.f32.mxu0 %vm3600_vm0, %v4996_v51 }
 0x5a0   :  { %1736 = vmatpush1.msra.mxu1 %v4440_v56  ;;  %1797 = vmatprep.mubr.f32.mxu1 %v4996_v51 }
 0x5a1   :  { %1737 = vmatprep.subr.mxu1 %v4444_v57  ;;  %2919 = vmatprep.subr.mxu0 %v4996_v51 }
 0x5a2   :  { %1738 = vmatpush1.msra.mxu1 %v4448_v58 }
 0x5a3   :  { %1739 = vmatprep.subr.mxu1 %v4451_v45 }
 0x5a4   :  { %1740 = vmatpush1.msra.mxu1 %v4454_v49 }
 0x5a5   :  { %1741 = vmatprep.subr.mxu1 %v4457_v50 }
 0x5a6   :  { %1742 = vmatpush1.msra.mxu1 %v4460_v14 }
 0x5a7   :  { %1743 = vmatprep.subr.mxu1 %v4463_v39 }
 0x5a8   :  { %1744 = vmatpush1.msra.mxu1 %v4466_v42 }
 0x5a9   :  { %1745 = vmatprep.subr.mxu1 %v4469_v18 }
 0x5aa   :  { %1746 = vmatpush1.msra.mxu1 %v4472_v28 }
 0x5ab   :  { %1747 = vmatprep.subr.mxu1 %v4475_v31 }
 0x5ac   :  { %1748 = vmatpush1.msra.mxu1 %v4478_v34 }
 0x5ad   :  { %1749 = vmatprep.subr.mxu1 %v4481_v17 }
 0x5ae   :  { %1750 = vmatpush1.msra.mxu1 %v4484_v23 }
 0x5af   :  { %1751 = vmatprep.subr.mxu1 %v4487_v29 }
 0x5b0   :  { %1752 = vmatpush1.msra.mxu1 %v4490_v30 }
 0x5b1   :  { %1753 = vmatprep.subr.mxu1 %v4493_v16 }
 0x5b2   :  { %1754 = vmatpush1.msra.mxu1 %v4496_v25 }
 0x5b3   :  { %1755 = vmatprep.subr.mxu1 %v4499_v32 }
 0x5b4   :  { %1756 = vmatpush1.msra.mxu1 %v4502_v46 }
 0x5b5   :  { %1757 = vmatprep.subr.mxu1 %v4505_v36 }
 0x5b6   :  { %1758 = vmatpush1.msra.mxu1 %v4508_v41 }
 0x5b7   :  { %1759 = vmatprep.subr.mxu1 %v4511_v27 }
 0x5b8   :  { %1760 = vmatpush1.msra.mxu1 %v4514_v52 }
 0x5b9   :  { %1761 = vmatprep.subr.mxu1 %v4517_v47 }
 0x5ba   :  { %1762 = vmatpush1.msra.mxu1 %v4520_v24 }
 0x5bb   :  { %1763 = vmatprep.subr.mxu1 %v4523_v60  ;;  %v1626_v60 = vrot.slane %v1466_v62, 2 }
 0x5bc   :  { %1764 = vmatpush1.msra.mxu1 %v4526_v44 }
 0x5bd   :  { %2954 = vmatprep.subr.mxu1 %v4996_v51 }
 0x63d   :  { %v1434_v2 = vpop.f32.mrf.mxu1  ;;  %v1533_v0 = vpop.f32.mrf.mxu0 }
 0x63e   :  { %v4531_v1 = vadd.f32 %v1434_v2, %v5045_v20  ;;  %v1534_v3 = vadd.f32 %v1533_v0, %v5047_v33 }
 0x63f   :  { %v2848_v5 = vpop.f32.mrf.mxu1  ;;  %v1535_v6 = vpop.f32.mrf.mxu0 }
 0x640   :  { %5052 = vst [vmem:[#allocation45_spill] sm:$0xff] %v4531_v1  ;;  %v1608_v7 = vadd.f32 %v1534_v3, %v1466_v62  ;;  %v4536_v8 = vsel %vm568_vm1, %v4531_v1, -inf  ;;  %v1536_v10 = vadd.f32 %v1535_v6, %v4083_v38  ;;  %v4580_v62 = vld [vmem:[#allocation22 + $0x50] sm:$0xff] }
 0x641   :  { %5053 = vst [vmem:[#allocation46_spill] sm:$0xff] %v4536_v8  ;;  %1439 = vmax.xlane.f32.xlu1 %v4536_v8 }
 0x642   :  { %v2372_v9 = vmul.f32 -1.442695, %v1608_v7  ;;  %v1618_v35 = vadd.f32 %v1616_v21, %v1536_v10 }
 0x644   :  { %3130 = vpow2.f32 %v2372_v9  ;;  %v2373_v44 = vmul.f32 -1.442695, %v1618_v35 }
 0x646   :  { %3132 = vpow2.f32 %v2373_v44 }
 0x651   :  { %v3131_v2 = vpop.eup %3130 }
 0x652   :  { %v1612_v20 = vadd.f32 1.0, %v3131_v2  ;;  %v4598_v2 = vld [vmem:[#allocation22 + $0x38] sm:$0xff] }
 0x653   :  { %v3133_v0 = vpop.eup %3132 }
 0x654   :  { %3134 = vrcp.f32 %v1612_v20  ;;  %v1622_v3 = vadd.f32 1.0, %v3133_v0  ;;  %v4550_v20 = vld [vmem:[#allocation22 + $0x78] sm:$0xff]  ;;  %v4604_v0 = vld [vmem:[#allocation22 + $0x30] sm:$0xff] }
 0x656   :  { %3136 = vrcp.f32 %v1622_v3  ;;  %v4616_v3 = vld [vmem:[#allocation22 + $0x20] sm:$0xff] }
 0x65d   :  { %v1604_v5 = vpop.f32.mrf.mxu1 }
 0x65e   :  { %v1605_v1 = vadd.f32 %v1604_v5, %v4089_v13  ;;  %v4610_v5 = vld [vmem:[#allocation22 + $0x28] sm:$0xff] }
 0x65f   :  { %v2883_v33 = vpop.f32.mrf.mxu1 }
 0x660   :  { %v4556_v33 = vld [vmem:[#allocation22 + $0x70] sm:$0xff] }
 0x661   :  { %v3135_v24 = vpop.eup %3134 }
 0x662   :  { %v1625_v7 = vmul.f32 %v3135_v24, %v1605_v1  ;;  %v4568_v24 = vld [vmem:[#allocation22 + $0x60] sm:$0xff]  ;;  %v4586_v1 = vld [vmem:[#allocation22 + $0x48] sm:$0xff] }
 0x663   :  { %v3137_v6 = vpop.eup %3136 }
 0x664   :  { %v1628_v8 = vadd.f32 %v1626_v60, %v1625_v7  ;;  %v1630_v9 = vsub.f32 1.0, %v3137_v6  ;;  %v1632_v44 = vmul.f32 %v3137_v6, %v4340_v11  ;;  %v4562_v11 = vld [vmem:[#allocation22 + $0x68] sm:$0xff]  ;;  %v4574_v60 = vld [vmem:[#allocation22 + $0x58] sm:$0xff]  ;;  %v4625_v6 = vld [vmem:[#allocation20 + $0x40] sm:$0xff] }
 0x665   :  { %v4622_v7 = vld [vmem:[#allocation22 + $0x18] sm:$0xff] }
 0x666   :  { %3138 = vtanh.f32 %v1628_v8  ;;  %v4592_v8 = vld [vmem:[#allocation22 + $0x40] sm:$0xff] }
 0x673   :  { %v3139_v21 = vpop.eup %3138 }
 0x674   :  { %v1631_v35 = vmul.f32 %v3139_v21, %v1630_v9  ;;  %v4630_v9 = vld [vmem:[#allocation22 + $0x10] sm:$0xff]  ;;  %v4633_v21 = vld [vmem:[#allocation20 + $0x28] sm:$0xff] }
 0x675   :  { %5054 = vst [vmem:[#allocation47_spill] sm:$0xff] %v4633_v21 }
 0x676   :  { %v4542_v10 = vadd.f32 %v1632_v44, %v1631_v35  ;;  %v4638_v35 = vld [vmem:[#allocation22 + $0x8] sm:$0xff]  ;;  %v4641_v44 = vld [vmem:[#allocation20 + $0x10] sm:$0xff] }
 0x678   :  { %2917 = vmatmul.mubr.f32.vlgmr.msra.gmra.mxu0 %v4542_v10  ;;  %1798 = vmatmul.mubr.f32.vlgmr.msra.gmra.mxu1 %v4542_v10 }
 0x679   :  { %2920 = vmatpush3.msra.mxu0 %v4344_v12  ;;  %2951 = vmatprep.mubr.msk.f32.mxu0 %vm3600_vm0, %v4996_v51 }
 0x67a   :  { %2921 = vmatprep.subr.mxu0 %v4996_v51  ;;  %2955 = vmatpush3.msra.mxu1 %v4550_v20 }
 0x67b   :  { %2922 = vmatpush3.msra.mxu0 %v4351_v15  ;;  %2956 = vmatprep.subr.mxu1 %v4996_v51 }
 0x67c   :  { %2923 = vmatprep.subr.mxu0 %v4996_v51  ;;  %2957 = vmatpush3.msra.mxu1 %v4556_v33 }
 0x67d   :  { %2924 = vmatpush3.msra.mxu0 %v4357_v26  ;;  %2958 = vmatprep.subr.mxu1 %v4996_v51 }
 0x67e   :  { %2925 = vmatprep.subr.mxu0 %v4996_v51  ;;  %2959 = vmatpush3.msra.mxu1 %v4562_v11 }
 0x67f   :  { %2926 = vmatpush3.msra.mxu0 %v4363_v4  ;;  %2960 = vmatprep.subr.mxu1 %v4996_v51 }
 0x680   :  { %2927 = vmatprep.subr.mxu0 %v4996_v51  ;;  %2961 = vmatpush3.msra.mxu1 %v4568_v24 }
 0x681   :  { %2928 = vmatpush3.msra.mxu0 %v4369_v19  ;;  %2962 = vmatprep.subr.mxu1 %v4996_v51 }
 0x682   :  { %2929 = vmatprep.subr.mxu0 %v4996_v51  ;;  %2963 = vmatpush3.msra.mxu1 %v4574_v60 }
 0x683   :  { %2930 = vmatpush3.msra.mxu0 %v4375_v22  ;;  %2964 = vmatprep.subr.mxu1 %v4996_v51 }
 0x684   :  { %2931 = vmatprep.subr.mxu0 %v4996_v51  ;;  %2965 = vmatpush3.msra.mxu1 %v4580_v62 }
 0x685   :  { %2932 = vmatpush3.msra.mxu0 %v4381_v43  ;;  %2966 = vmatprep.subr.mxu1 %v4996_v51 }
 0x686   :  { %2933 = vmatprep.subr.mxu0 %v4996_v51  ;;  %2967 = vmatpush3.msra.mxu1 %v4586_v1 }
 0x687   :  { %2934 = vmatpush3.msra.mxu0 %v4387_v37  ;;  %2968 = vmatprep.subr.mxu1 %v4996_v51 }
 0x688   :  { %2935 = vmatprep.subr.mxu0 %v4996_v51  ;;  %2969 = vmatpush3.msra.mxu1 %v4592_v8 }
 0x689   :  { %2936 = vmatpush3.msra.mxu0 %v4393_v40  ;;  %2970 = vmatprep.subr.mxu1 %v4996_v51 }
 0x68a   :  { %2937 = vmatprep.subr.mxu0 %v4996_v51  ;;  %2971 = vmatpush3.msra.mxu1 %v4598_v2 }
 0x68b   :  { %2938 = vmatpush3.msra.mxu0 %v4399_v48  ;;  %2972 = vmatprep.subr.mxu1 %v4996_v51 }
 0x68c   :  { %2939 = vmatprep.subr.mxu0 %v4996_v51  ;;  %2973 = vmatpush3.msra.mxu1 %v4604_v0 }
 0x68d   :  { %2940 = vmatpush3.msra.mxu0 %v4405_v53  ;;  %2974 = vmatprep.subr.mxu1 %v4996_v51 }
 0x68e   :  { %2941 = vmatprep.subr.mxu0 %v4996_v51  ;;  %2975 = vmatpush3.msra.mxu1 %v4610_v5 }
 0x68f   :  { %2942 = vmatpush3.msra.mxu0 %v4411_v54  ;;  %2976 = vmatprep.subr.mxu1 %v4996_v51 }
 0x690   :  { %2943 = vmatprep.subr.mxu0 %v4996_v51  ;;  %2977 = vmatpush3.msra.mxu1 %v4616_v3 }
 0x691   :  { %2944 = vmatpush3.msra.mxu0 %v4417_v55  ;;  %2978 = vmatprep.subr.mxu1 %v4996_v51 }
 0x692   :  { %2945 = vmatprep.subr.mxu0 %v4996_v51  ;;  %2979 = vmatpush3.msra.mxu1 %v4622_v7 }
 0x693   :  { %2946 = vmatpush3.msra.mxu0 %v4625_v6  ;;  %2980 = vmatprep.subr.mxu1 %v4996_v51 }
 0x694   :  { %2947 = vmatprep.subr.mxu0 %v4996_v51  ;;  %2981 = vmatpush3.msra.mxu1 %v4630_v9 }
 0x695   :  { %2948 = vmatpush3.msra.mxu0 %v4633_v21  ;;  %2982 = vmatprep.subr.mxu1 %v4996_v51  ;;  %v4648_v21 = vld [vmem:[#allocation22] sm:$0xff] }
 0x696   :  { %2949 = vmatprep.subr.mxu0 %v4996_v51  ;;  %2983 = vmatpush3.msra.mxu1 %v4638_v35 }
 0x697   :  { %2950 = vmatpush3.msra.mxu0 %v4641_v44  ;;  %2984 = vmatprep.subr.mxu1 %v4996_v51 }
 0x698   :  { %2952 = vmatmul.mubr.f32.vlgmr.msra.gmra.mxu0 %v4542_v10  ;;  %1999 = vmatprep.subr.mxu0 %v4284_v59  ;;  %v5055_v59 = vld [vmem:[#allocation42_spill] sm:$0xff] }
 0x699   :  { %2000 = vmatpush1.msra.mxu0 %v4287_v61  ;;  %2985 = vmatpush3.msra.mxu1 %v4648_v21  ;;  %v5056_v61 = vld [vmem:[#allocation43_spill] sm:$0xff] }
 0x69a   :  { %2001 = vmatprep.subr.mxu0 %v4291_v63  ;;  %2986 = vmatprep.mubr.msk.f32.mxu1 %vm3600_vm0, %v4996_v51  ;;  %v5057_v63 = vld [vmem:[#allocation44_spill] sm:$0xff] }
 0x69b   :  { %2002 = vmatpush1.msra.mxu0 %v4440_v56  ;;  %2063 = vmatprep.mubr.f32.mxu0 %v4996_v51 }
 0x69c   :  { %2003 = vmatprep.subr.mxu0 %v4444_v57  ;;  %2989 = vmatprep.subr.mxu1 %v4996_v51  ;;  %v1732_v57 = vld [vmem:[%s1731_s11] sm:$0x7] }
 0x69d   :  { %2004 = vmatpush1.msra.mxu0 %v4448_v58 }
 0x69e   :  { %2005 = vmatprep.subr.mxu0 %v4451_v45  ;;  %v5058_v45 = vld [vmem:[#allocation55_spill] sm:$0xff] }
 0x69f   :  { %2006 = vmatpush1.msra.mxu0 %v4454_v49 }
 0x6a0   :  { %2007 = vmatprep.subr.mxu0 %v4457_v50  ;;  %v5059_v50 = vld [vmem:[#allocation66_spill] sm:$0xff] }
 0x6a1   :  { %2008 = vmatpush1.msra.mxu0 %v4460_v14 }
 0x6a2   :  { %2009 = vmatprep.subr.mxu0 %v4463_v39 }
 0x6a3   :  { %2010 = vmatpush1.msra.mxu0 %v4466_v42 }
 0x6a4   :  { %2011 = vmatprep.subr.mxu0 %v4469_v18 }
 0x6a5   :  { %2012 = vmatpush1.msra.mxu0 %v4472_v28 }
 0x6a6   :  { %2013 = vmatprep.subr.mxu0 %v4475_v31 }
 0x6a7   :  { %2014 = vmatpush1.msra.mxu0 %v4478_v34 }
 0x6a8   :  { %2015 = vmatprep.subr.mxu0 %v4481_v17  ;;  %v1882_v17 = vrot.slane %v1732_v57, 1 }
 0x6a9   :  { %2016 = vmatpush1.msra.mxu0 %v4484_v23 }
 0x6aa   :  { %2017 = vmatprep.subr.mxu0 %v4487_v29 }
 0x6ab   :  { %2018 = vmatpush1.msra.mxu0 %v4490_v30 }
 0x6ac   :  { %2019 = vmatprep.subr.mxu0 %v4493_v16 }
 0x6ad   :  { %2020 = vmatpush1.msra.mxu0 %v4496_v25 }
 0x6ae   :  { %2021 = vmatprep.subr.mxu0 %v4499_v32 }
 0x6af   :  { %2022 = vmatpush1.msra.mxu0 %v4502_v46 }
 0x6b0   :  { %2023 = vmatprep.subr.mxu0 %v4505_v36 }
 0x6b1   :  { %2024 = vmatpush1.msra.mxu0 %v4508_v41 }
 0x6b2   :  { %2025 = vmatprep.subr.mxu0 %v4511_v27  ;;  %v1892_v27 = vrot.slane %v1732_v57, 2 }
 0x6b3   :  { %2026 = vmatpush1.msra.mxu0 %v4514_v52 }
 0x6b4   :  { %2027 = vmatprep.subr.mxu0 %v4517_v47 }
 0x6b5   :  { %2028 = vmatpush1.msra.mxu0 %v5055_v59 }
 0x6b6   :  { %2029 = vmatprep.subr.mxu0 %v5056_v61 }
 0x6b7   :  { %2030 = vmatpush1.msra.mxu0 %v5057_v63 }
 0x6b8   :  { %3024 = vmatprep.subr.mxu0 %v4996_v51 }
 0x738   :  { %v1700_v56 = vpop.f32.mrf.mxu0  ;;  %v1799_v58 = vpop.f32.mrf.mxu1 }
 0x739   :  { %v4687_v49 = vadd.f32 %v1700_v56, %v5058_v45  ;;  %v1800_v14 = vadd.f32 %v1799_v58, %v5059_v50 }
 0x73a   :  { %v2918_v39 = vpop.f32.mrf.mxu0  ;;  %v1801_v42 = vpop.f32.mrf.mxu1 }
 0x73b   :  { %v1874_v18 = vadd.f32 %v1800_v14, %v1732_v57  ;;  %v4692_v28 = vsel %vm568_vm1, %v4687_v49, -inf  ;;  %v1802_v34 = vadd.f32 %v1801_v42, %v4083_v38 }
 0x73c   :  { %1705 = vmax.xlane.f32.xlu1 %v4692_v28 }
 0x73d   :  { %v2376_v31 = vmul.f32 -1.442695, %v1874_v18  ;;  %v1884_v23 = vadd.f32 %v1882_v17, %v1802_v34 }
 0x73f   :  { %3140 = vpow2.f32 %v2376_v31  ;;  %v2377_v29 = vmul.f32 -1.442695, %v1884_v23 }
 0x741   :  { %3142 = vpow2.f32 %v2377_v29 }
 0x74c   :  { %v3141_v30 = vpop.eup %3140 }
 0x74d   :  { %v1878_v16 = vadd.f32 1.0, %v3141_v30 }
 0x74e   :  { %v3143_v25 = vpop.eup %3142 }
 0x74f   :  { %3144 = vrcp.f32 %v1878_v16  ;;  %v1888_v46 = vadd.f32 1.0, %v3143_v25 }
 0x751   :  { %3146 = vrcp.f32 %v1888_v46  ;;  %v5063_v46 = vlaneseq }
 0x758   :  { %v1870_v32 = vpop.f32.mrf.mxu0 }
 0x759   :  { %v1871_v41 = vadd.f32 %v1870_v32, %v4089_v13 }
 0x75a   :  { %v2953_v36 = vpop.f32.mrf.mxu0 }
 0x75b   :  { %v4803_v36 = vand.u32 127, %v5063_v46 }
 0x75c   :  { %v3145_v52 = vpop.eup %3144 }
 0x75d   :  { %v1891_v47 = vmul.f32 %v3145_v52, %v1871_v41  ;;  %v1451_v52 = vstv %s2370_s9 }
 0x75e   :  { %v3147_v61 = vpop.eup %3146  ;;  %vm1452_vm3 = vcmp.eq.s32.totalorder %v4803_v36, %v1451_v52 }
 0x75f   :  { %v1894_v59 = vadd.f32 %v1892_v27, %v1891_v47  ;;  %v1896_v63 = vsub.f32 1.0, %v3147_v61  ;;  %v1898_v45 = vmul.f32 %v3147_v61, %v4542_v10  ;;  %v1983_v61 = vstv %s2378_s10 }
 0x760   :  { %vm1984_vm4 = vcmp.eq.s32.totalorder %v4803_v36, %v1983_v61 }
 0x761   :  { %3148 = vtanh.f32 %v1894_v59 }
 0x76e   :  { %v3149_v56 = vpop.eup %3148 }
 0x76f   :  { %v1897_v58 = vmul.f32 %v3149_v56, %v1896_v63 }
 0x771   :  { %v4698_v14 = vadd.f32 %v1898_v45, %v1897_v58 }
 0x773   :  { %2987 = vmatmul.mubr.f32.vlgmr.msra.gmra.mxu1 %v4698_v14  ;;  %2064 = vmatmul.mubr.f32.vlgmr.msra.gmra.mxu0 %v4698_v14 }
 0x774   :  { %2990 = vmatpush3.msra.mxu1 %v4344_v12  ;;  %3021 = vmatprep.mubr.msk.f32.mxu1 %vm3600_vm0, %v4996_v51  ;;  %v5060_v12 = vld [vmem:[#allocation47_spill] sm:$0xff] }
 0x775   :  { %2991 = vmatprep.subr.mxu1 %v4996_v51  ;;  %3025 = vmatpush3.msra.mxu0 %v4550_v20 }
 0x776   :  { %2992 = vmatpush3.msra.mxu1 %v4351_v15  ;;  %3026 = vmatprep.subr.mxu0 %v4996_v51  ;;  %v4769_v15 = vpop.xlane.xlu0 %907 }
 0x777   :  { %2993 = vmatprep.subr.mxu1 %v4996_v51  ;;  %3027 = vmatpush3.msra.mxu0 %v4556_v33 }
 0x778   :  { %2994 = vmatpush3.msra.mxu1 %v4357_v26  ;;  %3028 = vmatprep.subr.mxu0 %v4996_v51  ;;  %v5061_v26 = vld [vmem:[#allocation58_spill] sm:$0xff] }
 0x779   :  { %2995 = vmatprep.subr.mxu1 %v4996_v51  ;;  %3029 = vmatpush3.msra.mxu0 %v4562_v11 }
 0x77a   :  { %2996 = vmatpush3.msra.mxu1 %v4363_v4  ;;  %3030 = vmatprep.subr.mxu0 %v4996_v51  ;;  %v909_v4 = vsub.f32 %v5061_v26, %v4769_v15  ;;  %v4796_v16 = vpop.xlane.xlu0 %1173 }
 0x77b   :  { %2997 = vmatprep.subr.mxu1 %v4996_v51  ;;  %3031 = vmatpush3.msra.mxu0 %v4568_v24 }
 0x77c   :  { %2998 = vmatpush3.msra.mxu1 %v4369_v19  ;;  %3032 = vmatprep.subr.mxu0 %v4996_v51  ;;  %v4773_v19 = vpop.xlane.xlu1 %1439 }
 0x77d   :  { %2999 = vmatprep.subr.mxu1 %v4996_v51  ;;  %3033 = vmatpush3.msra.mxu0 %v4574_v60 }
 0x77e   :  { %3000 = vmatpush3.msra.mxu1 %v4375_v22  ;;  %3034 = vmatprep.subr.mxu0 %v4996_v51  ;;  %v910_v22 = vmul.f32 1.442695, %v909_v4  ;;  %v5066_v4 = vld [vmem:[#allocation64_spill] sm:$0xff] }
 0x77f   :  { %3001 = vmatprep.subr.mxu1 %v4996_v51  ;;  %3035 = vmatpush3.msra.mxu0 %v4580_v62 }
 0x780   :  { %3002 = vmatpush3.msra.mxu1 %v4381_v43  ;;  %3036 = vmatprep.subr.mxu0 %v4996_v51  ;;  %v5062_v43 = vld [vmem:[#allocation45_spill] sm:$0xff]  ;;  %3150 = vpow2.f32 %v910_v22  ;;  %v1175_v22 = vsub.f32 %v5066_v4, %v4796_v16 }
 0x781   :  { %3003 = vmatprep.subr.mxu1 %v4996_v51  ;;  %3037 = vmatpush3.msra.mxu0 %v4586_v1  ;;  %v1453_v56 = vsel %vm1452_vm3, %v5062_v43, 0.0 }
 0x782   :  { %3004 = vmatpush3.msra.mxu1 %v4387_v37  ;;  %3038 = vmatprep.subr.mxu0 %v4996_v51  ;;  %v1441_v37 = vsub.f32 %v5062_v43, %v4773_v19  ;;  %v1454_v58 = vsel %vm568_vm1, %v1453_v56, 0.0 }
 0x783   :  { %3005 = vmatprep.subr.mxu1 %v4996_v51  ;;  %3039 = vmatpush3.msra.mxu0 %v4592_v8 }
 0x784   :  { %3006 = vmatpush3.msra.mxu1 %v4393_v40  ;;  %3040 = vmatprep.subr.mxu0 %v4996_v51  ;;  %v1442_v40 = vmul.f32 1.442695, %v1441_v37  ;;  %v1176_v37 = vmul.f32 1.442695, %v1175_v22 }
 0x785   :  { %3007 = vmatprep.subr.mxu1 %v4996_v51  ;;  %3041 = vmatpush3.msra.mxu0 %v4598_v2 }
 0x786   :  { %3008 = vmatpush3.msra.mxu1 %v4399_v48  ;;  %3042 = vmatprep.subr.mxu0 %v4996_v51  ;;  %3152 = vpow2.f32 %v1442_v40 }
 0x787   :  { %3009 = vmatprep.subr.mxu1 %v4996_v51  ;;  %3043 = vmatpush3.msra.mxu0 %v4604_v0 }
 0x788   :  { %3010 = vmatpush3.msra.mxu1 %v4405_v53  ;;  %3044 = vmatprep.subr.mxu0 %v4996_v51  ;;  %v1998_v53 = vld [vmem:[%s1997_s29] sm:$0x7] }
 0x789   :  { %3011 = vmatprep.subr.mxu1 %v4996_v51  ;;  %3045 = vmatpush3.msra.mxu0 %v4610_v5  ;;  %v2148_v8 = vrot.slane %v1998_v53, 1 }
 0x78a   :  { %3012 = vmatpush3.msra.mxu1 %v4411_v54  ;;  %3046 = vmatprep.subr.mxu0 %v4996_v51  ;;  %v4780_v54 = vld [vmem:[%s4886_s15] sm:$0x1]  ;;  %s918_s15 = sld [smem:[#allocation8]] }
 0x78b   :  { %3013 = vmatprep.subr.mxu1 %v4996_v51  ;;  %3047 = vmatpush3.msra.mxu0 %v4616_v3 }
 0x78c   :  { %3014 = vmatpush3.msra.mxu1 %v4417_v55  ;;  %3048 = vmatprep.subr.mxu0 %v4996_v51 }
 0x78d   :  { %3015 = vmatprep.subr.mxu1 %v4996_v51  ;;  %3049 = vmatpush3.msra.mxu0 %v4622_v7  ;;  %v3151_v60 = vpop.eup %3150 }
 0x78e   :  { %3016 = vmatpush3.msra.mxu1 %v4625_v6  ;;  %3050 = vmatprep.subr.mxu0 %v4996_v51  ;;  %v912_v2 = vsel %vm568_vm1, %v3151_v60, 0.0 }
 0x78f   :  { %3017 = vmatprep.subr.mxu1 %v4996_v51  ;;  %3051 = vmatpush3.msra.mxu0 %v4630_v9 }
 0x790   :  { %3018 = vmatpush3.msra.mxu1 %v5060_v12  ;;  %3052 = vmatprep.subr.mxu0 %v4996_v51  ;;  %v919_v41 = vstv %s918_s15  ;;  %v5064_v12 = vld [vmem:[#allocation61_spill] sm:$0xff] }
 0x791   :  { %3019 = vmatprep.subr.mxu1 %v4996_v51  ;;  %3053 = vmatpush3.msra.mxu0 %v4638_v35  ;;  %vm920_vm2 = vcmp.eq.s32.totalorder %v4803_v36, %v919_v41 }
 0x792   :  { %3020 = vmatpush3.msra.mxu1 %v4641_v44  ;;  %3054 = vmatprep.subr.mxu0 %v4996_v51  ;;  %v921_v59 = vsel %vm920_vm2, %v5061_v26, 0.0  ;;  %v5065_v26 = vld [vmem:[#allocation41_spill] sm:$0xff] }
 0x793   :  { %3022 = vmatmul.mubr.f32.vlgmr.msra.gmra.mxu1 %v4698_v14  ;;  %3055 = vmatpush3.msra.mxu0 %v4648_v21  ;;  %v3153_v0 = vpop.eup %3152  ;;  %v922_v63 = vsel %vm568_vm1, %v921_v59, 0.0 }
 0x794   :  { %3056 = vmatprep.mubr.msk.f32.mxu0 %vm3600_vm0, %v4996_v51  ;;  %v1444_v3 = vsel %vm568_vm1, %v3153_v0, 0.0 }
 0x7c5   :  { %v4820_v43 = vpop.xlane.xlu1 %1705 }
 0x7c6   :  { %v1707_v40 = vsub.f32 %v4687_v49, %v4820_v43 }
 0x833   :  { %v1966_v48 = vpop.f32.mrf.mxu1  ;;  %v2065_v51 = vpop.f32.mrf.mxu0 }
 0x834   :  { %v4783_v55 = vadd.f32 %v4780_v54, %v1966_v48  ;;  %v2066_v10 = vadd.f32 %v2065_v51, %v5059_v50  ;;  %v2158_v50 = vrot.slane %v1998_v53, 2  ;;  %v1708_v48 = vmul.f32 1.442695, %v1707_v40 }
 0x835   :  { %v2988_v20 = vpop.f32.mrf.mxu1  ;;  %v2067_v33 = vpop.f32.mrf.mxu0 }
 0x836   :  { %v2140_v11 = vadd.f32 %v2066_v10, %v1998_v53  ;;  %v4788_v24 = vsel %vm568_vm1, %v4783_v55, -inf  ;;  %v2068_v1 = vadd.f32 %v2067_v33, %v4083_v38  ;;  %v1985_v45 = vsel %vm1984_vm4, %v4783_v55, 0.0 }
 0x837   :  { %1971 = vmax.xlane.f32.xlu0 %v4788_v24 }
 0x838   :  { %v2380_v62 = vmul.f32 -1.442695, %v2140_v11  ;;  %v2150_v5 = vadd.f32 %v2148_v8, %v2068_v1 }
 0x83a   :  { %3154 = vpow2.f32 %v2380_v62  ;;  %v2381_v7 = vmul.f32 -1.442695, %v2150_v5 }
 0x83b   :  { %913 = vadd.xlane.f32.xlu0 %v912_v2  ;;  %v1717_v2 = vstv %s2374_s1 }
 0x83c   :  { %3156 = vpow2.f32 %v2381_v7  ;;  %vm1718_vm6 = vcmp.eq.s32.totalorder %v4803_v36, %v1717_v2 }
 0x83d   :  { %v1719_v7 = vsel %vm1718_vm6, %v4687_v49, 0.0 }
 0x83f   :  { %1445 = vadd.xlane.f32.xlu0 %v1444_v3 }
 0x847   :  { %v3155_v6 = vpop.eup %3154 }
 0x848   :  { %v2144_v9 = vadd.f32 1.0, %v3155_v6  ;;  %v2249_v6 = vstv %s2382_s2 }
 0x849   :  { %v3157_v21 = vpop.eup %3156  ;;  %vm2250_vm7 = vcmp.eq.s32.totalorder %v4803_v36, %v2249_v6 }
 0x84a   :  { %3158 = vrcp.f32 %v2144_v9  ;;  %v2154_v44 = vadd.f32 1.0, %v3157_v21  ;;  %v1720_v9 = vsel %vm568_vm1, %v1719_v7, 0.0  ;;  %v5067_v21 = vld [vmem:[#allocation65_spill] sm:$0xff] }
 0x84c   :  { %3160 = vrcp.f32 %v2154_v44 }
 0x853   :  { %v2136_v35 = vpop.f32.mrf.mxu1 }
 0x854   :  { %v2137_v38 = vadd.f32 %v2136_v35, %v4089_v13  ;;  %v569_v35 = vsel %vm568_vm1, %v5067_v21, 0.0 }
 0x855   :  { %v3023_v57 = vpop.f32.mrf.mxu1 }
 0x857   :  { %v3159_v39 = vpop.eup %3158 }
 0x858   :  { %v2157_v42 = vmul.f32 %v3159_v39, %v2137_v38  ;;  %v5068_v38 = vld [vmem:[#allocation46_spill] sm:$0xff] }
 0x859   :  { %v3161_v31 = vpop.eup %3160 }
 0x85a   :  { %v2160_v18 = vadd.f32 %v2158_v50, %v2157_v42  ;;  %v2162_v34 = vsub.f32 1.0, %v3161_v31  ;;  %v2164_v29 = vmul.f32 %v3161_v31, %v4698_v14  ;;  %v1986_v14 = vsel %vm568_vm1, %v1985_v45, 0.0 }
 0x85c   :  { %3162 = vtanh.f32 %v2160_v18 }
 0x869   :  { %v3163_v17 = vpop.eup %3162 }
 0x86a   :  { %v2163_v23 = vmul.f32 %v3163_v17, %v2162_v34 }
 0x86c   :  { %v2165_v30 = vadd.f32 %v2164_v29, %v2163_v23 }
 0x86e   :  { %3057 = vmatmul.mubr.f32.vlgmr.msra.gmra.mxu0 %v2165_v30 }
 0x8c0   :  { %v4798_v25 = vpop.xlane.xlu0 %1971 }
 0x8c1   :  { %v1973_v13 = vsub.f32 %v4783_v55, %v4798_v25 }
 0x8c3   :  { %v1974_v32 = vmul.f32 1.442695, %v1973_v13 }
 0x8c5   :  { %3164 = vpow2.f32 %v1974_v32 }
 0x8c6   :  { %3166 = vpow2.f32 %v1176_v37 }
 0x8c7   :  { %3168 = vpow2.f32 %v1708_v48 }
 0x8d2   :  { %v3165_v27 = vpop.eup %3164 }
 0x8d3   :  { %v1976_v47 = vsel %vm568_vm1, %v3165_v27, 0.0  ;;  %v3167_v20 = vpop.eup %3166 }
 0x8d4   :  { %1977 = vadd.xlane.f32.xlu0 %v1976_v47  ;;  %v3169_v33 = vpop.eup %3168 }
 0x8d5   :  { %v1710_v11 = vsel %vm568_vm1, %v3169_v33, 0.0 }
 0x8d8   :  { %923 = vadd.xlane.f32.xlu0 %v922_v63 }
 0x8dc   :  { %1455 = vadd.xlane.f32.xlu0 %v1454_v58 }
 0x8e0   :  { %1987 = vadd.xlane.f32.xlu0 %v1986_v14 }
 0x8e4   :  { %927 = vmax.index.xlane.f32.xlu0 %v5064_v12 }
 0x8e8   :  { %1193 = vmax.index.xlane.f32.xlu0 %v5065_v26 }
 0x8ec   :  { %1725 = vmax.index.xlane.f32.xlu0 %v4692_v28  ;;  %v1178_v28 = vsel %vm568_vm1, %v3167_v20, 0.0 }
 0x92e   :  { %v2232_v53 = vpop.f32.mrf.mxu0 }
 0x92f   :  { %v2233_v51 = vadd.f32 %v4780_v54, %v2232_v53  ;;  %v1185_v54 = vstv %s2366_s12 }
 0x930   :  { %v3058_v55 = vpop.f32.mrf.mxu0  ;;  %vm1186_vm5 = vcmp.eq.s32.totalorder %v4803_v36, %v1185_v54 }
 0x931   :  { %v2236_v10 = vsel %vm568_vm1, %v2233_v51, -inf  ;;  %v1187_v5 = vsel %vm1186_vm5, %v5066_v4, 0.0  ;;  %v2251_v44 = vsel %vm2250_vm7, %v2233_v51, 0.0 }
 0x932   :  { %2257 = vmax.index.xlane.f32.xlu0 %v2236_v10  ;;  %2237 = vmax.xlane.f32.xlu1 %v2236_v10  ;;  %v1188_v3 = vsel %vm568_vm1, %v1187_v5, 0.0  ;;  %v2252_v57 = vsel %vm568_vm1, %v2251_v44, 0.0 }
 0x936   :  { %1179 = vadd.xlane.f32.xlu1 %v1178_v28 }
 0x93a   :  { %1711 = vadd.xlane.f32.xlu1 %v1710_v11 }
 0x9bb   :  { %v4828_v60 = vpop.xlane.xlu1 %2237 }
 0x9bc   :  { %v2239_v62 = vsub.f32 %v2233_v51, %v4828_v60 }
 0x9be   :  { %v2240_v1 = vmul.f32 1.442695, %v2239_v62 }
 0x9c0   :  { %3170 = vpow2.f32 %v2240_v1 }
 0x9cd   :  { %v3171_v8 = vpop.eup %3170 }
 0x9ce   :  { %v2242_v0 = vsel %vm568_vm1, %v3171_v8, 0.0 }
 0x9cf   :  { %2243 = vadd.xlane.f32.xlu1 %v2242_v0 }
 0x9d3   :  { %1189 = vadd.xlane.f32.xlu1 %v1188_v3 }
 0x9d7   :  { %1721 = vadd.xlane.f32.xlu1 %v1720_v9 }
 0x9db   :  { %570 = vadd.xlane.f32.xlu1 %v569_v35 }
 0x9df   :  { %2253 = vadd.xlane.f32.xlu1 %v2252_v57 }
 0x9e3   :  { %1459 = vmax.index.xlane.f32.xlu1 %v5068_v38 }
 0x9e7   :  { %1991 = vmax.index.xlane.f32.xlu1 %v4788_v24 }
 0x9e8   :  { %3468 = shalt.err (!%p3465_p12)
}
 0x9e9   :  { %2287 = dma.vmem_to_hbm [thread:$0]  %s2285_s13, 16, %s4888_s17, [#allocation25]  }
 0x9ea   :  { %s3602_s30 = smov [#allocation23]  }
 0x9eb   :  { %s2274_s26 = sshll.u32 %s3602_s30, 4  ;;  %s2275_s26 = int_to_ptr.vmem [resolvable:$true] %s2274_s26 }
 0x9ec   :  { %s3477_s6 = scalar_lea.vmem %s2275_s26, 16  ;;  %s3481_s24 = scalar_lea.vmem %s2275_s26, 32 }
 0x9ed   :  { %p3478_p13 = scmp.ne.s32.totalorder %s2275_s26, %s3477_s6  ;;  %p3482_p0 = scmp.lt.s32.totalorder %s2275_s26, %s2275_s26 }
 0x9ee   :  { %p3483_p1 = scmp.lt.s32.totalorder %s3481_s24, %s3477_s6 }
 0x9f0   :  { %p3484_p2 = por %p3483_p1, %p3482_p0 }
 0x9f2   :  { %p3485_p3 = pnand %p3484_p2, %p3478_p13 }
 0x9f4   :  { %3488 = shalt.err (!%p3485_p3)
}
 0x9f5   :  { %2277 = dma.vmem_to_hbm [thread:$0]  %s2275_s26, 16, %s4887_s16, [#allocation4]   ;;  %v914_v49 = vpop.xlane.xlu0 %913  ;;  %v1180_v24 = vpop.xlane.xlu1 %1179  ;;  %vm929_vm8 = vcmp.eq.s32.totalorder %v4803_v36, 0 }
 0x9f6   :  { %3172 = vlog2.f32 %v914_v49  ;;  %s3603_s16 = smov [#allocation27]  }
 0x9f7   :  { %3174 = vlog2.f32 %v1180_v24  ;;  %s2304_s17 = sshll.u32 %s3603_s16, 4  ;;  %s2305_s17 = int_to_ptr.vmem [resolvable:$true] %s2304_s17 }
 0x9f8   :  { %s3497_s22 = scalar_lea.vmem %s2305_s17, 16  ;;  %s3501_s28 = scalar_lea.vmem %s2305_s17, 32 }
 0x9f9   :  { %v1446_v50 = vpop.xlane.xlu0 %1445  ;;  %v1712_v42 = vpop.xlane.xlu1 %1711  ;;  %p3498_p4 = scmp.ne.s32.totalorder %s2305_s17, %s3497_s22  ;;  %p3502_p5 = scmp.lt.s32.totalorder %s2305_s17, %s2305_s17 }
 0x9fa   :  { %3176 = vlog2.f32 %v1446_v50  ;;  %p3503_p6 = scmp.lt.s32.totalorder %s3501_s28, %s3497_s22 }
 0x9fb   :  { %3178 = vlog2.f32 %v1712_v42 }
 0x9fc   :  { %p3504_p7 = por %p3503_p6, %p3502_p5 }
 0x9fd   :  { %v1978_v39 = vpop.xlane.xlu0 %1977 }
 0x9fe   :  { %3180 = vlog2.f32 %v1978_v39  ;;  %p3505_p8 = pnand %p3504_p7, %p3498_p4 }
 0xa01   :  { %v924_v18 = vpop.xlane.xlu0 %923 }
 0xa03   :  { %v3173_v31 = vpop.eup %3172 }
 0xa04   :  { %v3175_v34 = vpop.eup %3174  ;;  %v916_v23 = vmul.f32 0.6931472, %v3173_v31 }
 0xa05   :  { %v1456_v17 = vpop.xlane.xlu0 %1455  ;;  %v1182_v29 = vmul.f32 0.6931472, %v3175_v34 }
 0xa06   :  { %v917_v41 = vadd.f32 %v916_v23, %v4769_v15 }
 0xa07   :  { %v3177_v30 = vpop.eup %3176  ;;  %v1183_v52 = vadd.f32 %v1182_v29, %v4796_v16 }
 0xa08   :  { %v3179_v32 = vpop.eup %3178  ;;  %v1448_v46 = vmul.f32 0.6931472, %v3177_v30  ;;  %v925_v59 = vsub.f32 %v917_v41, %v924_v18 }
 0xa09   :  { %v1988_v27 = vpop.xlane.xlu0 %1987  ;;  %v1714_v61 = vmul.f32 0.6931472, %v3179_v32 }
 0xa0a   :  { %v1449_v58 = vadd.f32 %v1448_v46, %v4773_v19 }
 0xa0b   :  { %v3181_v56 = vpop.eup %3180  ;;  %v1715_v22 = vadd.f32 %v1714_v61, %v4820_v43 }
 0xa0c   :  { %v1980_v12 = vmul.f32 0.6931472, %v3181_v56  ;;  %v1457_v26 = vsub.f32 %v1449_v58, %v1456_v17 }
 0xa0d   :  { %v928_v4 = vpop.xlane.xlu0 %927 }
 0xa0e   :  { %v1981_v16 = vadd.f32 %v1980_v12, %v4798_v25 }
 0xa11   :  { %v1194_v51 = vpop.xlane.xlu0 %1193 }
 0xa58   :  { %v2244_v13 = vpop.xlane.xlu1 %2243 }
 0xa59   :  { %3182 = vlog2.f32 %v2244_v13 }
 0xa5c   :  { %v1190_v47 = vpop.xlane.xlu1 %1189 }
 0xa5d   :  { %v1191_v63 = vsub.f32 %v1183_v52, %v1190_v47 }
 0xa5f   :  { %v1192_v45 = vadd.f32 %v1191_v63, %v925_v59 }
 0xa60   :  { %v1722_v14 = vpop.xlane.xlu1 %1721 }
 0xa61   :  { %v1458_v15 = vadd.f32 %v1457_v26, %v1192_v45  ;;  %v1723_v37 = vsub.f32 %v1715_v22, %v1722_v14 }
 0xa63   :  { %v1724_v19 = vadd.f32 %v1723_v37, %v1458_v15 }
 0xa64   :  { %v571_v40 = vpop.xlane.xlu1 %570 }
 0xa65   :  { %v572_v48 = vmul.f32 -0.5, %v571_v40 }
 0xa66   :  { %v3183_v53 = vpop.eup %3182 }
 0xa67   :  { %v2246_v55 = vmul.f32 0.6931472, %v3183_v53  ;;  %2266 = vst [vmem:[#allocation27] sm:$0x1] %v572_v48 }
 0xa68   :  { %v2254_v10 = vpop.xlane.xlu1 %2253 }
 0xa69   :  { %3508 = shalt.err (!%p3505_p8)
}
 0xa6a   :  { %2307 = dma.vmem_to_hbm [thread:$0]  %s2305_s17, 16, %s4890_s19, [#allocation28]   ;;  %v1989_v25 = vsub.f32 %v1981_v16, %v1988_v27  ;;  %vm1195_vm9 = vcmp.eq.s32.totalorder %v4803_v36, 1  ;;  %v2247_v43 = vadd.f32 %v2246_v55, %v4828_v60  ;;  %vm1461_vm10 = vcmp.eq.s32.totalorder %v4803_v36, 2  ;;  %v1726_v1 = vpop.xlane.xlu0 %1725 }
 0xa6b   :  { %v930_v20 = vsel %vm929_vm8, %v928_v4, 0  ;;  %s3604_s4 = smov [#allocation29]   ;;  %v2261_v54 = vmul.f32 0.06, %v572_v48  ;;  %vm1727_vm11 = vcmp.eq.s32.totalorder %v4803_v36, 3  ;;  %vm1993_vm12 = vcmp.eq.s32.totalorder %v4803_v36, 4 }
 0xa6c   :  { %v1990_v28 = vadd.f32 %v1989_v25, %v1724_v19  ;;  %v2255_v33 = vsub.f32 %v2247_v43, %v2254_v10  ;;  %v1196_v11 = vsel %vm1195_vm9, %v1194_v51, %v930_v20  ;;  %v1460_v62 = vpop.xlane.xlu1 %1459  ;;  %s2314_s29 = sshll.u32 %s3604_s4, 4  ;;  %s3605_s19 = smov [#allocation26]   ;;  %vm2259_vm13 = vcmp.eq.s32.totalorder %v4803_v36, 5  ;;  %s2315_s29 = int_to_ptr.vmem [resolvable:$true] %s2314_s29 }
 0xa6d   :  { %v1462_v2 = vsel %vm1461_vm10, %v1460_v62, %v1196_v11  ;;  %s2294_s0 = sshll.u32 %s3605_s19, 4  ;;  %s3517_s8 = scalar_lea.vmem %s2315_s29, 16  ;;  %s2295_s0 = int_to_ptr.vmem [resolvable:$true] %s2294_s0 }
 0xa6e   :  { %v2256_v8 = vadd.f32 %v2255_v33, %v1990_v28  ;;  %v1728_v0 = vsel %vm1727_vm11, %v1726_v1, %v1462_v2  ;;  %v2258_v3 = vpop.xlane.xlu0 %2257  ;;  %p3518_p9 = scmp.ne.s32.totalorder %s2315_s29, %s3517_s8  ;;  %s3521_s15 = scalar_lea.vmem %s2315_s29, 32 }
 0xa6f   :  { %p3522_p10 = scmp.lt.s32.totalorder %s2315_s29, %s2315_s29  ;;  %p3523_p11 = scmp.lt.s32.totalorder %s3521_s15, %s3517_s8 }
 0xa70   :  { %v2262_v60 = vadd.f32 %v2261_v54, %v2256_v8  ;;  %v1992_v5 = vpop.xlane.xlu1 %1991 }
 0xa71   :  { %v1994_v7 = vsel %vm1993_vm12, %v1992_v5, %v1728_v0  ;;  %p3524_p12 = por %p3523_p11, %p3522_p10 }
 0xa72   :  { %2267 = vst [vmem:[#allocation29] sm:$0x1] %v2262_v60  ;;  %v2260_v6 = vsel %vm2259_vm13, %v2258_v3, %v1994_v7 }
 0xa73   :  { %p3525_p13 = pnand %p3524_p12, %p3518_p9 }
 0xa75   :  { %3528 = shalt.err (!%p3525_p13)
}
 0xa76   :  { %2317 = dma.vmem_to_hbm [thread:$0]  %s2315_s29, 16, %s4891_s20, [#allocation28]   ;;  %2265 = vst [vmem:[#allocation26] sm:$0x1] %v2260_v6 }
 0xa77   :  { %s3537_s12 = scalar_lea.vmem %s2295_s0, 16  ;;  %s3541_s1 = scalar_lea.vmem %s2295_s0, 32 }
 0xa78   :  { %p3538_p0 = scmp.ne.s32.totalorder %s2295_s0, %s3537_s12  ;;  %p3542_p1 = scmp.lt.s32.totalorder %s2295_s0, %s2295_s0 }
 0xa79   :  { %p3543_p2 = scmp.lt.s32.totalorder %s3541_s1, %s3537_s12 }
 0xa7b   :  { %p3544_p3 = por %p3543_p2, %p3542_p1 }
 0xa7d   :  { %p3545_p4 = pnand %p3544_p3, %p3538_p0 }
 0xa7f   :  { %3548 = shalt.err (!%p3545_p4)
}
 0xa80   :  { %2297 = dma.vmem_to_hbm [thread:$0]  %s2295_s0, 16, %s4889_s18, [#allocation25]  }
 0xa81   :  { %3573 = dma.done.wait [#allocation4], 16  }
 0xa82   :  { %3574 = vsyncadd [#allocation4], 4294967280 }
 0xa83   :  { %3575 = dma.done.wait [#allocation25], 32  }
 0xa84   :  { %3576 = vsyncadd [#allocation25], 4294967264 }
 0xa85   :  { %3577 = dma.done.wait [#allocation28], 32  }
 0xa86   :  { %3578 = vsyncadd [#allocation28], 4294967264 }
 0xa87   :  { %2333 = vsyncpa [#allocation3], 1 }
 0xa88   :  { %2334 = vsyncpa [#allocation12], 1 }
 0xa89   :  { %2335 = vsyncpa [#allocation15], 1 }
 0xa8a   :  { %2336 = vsyncpa [#allocation18], 1 }
 0xa8b   :  { %2337 = vsyncpa [#allocation21], 1 }
 0xa8c   :  { %2338 = vsyncpa [#allocation4], 1 }
 0xa8d   :  { %2339 = vsyncpa [#allocation25], 1 }
 0xa8e   :  { %2340 = vsyncpa [#allocation28], 1 }
 0xa8f   :  { %2341 = vsyncpa [#allocation5], 1 }
 0xa90   :  { %2342 = vsyncpa [#allocation9], 1 }
 0xa91   :  { %2343 = vsyncpa [#allocation6], 1 }

</bundles_post_ra>
